<compile_context>
chip_gen: v7x
topology: tpu7x:2x2x1
jax: 0.10.0
libtpu: 0.0.40
codegen_flags: <defaults>
</compile_context>

<pallas_src>
import math
import numpy as np
import jax
import jax.numpy as jnp
from jax import lax
from jax.experimental import pallas as pl
from jax.experimental.pallas import tpu as pltpu

# ------- algorithm constants (Features/ChannelFeatures __init__ with mode='local') -------
STRIDE = (4, 4)                  # mode == 'local'
MASK = (17, 17)                  # mode == 'local'
BINS = (-1.5, -0.5, 0.5, 1.5)    # module arg `bins`
DIST = (1,)                      # module arg `dist`
THETA = (0.0,)                   # module arg `theta`

MH, MW = MASK
NPIX = MH * MW                   # 289 pixels per window
INV_NPIX = 1.0 / float(NPIX)
# TODO(synk): reference uses data-dependent levels = len(set(window)); we use the fixed
#             maximum level count implied by np.digitize, LEVELS = len(bins) + 1.
LEVELS = len(BINS) + 1
# skimage graycomatrix pixel-pair offsets: (round(sin(theta)*d), round(cos(theta)*d))
OFFSETS = tuple((int(round(math.sin(t) * d)), int(round(math.cos(t) * d)))
                for d in DIST for t in THETA)
OFF_SHIFT = tuple(dr * MW + dc for dr, dc in OFFSETS)   # flat-pixel shift to the neighbour
N_OFF = len(OFFSETS)
N_GLCM = 5 * N_OFF               # contrast, homogeneity, energy, correlation, entropy
NFEAT = 4 + LEVELS + N_GLCM      # [mean, std, maxn, minn] + hist + glcm props

CHUNK = 128                      # windows per inner-loop step (one lane tile)
TILE = 8                         # pixel rows per sublane tile
N_TILES = -(-NPIX // TILE)       # 37 pixel tiles per window
NPIX_PAD = (N_TILES + 1) * TILE  # 304: one spare tile so the 16-row neighbour slab never reads OOB
MAX_WB = 2048                    # windows per grid step (DMA block, multiple of CHUNK)

assert all(0 <= dr < MH and 0 <= dc < MW for dr, dc in OFFSETS)
assert all(1 <= s <= TILE for s in OFF_SHIFT), "neighbour must live within one extra sublane tile"


def _features_kernel(wins_ref, out_ref):
    """wins_ref: (NPIX_PAD, WB) f32  -- pixels on sublanes, windows on lanes.
       out_ref : (NFEAT,  WB) f32  -- one lane-dense row per feature."""
    wb = wins_ref.shape[1]
    nch = wb // CHUNK
    nbins = len(BINS)
    idx = list(range(LEVELS))
    pairs = [(i, j) for i in idx for j in idx if i <= j]          # 15 upper-triangle pairs

    # loop-invariant sublane index 0..7 (hoisted; int iota -> f32 convert)
    sub8 = lax.broadcasted_iota(jnp.int32, (TILE, CHUNK), 0).astype(jnp.float32)

    def chunk_body(ci, carry):
        col = pl.multiple_of(ci * CHUNK, CHUNK)

        # ---------------- pass 1 : raw-window statistics (streaming accumulators) -----------
        def stat_body(t, c):
            s, sq, mn, mx = c
            r0 = pl.multiple_of(t * TILE, TILE)
            w = wins_ref[pl.ds(r0, TILE), pl.ds(col, CHUNK)]       # (8, CHUNK)
            pix = sub8 + (t * TILE).astype(jnp.float32)
            ok = pix < float(NPIX)
            s = s + jnp.where(ok, w, 0.0)
            sq = sq + jnp.where(ok, w * w, 0.0)
            mn = jnp.minimum(mn, jnp.where(ok, w, jnp.inf))
            mx = jnp.maximum(mx, jnp.where(ok, w, -jnp.inf))
            return s, sq, mn, mx

        zero8 = jnp.zeros((TILE, CHUNK), jnp.float32)
        s, sq, mn, mx = lax.fori_loop(
            0, N_TILES, stat_body,
            (zero8, zero8,
             jnp.full((TILE, CHUNK), jnp.inf, jnp.float32),
             jnp.full((TILE, CHUNK), -jnp.inf, jnp.float32)))

        S = jnp.sum(s, axis=0, keepdims=True)                      # (1, CHUNK)
        SQ = jnp.sum(sq, axis=0, keepdims=True)
        MN = jnp.min(mn, axis=0, keepdims=True)
        MX = jnp.max(mx, axis=0, keepdims=True)

        mean = S * INV_NPIX
        var = jnp.maximum(SQ * INV_NPIX - mean * mean, 0.0)
        std = jnp.sqrt(var)
        inv_std = lax.rsqrt(var)          # inf for flat windows -> inf/nan like the NumPy reference
        maxn = (MX - mean) * inv_std
        minn = (mean - MN) * inv_std

        # quantize() thresholds, expressed in the normalized space n = (x - mean) * inv_std.
        # TODO(synk): the reference re-measures mean/std of the [0,1]-mapped image; that
        #             renormalization is folded algebraically here (identical up to FP rounding).
        u = std * inv_std                 # ~= 1.0 (NaN for flat windows -> everything lands in level 0)
        thr = [jnp.float32(b) * u for b in BINS]

        # ---------------- pass 2 : histogram + symmetric co-occurrence (streaming) ----------
        def glcm_body(t, c):
            hists = list(c[:LEVELS - 1])
            paccs = list(c[LEVELS - 1:])
            r0 = pl.multiple_of(t * TILE, TILE)
            slab = wins_ref[pl.ds(r0, 2 * TILE), pl.ds(col, CHUNK)]          # (16, CHUNK)
            nsl = (slab - mean) * inv_std
            ge = [(nsl >= thr[b]).astype(jnp.float32) for b in range(nbins)]

            # one-hot level masks for the current pixels (rows 0..7 of the slab)
            gc = [g[0:TILE] for g in ge]
            lc = ([1.0 - gc[0]]
                  + [gc[b - 1] - gc[b] for b in range(1, nbins)]
                  + [gc[-1]])

            # per-pixel validity, regenerated in-kernel (no DMA'd mask inputs)
            pix = sub8 + (t * TILE).astype(jnp.float32)
            rowp = jnp.floor(pix * (1.0 / float(MW)))
            colp = pix - float(MW) * rowp
            pixv = (pix < float(NPIX)).astype(jnp.float32)

            for v in range(LEVELS - 1):                      # last level count derived afterwards
                hists[v] = hists[v] + lc[v] * pixv

            k = 0
            for o, (dr, dc) in enumerate(OFFSETS):
                sh_ = OFF_SHIFT[o]
                gn = [g[sh_:sh_ + TILE] for g in ge]         # neighbour rows of the same slab
                ln = ([1.0 - gn[0]]
                      + [gn[b - 1] - gn[b] for b in range(1, nbins)]
                      + [gn[-1]])
                pv = pixv
                if dc > 0:
                    pv = pv * (colp < float(MW - dc)).astype(jnp.float32)
                if dr > 0:
                    pv = pv * (rowp < float(MH - dr)).astype(jnp.float32)
                ln = [m * pv for m in ln]                    # fold pair validity once
                for (i, j) in pairs:
                    if i == j:
                        paccs[k] = paccs[k] + lc[i] * ln[i]
                    else:
                        paccs[k] = paccs[k] + (lc[i] * ln[j] + lc[j] * ln[i])
                    k += 1
            return tuple(hists) + tuple(paccs)

        init = tuple(jnp.zeros((TILE, CHUNK), jnp.float32)
                     for _ in range(LEVELS - 1 + len(pairs) * N_OFF))
        acc = lax.fori_loop(0, N_TILES, glcm_body, init)

        # ---- hist(): density histogram of quantized levels (last level derived) ----
        hcnt = [jnp.sum(acc[v], axis=0, keepdims=True) for v in range(LEVELS - 1)]
        hcnt.append(float(NPIX) - sum(hcnt))
        hist = [h * INV_NPIX for h in hcnt]

        # ---- glcm(): symmetric normalized co-occurrence + greycoprops + entropy ----
        contrast, homog, energy, corr, entr = [], [], [], [], []
        k0 = LEVELS - 1
        for o, (dr, dc) in enumerate(OFFSETS):
            inv_tot = 1.0 / (2.0 * float((MH - dr) * (MW - dc)))   # sum(G) = 2 * #valid pairs
            P = [[None] * LEVELS for _ in range(LEVELS)]
            for n_, (i, j) in enumerate(pairs):
                csum = jnp.sum(acc[k0 + o * len(pairs) + n_], axis=0, keepdims=True)
                if i == j:
                    P[i][i] = (2.0 * inv_tot) * csum
                else:
                    P[i][j] = P[j][i] = inv_tot * csum

            c_ = sum(P[i][j] * float((i - j) ** 2) for i in idx for j in idx if i != j)
            h_ = sum(P[i][j] * (1.0 / (1.0 + float((i - j) ** 2))) for i in idx for j in idx)
            asm = sum(P[i][j] * P[i][j] for i in idx for j in idx)
            e_ = jnp.sqrt(asm)
            mu_i = sum(float(i) * P[i][j] for i in idx for j in idx)
            mu_j = sum(float(j) * P[i][j] for i in idx for j in idx)
            var_i = sum(P[i][j] * (float(i) - mu_i) ** 2 for i in idx for j in idx)
            var_j = sum(P[i][j] * (float(j) - mu_j) ** 2 for i in idx for j in idx)
            cov = sum(P[i][j] * (float(i) - mu_i) * (float(j) - mu_j)
                      for i in idx for j in idx)
            std_i = jnp.sqrt(var_i)
            std_j = jnp.sqrt(var_j)
            cor_ = jnp.where((std_i > 1e-15) & (std_j > 1e-15),
                             cov / (std_i * std_j + 1e-30), 1.0)
            ent_ = -sum(P[i][j] * jnp.log2(P[i][j] + 1e-8) for i in idx for j in idx)

            contrast.append(c_); homog.append(h_); energy.append(e_)
            corr.append(cor_); entr.append(ent_)

        # property-major ordering: [mean,std,max,min] + hist + contrast+homog+energy+corr+entr
        feats = [mean, std, maxn, minn] + hist + contrast + homog + energy + corr + entr
        for k_, v in enumerate(feats):
            out_ref[pl.ds(k_, 1), pl.ds(col, CHUNK)] = v           # lane-dense 128-wide row store
        return carry

    lax.fori_loop(0, nch, chunk_body, 0)


def channel_features(x, max_wb=MAX_WB):
    """x: (B, C, H, W) float, C == 1. Returns (B, NFEAT) float32."""
    B, C, H, W = x.shape
    assert C == 1, "reference forward (squeeze(-1)) only supports single-channel input"
    sh, sw = STRIDE
    nx = (H - MH) // sh + 1
    ny = (W - MW) // sw + 1
    assert nx >= 1 and ny >= 1
    bc = B * C
    N = bc * nx * ny

    # ---- single gather straight into the kernel's pixel-major (NPIX, N) layout ----
    # TODO(synk): strip-based in-kernel window extraction would avoid materialising this
    #             ~18x-duplicated array in HBM; kept as host glue for now.
    pix = jnp.arange(NPIX)
    pr, pc = pix // MW, pix % MW
    rows = pr[:, None] + jnp.arange(nx)[None, :] * sh                       # (NPIX, nx)
    cols = pc[:, None] + jnp.arange(ny)[None, :] * sw                       # (NPIX, ny)
    spat = (rows[:, :, None] * W + cols[:, None, :]).reshape(NPIX, nx * ny)
    xflat = x.reshape(bc, H * W).astype(jnp.float32)
    wins = jnp.moveaxis(xflat[:, spat], 0, 1).reshape(NPIX, N)              # (NPIX, N)

    # ---- block / grid sizing: >= 2 grid steps whenever possible (v7x megacore) ----
    tc = -(-N // CHUNK)                                     # total 128-window chunks
    wb_chunks = 1 if tc == 1 else min(max_wb // CHUNK, (tc + 1) // 2)
    wb = wb_chunks * CHUNK
    grid = -(-tc // wb_chunks)
    n_pad = grid * wb

    # finite padding: spare pixel tile for the neighbour slab; edge-replicated fake windows
    wins = jnp.pad(wins, ((0, NPIX_PAD - NPIX), (0, n_pad - N)), mode="edge")

    out = pl.pallas_call(
        _features_kernel,
        out_shape=jax.ShapeDtypeStruct((NFEAT, n_pad), jnp.float32),
        grid_spec=pltpu.PrefetchScalarGridSpec(
            num_scalar_prefetch=0,
            grid=(grid,),
            in_specs=[pl.BlockSpec((NPIX_PAD, wb), lambda n: (0, n))],
            out_specs=pl.BlockSpec((NFEAT, wb), lambda n: (0, n)),
        ),
        compiler_params=pltpu.CompilerParams(dimension_semantics=("parallel",)),
    )(wins)

    out = out[:, :N].T.reshape(B, C, nx, ny, NFEAT)         # back to window-grid layout
    feats = jnp.mean(out, axis=(2, 3))                      # mean over the (Nx, Ny) window grid
    return feats[:, 0, :]                                   # (B, NFEAT), C == 1


if __name__ == "__main__":
    key = jax.random.PRNGKey(0)
    # B=2, C=1 (required by the module), H=W=49 -> 9x9 windows of 17x17 with stride 4
    x = jax.random.normal(key, (2, 1, 49, 49), dtype=jnp.float32)
    feats = jax.block_until_ready(channel_features(x))
    assert feats.shape == (2, NFEAT)
    assert bool(jnp.all(jnp.isfinite(feats)))
    print("KERNEL_OK")
</pallas_src>

<mosaic_0001>
module attributes {stable_mosaic.version = 11 : i64} {
  func.func @_features_kernel(%arg0: i32, %arg1: memref<304x128xf32, #tpu.memory_space<vmem>>, %arg2: memref<14x128xf32, #tpu.memory_space<vmem>>) attributes {dimension_semantics = [#tpu.dimension_semantics<parallel>], iteration_bounds = array<i64: 2>, scalar_prefetch = 0 : i64, scratch_operands = 0 : i64, tpu.core_type = #tpu.core_type<tc>, window_params = [{transform_indices = @transform_0, window_bounds = array<i64: 304, 128>}, {transform_indices = @transform_1, window_bounds = array<i64: 14, 128>}]} {
    %0 = tpu.iota {dimensions = array<i32: 0>} : vector<8x128xi32>
    %1 = arith.sitofp %0 : vector<8x128xi32> to vector<8x128xf32>
    %c0_i32 = arith.constant 0 : i32
    %c128_i32 = arith.constant 128 : i32
    %2 = arith.muli %c0_i32, %c128_i32 : i32
    %3 = tpu.assume_multiple %2, 128 : i32
    %cst = arith.constant 0.000000e+00 : f32
    %4 = vector.broadcast %cst : f32 to vector<8x128xf32>
    %cst_0 = arith.constant 0x7F800000 : f32
    %5 = vector.broadcast %cst_0 : f32 to vector<8x128xf32>
    %cst_1 = arith.constant 0xFF800000 : f32
    %6 = vector.broadcast %cst_1 : f32 to vector<8x128xf32>
    %c0_i32_2 = arith.constant 0 : i32
    %c37_i32 = arith.constant 37 : i32
    %7 = arith.addi %c0_i32_2, %c37_i32 : i32
    %c1_i32 = arith.constant 1 : i32
    %8:4 = scf.for %arg3 = %c0_i32_2 to %7 step %c1_i32 iter_args(%arg4 = %4, %arg5 = %4, %arg6 = %5, %arg7 = %6) -> (vector<8x128xf32>, vector<8x128xf32>, vector<8x128xf32>, vector<8x128xf32>)  : i32 {
      %c8_i32 = arith.constant 8 : i32
      %1159 = arith.muli %arg3, %c8_i32 : i32
      %1160 = tpu.assume_multiple %1159, 8 : i32
      %1161 = arith.index_cast %1160 : i32 to index
      %1162 = arith.index_cast %3 : i32 to index
      %1163 = vector.load %arg1[%1161, %1162] : memref<304x128xf32, #tpu.memory_space<vmem>>, vector<8x128xf32>
      %c8_i32_339 = arith.constant 8 : i32
      %1164 = arith.muli %arg3, %c8_i32_339 : i32
      %1165 = arith.sitofp %1164 : i32 to f32
      %1166 = vector.broadcast %1165 : f32 to vector<8x128xf32>
      %1167 = arith.addf %1, %1166 : vector<8x128xf32>
      %cst_340 = arith.constant 2.890000e+02 : f32
      %1168 = vector.broadcast %cst_340 : f32 to vector<8x128xf32>
      %1169 = arith.cmpf olt, %1167, %1168 : vector<8x128xf32>
      %cst_341 = arith.constant 0.000000e+00 : f32
      %1170 = vector.broadcast %cst_341 : f32 to vector<8x128xf32>
      %1171 = arith.select %1169, %1163, %1170 : vector<8x128xi1>, vector<8x128xf32>
      %1172 = arith.addf %arg4, %1171 : vector<8x128xf32>
      %1173 = arith.mulf %1163, %1163 : vector<8x128xf32>
      %cst_342 = arith.constant 0.000000e+00 : f32
      %1174 = vector.broadcast %cst_342 : f32 to vector<8x128xf32>
      %1175 = arith.select %1169, %1173, %1174 : vector<8x128xi1>, vector<8x128xf32>
      %1176 = arith.addf %arg5, %1175 : vector<8x128xf32>
      %cst_343 = arith.constant 0x7F800000 : f32
      %1177 = vector.broadcast %cst_343 : f32 to vector<8x128xf32>
      %1178 = arith.select %1169, %1163, %1177 : vector<8x128xi1>, vector<8x128xf32>
      %1179 = arith.minimumf %arg6, %1178 : vector<8x128xf32>
      %cst_344 = arith.constant 0xFF800000 : f32
      %1180 = vector.broadcast %cst_344 : f32 to vector<8x128xf32>
      %1181 = arith.select %1169, %1163, %1180 : vector<8x128xi1>, vector<8x128xf32>
      %1182 = arith.maximumf %arg7, %1181 : vector<8x128xf32>
      scf.yield %1172, %1176, %1179, %1182 : vector<8x128xf32>, vector<8x128xf32>, vector<8x128xf32>, vector<8x128xf32>
    }
    %c37_i32_3 = arith.constant 37 : i32
    %cst_4 = arith.constant dense<0.000000e+00> : vector<128xf32>
    %9 = vector.multi_reduction <add>, %8#0, %cst_4 [0] : vector<8x128xf32> to vector<128xf32>
    %10 = vector.shape_cast %9 : vector<128xf32> to vector<1x128xf32>
    %cst_5 = arith.constant dense<0.000000e+00> : vector<128xf32>
    %11 = vector.multi_reduction <add>, %8#1, %cst_5 [0] : vector<8x128xf32> to vector<128xf32>
    %12 = vector.shape_cast %11 : vector<128xf32> to vector<1x128xf32>
    %cst_6 = arith.constant dense<0x7F800000> : vector<128xf32>
    %13 = vector.multi_reduction <minimumf>, %8#2, %cst_6 [0] : vector<8x128xf32> to vector<128xf32>
    %14 = vector.shape_cast %13 : vector<128xf32> to vector<1x128xf32>
    %cst_7 = arith.constant dense<0xFF800000> : vector<128xf32>
    %15 = vector.multi_reduction <maximumf>, %8#3, %cst_7 [0] : vector<8x128xf32> to vector<128xf32>
    %16 = vector.shape_cast %15 : vector<128xf32> to vector<1x128xf32>
    %cst_8 = arith.constant 0.00346020772 : f32
    %17 = vector.broadcast %cst_8 : f32 to vector<1x128xf32>
    %18 = arith.mulf %10, %17 : vector<1x128xf32>
    %cst_9 = arith.constant 0.00346020772 : f32
    %19 = vector.broadcast %cst_9 : f32 to vector<1x128xf32>
    %20 = arith.mulf %12, %19 : vector<1x128xf32>
    %21 = arith.mulf %18, %18 : vector<1x128xf32>
    %22 = arith.subf %20, %21 : vector<1x128xf32>
    %cst_10 = arith.constant 0.000000e+00 : f32
    %23 = vector.broadcast %cst_10 : f32 to vector<1x128xf32>
    %24 = arith.maximumf %22, %23 : vector<1x128xf32>
    %25 = math.sqrt %24 : vector<1x128xf32>
    %26 = math.rsqrt %24 : vector<1x128xf32>
    %27 = arith.subf %16, %18 : vector<1x128xf32>
    %28 = arith.mulf %27, %26 : vector<1x128xf32>
    %29 = arith.subf %18, %14 : vector<1x128xf32>
    %30 = arith.mulf %29, %26 : vector<1x128xf32>
    %31 = arith.mulf %25, %26 : vector<1x128xf32>
    %cst_11 = arith.constant -1.500000e+00 : f32
    %32 = vector.broadcast %cst_11 : f32 to vector<1x128xf32>
    %33 = arith.mulf %32, %31 : vector<1x128xf32>
    %cst_12 = arith.constant -5.000000e-01 : f32
    %34 = vector.broadcast %cst_12 : f32 to vector<1x128xf32>
    %35 = arith.mulf %34, %31 : vector<1x128xf32>
    %cst_13 = arith.constant 5.000000e-01 : f32
    %36 = vector.broadcast %cst_13 : f32 to vector<1x128xf32>
    %37 = arith.mulf %36, %31 : vector<1x128xf32>
    %cst_14 = arith.constant 1.500000e+00 : f32
    %38 = vector.broadcast %cst_14 : f32 to vector<1x128xf32>
    %39 = arith.mulf %38, %31 : vector<1x128xf32>
    %cst_15 = arith.constant 0.000000e+00 : f32
    %40 = vector.broadcast %cst_15 : f32 to vector<8x128xf32>
    %cst_16 = arith.constant 0.000000e+00 : f32
    %41 = vector.broadcast %cst_16 : f32 to vector<8x128xf32>
    %cst_17 = arith.constant 0.000000e+00 : f32
    %42 = vector.broadcast %cst_17 : f32 to vector<8x128xf32>
    %cst_18 = arith.constant 0.000000e+00 : f32
    %43 = vector.broadcast %cst_18 : f32 to vector<8x128xf32>
    %cst_19 = arith.constant 0.000000e+00 : f32
    %44 = vector.broadcast %cst_19 : f32 to vector<8x128xf32>
    %cst_20 = arith.constant 0.000000e+00 : f32
    %45 = vector.broadcast %cst_20 : f32 to vector<8x128xf32>
    %cst_21 = arith.constant 0.000000e+00 : f32
    %46 = vector.broadcast %cst_21 : f32 to vector<8x128xf32>
    %cst_22 = arith.constant 0.000000e+00 : f32
    %47 = vector.broadcast %cst_22 : f32 to vector<8x128xf32>
    %cst_23 = arith.constant 0.000000e+00 : f32
    %48 = vector.broadcast %cst_23 : f32 to vector<8x128xf32>
    %cst_24 = arith.constant 0.000000e+00 : f32
    %49 = vector.broadcast %cst_24 : f32 to vector<8x128xf32>
    %cst_25 = arith.constant 0.000000e+00 : f32
    %50 = vector.broadcast %cst_25 : f32 to vector<8x128xf32>
    %cst_26 = arith.constant 0.000000e+00 : f32
    %51 = vector.broadcast %cst_26 : f32 to vector<8x128xf32>
    %cst_27 = arith.constant 0.000000e+00 : f32
    %52 = vector.broadcast %cst_27 : f32 to vector<8x128xf32>
    %cst_28 = arith.constant 0.000000e+00 : f32
    %53 = vector.broadcast %cst_28 : f32 to vector<8x128xf32>
    %cst_29 = arith.constant 0.000000e+00 : f32
    %54 = vector.broadcast %cst_29 : f32 to vector<8x128xf32>
    %cst_30 = arith.constant 0.000000e+00 : f32
    %55 = vector.broadcast %cst_30 : f32 to vector<8x128xf32>
    %cst_31 = arith.constant 0.000000e+00 : f32
    %56 = vector.broadcast %cst_31 : f32 to vector<8x128xf32>
    %cst_32 = arith.constant 0.000000e+00 : f32
    %57 = vector.broadcast %cst_32 : f32 to vector<8x128xf32>
    %cst_33 = arith.constant 0.000000e+00 : f32
    %58 = vector.broadcast %cst_33 : f32 to vector<8x128xf32>
    %c0_i32_34 = arith.constant 0 : i32
    %c37_i32_35 = arith.constant 37 : i32
    %59 = arith.addi %c0_i32_34, %c37_i32_35 : i32
    %c1_i32_36 = arith.constant 1 : i32
    %60:19 = scf.for %arg3 = %c0_i32_34 to %59 step %c1_i32_36 iter_args(%arg4 = %40, %arg5 = %41, %arg6 = %42, %arg7 = %43, %arg8 = %44, %arg9 = %45, %arg10 = %46, %arg11 = %47, %arg12 = %48, %arg13 = %49, %arg14 = %50, %arg15 = %51, %arg16 = %52, %arg17 = %53, %arg18 = %54, %arg19 = %55, %arg20 = %56, %arg21 = %57, %arg22 = %58) -> (vector<8x128xf32>, vector<8x128xf32>, vector<8x128xf32>, vector<8x128xf32>, vector<8x128xf32>, vector<8x128xf32>, vector<8x128xf32>, vector<8x128xf32>, vector<8x128xf32>, vector<8x128xf32>, vector<8x128xf32>, vector<8x128xf32>, vector<8x128xf32>, vector<8x128xf32>, vector<8x128xf32>, vector<8x128xf32>, vector<8x128xf32>, vector<8x128xf32>, vector<8x128xf32>)  : i32 {
      %c8_i32 = arith.constant 8 : i32
      %1159 = arith.muli %arg3, %c8_i32 : i32
      %1160 = tpu.assume_multiple %1159, 8 : i32
      %1161 = arith.index_cast %1160 : i32 to index
      %1162 = arith.index_cast %3 : i32 to index
      %1163 = vector.load %arg1[%1161, %1162] : memref<304x128xf32, #tpu.memory_space<vmem>>, vector<16x128xf32>
      %1164 = vector.broadcast %18 : vector<1x128xf32> to vector<16x128xf32>
      %1165 = arith.subf %1163, %1164 : vector<16x128xf32>
      %1166 = vector.broadcast %26 : vector<1x128xf32> to vector<16x128xf32>
      %1167 = arith.mulf %1165, %1166 : vector<16x128xf32>
      %1168 = vector.broadcast %33 : vector<1x128xf32> to vector<16x128xf32>
      %1169 = arith.cmpf oge, %1167, %1168 : vector<16x128xf32>
      %1170 = arith.extui %1169 : vector<16x128xi1> to vector<16x128xi32>
      %1171 = arith.sitofp %1170 : vector<16x128xi32> to vector<16x128xf32>
      %1172 = vector.broadcast %35 : vector<1x128xf32> to vector<16x128xf32>
      %1173 = arith.cmpf oge, %1167, %1172 : vector<16x128xf32>
      %1174 = arith.extui %1173 : vector<16x128xi1> to vector<16x128xi32>
      %1175 = arith.sitofp %1174 : vector<16x128xi32> to vector<16x128xf32>
      %1176 = vector.broadcast %37 : vector<1x128xf32> to vector<16x128xf32>
      %1177 = arith.cmpf oge, %1167, %1176 : vector<16x128xf32>
      %1178 = arith.extui %1177 : vector<16x128xi1> to vector<16x128xi32>
      %1179 = arith.sitofp %1178 : vector<16x128xi32> to vector<16x128xf32>
      %1180 = vector.broadcast %39 : vector<1x128xf32> to vector<16x128xf32>
      %1181 = arith.cmpf oge, %1167, %1180 : vector<16x128xf32>
      %1182 = arith.extui %1181 : vector<16x128xi1> to vector<16x128xi32>
      %1183 = arith.sitofp %1182 : vector<16x128xi32> to vector<16x128xf32>
      %1184 = vector.extract_strided_slice %1171 {offsets = [0, 0], sizes = [8, 128], strides = [1, 1]} : vector<16x128xf32> to vector<8x128xf32>
      %1185 = vector.extract_strided_slice %1175 {offsets = [0, 0], sizes = [8, 128], strides = [1, 1]} : vector<16x128xf32> to vector<8x128xf32>
      %1186 = vector.extract_strided_slice %1179 {offsets = [0, 0], sizes = [8, 128], strides = [1, 1]} : vector<16x128xf32> to vector<8x128xf32>
      %1187 = vector.extract_strided_slice %1183 {offsets = [0, 0], sizes = [8, 128], strides = [1, 1]} : vector<16x128xf32> to vector<8x128xf32>
      %cst_339 = arith.constant 1.000000e+00 : f32
      %1188 = vector.broadcast %cst_339 : f32 to vector<8x128xf32>
      %1189 = arith.subf %1188, %1184 : vector<8x128xf32>
      %1190 = arith.subf %1184, %1185 : vector<8x128xf32>
      %1191 = arith.subf %1185, %1186 : vector<8x128xf32>
      %1192 = arith.subf %1186, %1187 : vector<8x128xf32>
      %c8_i32_340 = arith.constant 8 : i32
      %1193 = arith.muli %arg3, %c8_i32_340 : i32
      %1194 = arith.sitofp %1193 : i32 to f32
      %1195 = vector.broadcast %1194 : f32 to vector<8x128xf32>
      %1196 = arith.addf %1, %1195 : vector<8x128xf32>
      %cst_341 = arith.constant 0.0588235296 : f32
      %1197 = vector.broadcast %cst_341 : f32 to vector<8x128xf32>
      %1198 = arith.mulf %1196, %1197 : vector<8x128xf32>
      %1199 = math.floor %1198 : vector<8x128xf32>
      %cst_342 = arith.constant 1.700000e+01 : f32
      %1200 = vector.broadcast %cst_342 : f32 to vector<8x128xf32>
      %1201 = arith.mulf %1200, %1199 : vector<8x128xf32>
      %1202 = arith.subf %1196, %1201 : vector<8x128xf32>
      %cst_343 = arith.constant 2.890000e+02 : f32
      %1203 = vector.broadcast %cst_343 : f32 to vector<8x128xf32>
      %1204 = arith.cmpf olt, %1196, %1203 : vector<8x128xf32>
      %1205 = arith.extui %1204 : vector<8x128xi1> to vector<8x128xi32>
      %1206 = arith.sitofp %1205 : vector<8x128xi32> to vector<8x128xf32>
      %1207 = arith.mulf %1189, %1206 : vector<8x128xf32>
      %1208 = arith.addf %arg4, %1207 : vector<8x128xf32>
      %1209 = arith.mulf %1190, %1206 : vector<8x128xf32>
      %1210 = arith.addf %arg5, %1209 : vector<8x128xf32>
      %1211 = arith.mulf %1191, %1206 : vector<8x128xf32>
      %1212 = arith.addf %arg6, %1211 : vector<8x128xf32>
      %1213 = arith.mulf %1192, %1206 : vector<8x128xf32>
      %1214 = arith.addf %arg7, %1213 : vector<8x128xf32>
      %1215 = vector.extract_strided_slice %1171 {offsets = [1, 0], sizes = [8, 128], strides = [1, 1]} : vector<16x128xf32> to vector<8x128xf32>
      %1216 = vector.extract_strided_slice %1175 {offsets = [1, 0], sizes = [8, 128], strides = [1, 1]} : vector<16x128xf32> to vector<8x128xf32>
      %1217 = vector.extract_strided_slice %1179 {offsets = [1, 0], sizes = [8, 128], strides = [1, 1]} : vector<16x128xf32> to vector<8x128xf32>
      %1218 = vector.extract_strided_slice %1183 {offsets = [1, 0], sizes = [8, 128], strides = [1, 1]} : vector<16x128xf32> to vector<8x128xf32>
      %cst_344 = arith.constant 1.000000e+00 : f32
      %1219 = vector.broadcast %cst_344 : f32 to vector<8x128xf32>
      %1220 = arith.subf %1219, %1215 : vector<8x128xf32>
      %1221 = arith.subf %1215, %1216 : vector<8x128xf32>
      %1222 = arith.subf %1216, %1217 : vector<8x128xf32>
      %1223 = arith.subf %1217, %1218 : vector<8x128xf32>
      %cst_345 = arith.constant 1.600000e+01 : f32
      %1224 = vector.broadcast %cst_345 : f32 to vector<8x128xf32>
      %1225 = arith.cmpf olt, %1202, %1224 : vector<8x128xf32>
      %1226 = arith.extui %1225 : vector<8x128xi1> to vector<8x128xi32>
      %1227 = arith.sitofp %1226 : vector<8x128xi32> to vector<8x128xf32>
      %1228 = arith.mulf %1206, %1227 : vector<8x128xf32>
      %1229 = arith.mulf %1220, %1228 : vector<8x128xf32>
      %1230 = arith.mulf %1221, %1228 : vector<8x128xf32>
      %1231 = arith.mulf %1222, %1228 : vector<8x128xf32>
      %1232 = arith.mulf %1223, %1228 : vector<8x128xf32>
      %1233 = arith.mulf %1218, %1228 : vector<8x128xf32>
      %1234 = arith.mulf %1189, %1229 : vector<8x128xf32>
      %1235 = arith.addf %arg8, %1234 : vector<8x128xf32>
      %1236 = arith.mulf %1189, %1230 : vector<8x128xf32>
      %1237 = arith.mulf %1190, %1229 : vector<8x128xf32>
      %1238 = arith.addf %1236, %1237 : vector<8x128xf32>
      %1239 = arith.addf %arg9, %1238 : vector<8x128xf32>
      %1240 = arith.mulf %1189, %1231 : vector<8x128xf32>
      %1241 = arith.mulf %1191, %1229 : vector<8x128xf32>
      %1242 = arith.addf %1240, %1241 : vector<8x128xf32>
      %1243 = arith.addf %arg10, %1242 : vector<8x128xf32>
      %1244 = arith.mulf %1189, %1232 : vector<8x128xf32>
      %1245 = arith.mulf %1192, %1229 : vector<8x128xf32>
      %1246 = arith.addf %1244, %1245 : vector<8x128xf32>
      %1247 = arith.addf %arg11, %1246 : vector<8x128xf32>
      %1248 = arith.mulf %1189, %1233 : vector<8x128xf32>
      %1249 = arith.mulf %1187, %1229 : vector<8x128xf32>
      %1250 = arith.addf %1248, %1249 : vector<8x128xf32>
      %1251 = arith.addf %arg12, %1250 : vector<8x128xf32>
      %1252 = arith.mulf %1190, %1230 : vector<8x128xf32>
      %1253 = arith.addf %arg13, %1252 : vector<8x128xf32>
      %1254 = arith.mulf %1190, %1231 : vector<8x128xf32>
      %1255 = arith.mulf %1191, %1230 : vector<8x128xf32>
      %1256 = arith.addf %1254, %1255 : vector<8x128xf32>
      %1257 = arith.addf %arg14, %1256 : vector<8x128xf32>
      %1258 = arith.mulf %1190, %1232 : vector<8x128xf32>
      %1259 = arith.mulf %1192, %1230 : vector<8x128xf32>
      %1260 = arith.addf %1258, %1259 : vector<8x128xf32>
      %1261 = arith.addf %arg15, %1260 : vector<8x128xf32>
      %1262 = arith.mulf %1190, %1233 : vector<8x128xf32>
      %1263 = arith.mulf %1187, %1230 : vector<8x128xf32>
      %1264 = arith.addf %1262, %1263 : vector<8x128xf32>
      %1265 = arith.addf %arg16, %1264 : vector<8x128xf32>
      %1266 = arith.mulf %1191, %1231 : vector<8x128xf32>
      %1267 = arith.addf %arg17, %1266 : vector<8x128xf32>
      %1268 = arith.mulf %1191, %1232 : vector<8x128xf32>
      %1269 = arith.mulf %1192, %1231 : vector<8x128xf32>
      %1270 = arith.addf %1268, %1269 : vector<8x128xf32>
      %1271 = arith.addf %arg18, %1270 : vector<8x128xf32>
      %1272 = arith.mulf %1191, %1233 : vector<8x128xf32>
      %1273 = arith.mulf %1187, %1231 : vector<8x128xf32>
      %1274 = arith.addf %1272, %1273 : vector<8x128xf32>
      %1275 = arith.addf %arg19, %1274 : vector<8x128xf32>
      %1276 = arith.mulf %1192, %1232 : vector<8x128xf32>
      %1277 = arith.addf %arg20, %1276 : vector<8x128xf32>
      %1278 = arith.mulf %1192, %1233 : vector<8x128xf32>
      %1279 = arith.mulf %1187, %1232 : vector<8x128xf32>
      %1280 = arith.addf %1278, %1279 : vector<8x128xf32>
      %1281 = arith.addf %arg21, %1280 : vector<8x128xf32>
      %1282 = arith.mulf %1187, %1233 : vector<8x128xf32>
      %1283 = arith.addf %arg22, %1282 : vector<8x128xf32>
      scf.yield %1208, %1210, %1212, %1214, %1235, %1239, %1243, %1247, %1251, %1253, %1257, %1261, %1265, %1267, %1271, %1275, %1277, %1281, %1283 : vector<8x128xf32>, vector<8x128xf32>, vector<8x128xf32>, vector<8x128xf32>, vector<8x128xf32>, vector<8x128xf32>, vector<8x128xf32>, vector<8x128xf32>, vector<8x128xf32>, vector<8x128xf32>, vector<8x128xf32>, vector<8x128xf32>, vector<8x128xf32>, vector<8x128xf32>, vector<8x128xf32>, vector<8x128xf32>, vector<8x128xf32>, vector<8x128xf32>, vector<8x128xf32>
    }
    %c37_i32_37 = arith.constant 37 : i32
    %cst_38 = arith.constant dense<0.000000e+00> : vector<128xf32>
    %61 = vector.multi_reduction <add>, %60#0, %cst_38 [0] : vector<8x128xf32> to vector<128xf32>
    %62 = vector.shape_cast %61 : vector<128xf32> to vector<1x128xf32>
    %cst_39 = arith.constant dense<0.000000e+00> : vector<128xf32>
    %63 = vector.multi_reduction <add>, %60#1, %cst_39 [0] : vector<8x128xf32> to vector<128xf32>
    %64 = vector.shape_cast %63 : vector<128xf32> to vector<1x128xf32>
    %cst_40 = arith.constant dense<0.000000e+00> : vector<128xf32>
    %65 = vector.multi_reduction <add>, %60#2, %cst_40 [0] : vector<8x128xf32> to vector<128xf32>
    %66 = vector.shape_cast %65 : vector<128xf32> to vector<1x128xf32>
    %cst_41 = arith.constant dense<0.000000e+00> : vector<128xf32>
    %67 = vector.multi_reduction <add>, %60#3, %cst_41 [0] : vector<8x128xf32> to vector<128xf32>
    %68 = vector.shape_cast %67 : vector<128xf32> to vector<1x128xf32>
    %cst_42 = arith.constant 0.000000e+00 : f32
    %69 = vector.broadcast %cst_42 : f32 to vector<1x128xf32>
    %70 = arith.addf %69, %62 : vector<1x128xf32>
    %71 = arith.addf %70, %64 : vector<1x128xf32>
    %72 = arith.addf %71, %66 : vector<1x128xf32>
    %73 = arith.addf %72, %68 : vector<1x128xf32>
    %cst_43 = arith.constant 2.890000e+02 : f32
    %74 = vector.broadcast %cst_43 : f32 to vector<1x128xf32>
    %75 = arith.subf %74, %73 : vector<1x128xf32>
    %cst_44 = arith.constant 0.00346020772 : f32
    %76 = vector.broadcast %cst_44 : f32 to vector<1x128xf32>
    %77 = arith.mulf %62, %76 : vector<1x128xf32>
    %cst_45 = arith.constant 0.00346020772 : f32
    %78 = vector.broadcast %cst_45 : f32 to vector<1x128xf32>
    %79 = arith.mulf %64, %78 : vector<1x128xf32>
    %cst_46 = arith.constant 0.00346020772 : f32
    %80 = vector.broadcast %cst_46 : f32 to vector<1x128xf32>
    %81 = arith.mulf %66, %80 : vector<1x128xf32>
    %cst_47 = arith.constant 0.00346020772 : f32
    %82 = vector.broadcast %cst_47 : f32 to vector<1x128xf32>
    %83 = arith.mulf %68, %82 : vector<1x128xf32>
    %cst_48 = arith.constant 0.00346020772 : f32
    %84 = vector.broadcast %cst_48 : f32 to vector<1x128xf32>
    %85 = arith.mulf %75, %84 : vector<1x128xf32>
    %cst_49 = arith.constant dense<0.000000e+00> : vector<128xf32>
    %86 = vector.multi_reduction <add>, %60#4, %cst_49 [0] : vector<8x128xf32> to vector<128xf32>
    %87 = vector.shape_cast %86 : vector<128xf32> to vector<1x128xf32>
    %cst_50 = arith.constant 0.0036764706 : f32
    %88 = vector.broadcast %cst_50 : f32 to vector<1x128xf32>
    %89 = arith.mulf %88, %87 : vector<1x128xf32>
    %cst_51 = arith.constant dense<0.000000e+00> : vector<128xf32>
    %90 = vector.multi_reduction <add>, %60#5, %cst_51 [0] : vector<8x128xf32> to vector<128xf32>
    %91 = vector.shape_cast %90 : vector<128xf32> to vector<1x128xf32>
    %cst_52 = arith.constant 0.0018382353 : f32
    %92 = vector.broadcast %cst_52 : f32 to vector<1x128xf32>
    %93 = arith.mulf %92, %91 : vector<1x128xf32>
    %cst_53 = arith.constant dense<0.000000e+00> : vector<128xf32>
    %94 = vector.multi_reduction <add>, %60#6, %cst_53 [0] : vector<8x128xf32> to vector<128xf32>
    %95 = vector.shape_cast %94 : vector<128xf32> to vector<1x128xf32>
    %cst_54 = arith.constant 0.0018382353 : f32
    %96 = vector.broadcast %cst_54 : f32 to vector<1x128xf32>
    %97 = arith.mulf %96, %95 : vector<1x128xf32>
    %cst_55 = arith.constant dense<0.000000e+00> : vector<128xf32>
    %98 = vector.multi_reduction <add>, %60#7, %cst_55 [0] : vector<8x128xf32> to vector<128xf32>
    %99 = vector.shape_cast %98 : vector<128xf32> to vector<1x128xf32>
    %cst_56 = arith.constant 0.0018382353 : f32
    %100 = vector.broadcast %cst_56 : f32 to vector<1x128xf32>
    %101 = arith.mulf %100, %99 : vector<1x128xf32>
    %cst_57 = arith.constant dense<0.000000e+00> : vector<128xf32>
    %102 = vector.multi_reduction <add>, %60#8, %cst_57 [0] : vector<8x128xf32> to vector<128xf32>
    %103 = vector.shape_cast %102 : vector<128xf32> to vector<1x128xf32>
    %cst_58 = arith.constant 0.0018382353 : f32
    %104 = vector.broadcast %cst_58 : f32 to vector<1x128xf32>
    %105 = arith.mulf %104, %103 : vector<1x128xf32>
    %cst_59 = arith.constant dense<0.000000e+00> : vector<128xf32>
    %106 = vector.multi_reduction <add>, %60#9, %cst_59 [0] : vector<8x128xf32> to vector<128xf32>
    %107 = vector.shape_cast %106 : vector<128xf32> to vector<1x128xf32>
    %cst_60 = arith.constant 0.0036764706 : f32
    %108 = vector.broadcast %cst_60 : f32 to vector<1x128xf32>
    %109 = arith.mulf %108, %107 : vector<1x128xf32>
    %cst_61 = arith.constant dense<0.000000e+00> : vector<128xf32>
    %110 = vector.multi_reduction <add>, %60#10, %cst_61 [0] : vector<8x128xf32> to vector<128xf32>
    %111 = vector.shape_cast %110 : vector<128xf32> to vector<1x128xf32>
    %cst_62 = arith.constant 0.0018382353 : f32
    %112 = vector.broadcast %cst_62 : f32 to vector<1x128xf32>
    %113 = arith.mulf %112, %111 : vector<1x128xf32>
    %cst_63 = arith.constant dense<0.000000e+00> : vector<128xf32>
    %114 = vector.multi_reduction <add>, %60#11, %cst_63 [0] : vector<8x128xf32> to vector<128xf32>
    %115 = vector.shape_cast %114 : vector<128xf32> to vector<1x128xf32>
    %cst_64 = arith.constant 0.0018382353 : f32
    %116 = vector.broadcast %cst_64 : f32 to vector<1x128xf32>
    %117 = arith.mulf %116, %115 : vector<1x128xf32>
    %cst_65 = arith.constant dense<0.000000e+00> : vector<128xf32>
    %118 = vector.multi_reduction <add>, %60#12, %cst_65 [0] : vector<8x128xf32> to vector<128xf32>
    %119 = vector.shape_cast %118 : vector<128xf32> to vector<1x128xf32>
    %cst_66 = arith.constant 0.0018382353 : f32
    %120 = vector.broadcast %cst_66 : f32 to vector<1x128xf32>
    %121 = arith.mulf %120, %119 : vector<1x128xf32>
    %cst_67 = arith.constant dense<0.000000e+00> : vector<128xf32>
    %122 = vector.multi_reduction <add>, %60#13, %cst_67 [0] : vector<8x128xf32> to vector<128xf32>
    %123 = vector.shape_cast %122 : vector<128xf32> to vector<1x128xf32>
    %cst_68 = arith.constant 0.0036764706 : f32
    %124 = vector.broadcast %cst_68 : f32 to vector<1x128xf32>
    %125 = arith.mulf %124, %123 : vector<1x128xf32>
    %cst_69 = arith.constant dense<0.000000e+00> : vector<128xf32>
    %126 = vector.multi_reduction <add>, %60#14, %cst_69 [0] : vector<8x128xf32> to vector<128xf32>
    %127 = vector.shape_cast %126 : vector<128xf32> to vector<1x128xf32>
    %cst_70 = arith.constant 0.0018382353 : f32
    %128 = vector.broadcast %cst_70 : f32 to vector<1x128xf32>
    %129 = arith.mulf %128, %127 : vector<1x128xf32>
    %cst_71 = arith.constant dense<0.000000e+00> : vector<128xf32>
    %130 = vector.multi_reduction <add>, %60#15, %cst_71 [0] : vector<8x128xf32> to vector<128xf32>
    %131 = vector.shape_cast %130 : vector<128xf32> to vector<1x128xf32>
    %cst_72 = arith.constant 0.0018382353 : f32
    %132 = vector.broadcast %cst_72 : f32 to vector<1x128xf32>
    %133 = arith.mulf %132, %131 : vector<1x128xf32>
    %cst_73 = arith.constant dense<0.000000e+00> : vector<128xf32>
    %134 = vector.multi_reduction <add>, %60#16, %cst_73 [0] : vector<8x128xf32> to vector<128xf32>
    %135 = vector.shape_cast %134 : vector<128xf32> to vector<1x128xf32>
    %cst_74 = arith.constant 0.0036764706 : f32
    %136 = vector.broadcast %cst_74 : f32 to vector<1x128xf32>
    %137 = arith.mulf %136, %135 : vector<1x128xf32>
    %cst_75 = arith.constant dense<0.000000e+00> : vector<128xf32>
    %138 = vector.multi_reduction <add>, %60#17, %cst_75 [0] : vector<8x128xf32> to vector<128xf32>
    %139 = vector.shape_cast %138 : vector<128xf32> to vector<1x128xf32>
    %cst_76 = arith.constant 0.0018382353 : f32
    %140 = vector.broadcast %cst_76 : f32 to vector<1x128xf32>
    %141 = arith.mulf %140, %139 : vector<1x128xf32>
    %cst_77 = arith.constant dense<0.000000e+00> : vector<128xf32>
    %142 = vector.multi_reduction <add>, %60#18, %cst_77 [0] : vector<8x128xf32> to vector<128xf32>
    %143 = vector.shape_cast %142 : vector<128xf32> to vector<1x128xf32>
    %cst_78 = arith.constant 0.0036764706 : f32
    %144 = vector.broadcast %cst_78 : f32 to vector<1x128xf32>
    %145 = arith.mulf %144, %143 : vector<1x128xf32>
    %cst_79 = arith.constant 1.000000e+00 : f32
    %146 = vector.broadcast %cst_79 : f32 to vector<1x128xf32>
    %147 = arith.mulf %93, %146 : vector<1x128xf32>
    %cst_80 = arith.constant 0.000000e+00 : f32
    %148 = vector.broadcast %cst_80 : f32 to vector<1x128xf32>
    %149 = arith.addf %148, %147 : vector<1x128xf32>
    %cst_81 = arith.constant 4.000000e+00 : f32
    %150 = vector.broadcast %cst_81 : f32 to vector<1x128xf32>
    %151 = arith.mulf %97, %150 : vector<1x128xf32>
    %152 = arith.addf %149, %151 : vector<1x128xf32>
    %cst_82 = arith.constant 9.000000e+00 : f32
    %153 = vector.broadcast %cst_82 : f32 to vector<1x128xf32>
    %154 = arith.mulf %101, %153 : vector<1x128xf32>
    %155 = arith.addf %152, %154 : vector<1x128xf32>
    %cst_83 = arith.constant 1.600000e+01 : f32
    %156 = vector.broadcast %cst_83 : f32 to vector<1x128xf32>
    %157 = arith.mulf %105, %156 : vector<1x128xf32>
    %158 = arith.addf %155, %157 : vector<1x128xf32>
    %cst_84 = arith.constant 1.000000e+00 : f32
    %159 = vector.broadcast %cst_84 : f32 to vector<1x128xf32>
    %160 = arith.mulf %93, %159 : vector<1x128xf32>
    %161 = arith.addf %158, %160 : vector<1x128xf32>
    %cst_85 = arith.constant 1.000000e+00 : f32
    %162 = vector.broadcast %cst_85 : f32 to vector<1x128xf32>
    %163 = arith.mulf %113, %162 : vector<1x128xf32>
    %164 = arith.addf %161, %163 : vector<1x128xf32>
    %cst_86 = arith.constant 4.000000e+00 : f32
    %165 = vector.broadcast %cst_86 : f32 to vector<1x128xf32>
    %166 = arith.mulf %117, %165 : vector<1x128xf32>
    %167 = arith.addf %164, %166 : vector<1x128xf32>
    %cst_87 = arith.constant 9.000000e+00 : f32
    %168 = vector.broadcast %cst_87 : f32 to vector<1x128xf32>
    %169 = arith.mulf %121, %168 : vector<1x128xf32>
    %170 = arith.addf %167, %169 : vector<1x128xf32>
    %cst_88 = arith.constant 4.000000e+00 : f32
    %171 = vector.broadcast %cst_88 : f32 to vector<1x128xf32>
    %172 = arith.mulf %97, %171 : vector<1x128xf32>
    %173 = arith.addf %170, %172 : vector<1x128xf32>
    %cst_89 = arith.constant 1.000000e+00 : f32
    %174 = vector.broadcast %cst_89 : f32 to vector<1x128xf32>
    %175 = arith.mulf %113, %174 : vector<1x128xf32>
    %176 = arith.addf %173, %175 : vector<1x128xf32>
    %cst_90 = arith.constant 1.000000e+00 : f32
    %177 = vector.broadcast %cst_90 : f32 to vector<1x128xf32>
    %178 = arith.mulf %129, %177 : vector<1x128xf32>
    %179 = arith.addf %176, %178 : vector<1x128xf32>
    %cst_91 = arith.constant 4.000000e+00 : f32
    %180 = vector.broadcast %cst_91 : f32 to vector<1x128xf32>
    %181 = arith.mulf %133, %180 : vector<1x128xf32>
    %182 = arith.addf %179, %181 : vector<1x128xf32>
    %cst_92 = arith.constant 9.000000e+00 : f32
    %183 = vector.broadcast %cst_92 : f32 to vector<1x128xf32>
    %184 = arith.mulf %101, %183 : vector<1x128xf32>
    %185 = arith.addf %182, %184 : vector<1x128xf32>
    %cst_93 = arith.constant 4.000000e+00 : f32
    %186 = vector.broadcast %cst_93 : f32 to vector<1x128xf32>
    %187 = arith.mulf %117, %186 : vector<1x128xf32>
    %188 = arith.addf %185, %187 : vector<1x128xf32>
    %cst_94 = arith.constant 1.000000e+00 : f32
    %189 = vector.broadcast %cst_94 : f32 to vector<1x128xf32>
    %190 = arith.mulf %129, %189 : vector<1x128xf32>
    %191 = arith.addf %188, %190 : vector<1x128xf32>
    %cst_95 = arith.constant 1.000000e+00 : f32
    %192 = vector.broadcast %cst_95 : f32 to vector<1x128xf32>
    %193 = arith.mulf %141, %192 : vector<1x128xf32>
    %194 = arith.addf %191, %193 : vector<1x128xf32>
    %cst_96 = arith.constant 1.600000e+01 : f32
    %195 = vector.broadcast %cst_96 : f32 to vector<1x128xf32>
    %196 = arith.mulf %105, %195 : vector<1x128xf32>
    %197 = arith.addf %194, %196 : vector<1x128xf32>
    %cst_97 = arith.constant 9.000000e+00 : f32
    %198 = vector.broadcast %cst_97 : f32 to vector<1x128xf32>
    %199 = arith.mulf %121, %198 : vector<1x128xf32>
    %200 = arith.addf %197, %199 : vector<1x128xf32>
    %cst_98 = arith.constant 4.000000e+00 : f32
    %201 = vector.broadcast %cst_98 : f32 to vector<1x128xf32>
    %202 = arith.mulf %133, %201 : vector<1x128xf32>
    %203 = arith.addf %200, %202 : vector<1x128xf32>
    %cst_99 = arith.constant 1.000000e+00 : f32
    %204 = vector.broadcast %cst_99 : f32 to vector<1x128xf32>
    %205 = arith.mulf %141, %204 : vector<1x128xf32>
    %206 = arith.addf %203, %205 : vector<1x128xf32>
    %cst_100 = arith.constant 1.000000e+00 : f32
    %207 = vector.broadcast %cst_100 : f32 to vector<1x128xf32>
    %208 = arith.mulf %89, %207 : vector<1x128xf32>
    %cst_101 = arith.constant 0.000000e+00 : f32
    %209 = vector.broadcast %cst_101 : f32 to vector<1x128xf32>
    %210 = arith.addf %209, %208 : vector<1x128xf32>
    %cst_102 = arith.constant 5.000000e-01 : f32
    %211 = vector.broadcast %cst_102 : f32 to vector<1x128xf32>
    %212 = arith.mulf %93, %211 : vector<1x128xf32>
    %213 = arith.addf %210, %212 : vector<1x128xf32>
    %cst_103 = arith.constant 2.000000e-01 : f32
    %214 = vector.broadcast %cst_103 : f32 to vector<1x128xf32>
    %215 = arith.mulf %97, %214 : vector<1x128xf32>
    %216 = arith.addf %213, %215 : vector<1x128xf32>
    %cst_104 = arith.constant 1.000000e-01 : f32
    %217 = vector.broadcast %cst_104 : f32 to vector<1x128xf32>
    %218 = arith.mulf %101, %217 : vector<1x128xf32>
    %219 = arith.addf %216, %218 : vector<1x128xf32>
    %cst_105 = arith.constant 0.0588235296 : f32
    %220 = vector.broadcast %cst_105 : f32 to vector<1x128xf32>
    %221 = arith.mulf %105, %220 : vector<1x128xf32>
    %222 = arith.addf %219, %221 : vector<1x128xf32>
    %cst_106 = arith.constant 5.000000e-01 : f32
    %223 = vector.broadcast %cst_106 : f32 to vector<1x128xf32>
    %224 = arith.mulf %93, %223 : vector<1x128xf32>
    %225 = arith.addf %222, %224 : vector<1x128xf32>
    %cst_107 = arith.constant 1.000000e+00 : f32
    %226 = vector.broadcast %cst_107 : f32 to vector<1x128xf32>
    %227 = arith.mulf %109, %226 : vector<1x128xf32>
    %228 = arith.addf %225, %227 : vector<1x128xf32>
    %cst_108 = arith.constant 5.000000e-01 : f32
    %229 = vector.broadcast %cst_108 : f32 to vector<1x128xf32>
    %230 = arith.mulf %113, %229 : vector<1x128xf32>
    %231 = arith.addf %228, %230 : vector<1x128xf32>
    %cst_109 = arith.constant 2.000000e-01 : f32
    %232 = vector.broadcast %cst_109 : f32 to vector<1x128xf32>
    %233 = arith.mulf %117, %232 : vector<1x128xf32>
    %234 = arith.addf %231, %233 : vector<1x128xf32>
    %cst_110 = arith.constant 1.000000e-01 : f32
    %235 = vector.broadcast %cst_110 : f32 to vector<1x128xf32>
    %236 = arith.mulf %121, %235 : vector<1x128xf32>
    %237 = arith.addf %234, %236 : vector<1x128xf32>
    %cst_111 = arith.constant 2.000000e-01 : f32
    %238 = vector.broadcast %cst_111 : f32 to vector<1x128xf32>
    %239 = arith.mulf %97, %238 : vector<1x128xf32>
    %240 = arith.addf %237, %239 : vector<1x128xf32>
    %cst_112 = arith.constant 5.000000e-01 : f32
    %241 = vector.broadcast %cst_112 : f32 to vector<1x128xf32>
    %242 = arith.mulf %113, %241 : vector<1x128xf32>
    %243 = arith.addf %240, %242 : vector<1x128xf32>
    %cst_113 = arith.constant 1.000000e+00 : f32
    %244 = vector.broadcast %cst_113 : f32 to vector<1x128xf32>
    %245 = arith.mulf %125, %244 : vector<1x128xf32>
    %246 = arith.addf %243, %245 : vector<1x128xf32>
    %cst_114 = arith.constant 5.000000e-01 : f32
    %247 = vector.broadcast %cst_114 : f32 to vector<1x128xf32>
    %248 = arith.mulf %129, %247 : vector<1x128xf32>
    %249 = arith.addf %246, %248 : vector<1x128xf32>
    %cst_115 = arith.constant 2.000000e-01 : f32
    %250 = vector.broadcast %cst_115 : f32 to vector<1x128xf32>
    %251 = arith.mulf %133, %250 : vector<1x128xf32>
    %252 = arith.addf %249, %251 : vector<1x128xf32>
    %cst_116 = arith.constant 1.000000e-01 : f32
    %253 = vector.broadcast %cst_116 : f32 to vector<1x128xf32>
    %254 = arith.mulf %101, %253 : vector<1x128xf32>
    %255 = arith.addf %252, %254 : vector<1x128xf32>
    %cst_117 = arith.constant 2.000000e-01 : f32
    %256 = vector.broadcast %cst_117 : f32 to vector<1x128xf32>
    %257 = arith.mulf %117, %256 : vector<1x128xf32>
    %258 = arith.addf %255, %257 : vector<1x128xf32>
    %cst_118 = arith.constant 5.000000e-01 : f32
    %259 = vector.broadcast %cst_118 : f32 to vector<1x128xf32>
    %260 = arith.mulf %129, %259 : vector<1x128xf32>
    %261 = arith.addf %258, %260 : vector<1x128xf32>
    %cst_119 = arith.constant 1.000000e+00 : f32
    %262 = vector.broadcast %cst_119 : f32 to vector<1x128xf32>
    %263 = arith.mulf %137, %262 : vector<1x128xf32>
    %264 = arith.addf %261, %263 : vector<1x128xf32>
    %cst_120 = arith.constant 5.000000e-01 : f32
    %265 = vector.broadcast %cst_120 : f32 to vector<1x128xf32>
    %266 = arith.mulf %141, %265 : vector<1x128xf32>
    %267 = arith.addf %264, %266 : vector<1x128xf32>
    %cst_121 = arith.constant 0.0588235296 : f32
    %268 = vector.broadcast %cst_121 : f32 to vector<1x128xf32>
    %269 = arith.mulf %105, %268 : vector<1x128xf32>
    %270 = arith.addf %267, %269 : vector<1x128xf32>
    %cst_122 = arith.constant 1.000000e-01 : f32
    %271 = vector.broadcast %cst_122 : f32 to vector<1x128xf32>
    %272 = arith.mulf %121, %271 : vector<1x128xf32>
    %273 = arith.addf %270, %272 : vector<1x128xf32>
    %cst_123 = arith.constant 2.000000e-01 : f32
    %274 = vector.broadcast %cst_123 : f32 to vector<1x128xf32>
    %275 = arith.mulf %133, %274 : vector<1x128xf32>
    %276 = arith.addf %273, %275 : vector<1x128xf32>
    %cst_124 = arith.constant 5.000000e-01 : f32
    %277 = vector.broadcast %cst_124 : f32 to vector<1x128xf32>
    %278 = arith.mulf %141, %277 : vector<1x128xf32>
    %279 = arith.addf %276, %278 : vector<1x128xf32>
    %cst_125 = arith.constant 1.000000e+00 : f32
    %280 = vector.broadcast %cst_125 : f32 to vector<1x128xf32>
    %281 = arith.mulf %145, %280 : vector<1x128xf32>
    %282 = arith.addf %279, %281 : vector<1x128xf32>
    %283 = arith.mulf %89, %89 : vector<1x128xf32>
    %cst_126 = arith.constant 0.000000e+00 : f32
    %284 = vector.broadcast %cst_126 : f32 to vector<1x128xf32>
    %285 = arith.addf %284, %283 : vector<1x128xf32>
    %286 = arith.mulf %93, %93 : vector<1x128xf32>
    %287 = arith.addf %285, %286 : vector<1x128xf32>
    %288 = arith.mulf %97, %97 : vector<1x128xf32>
    %289 = arith.addf %287, %288 : vector<1x128xf32>
    %290 = arith.mulf %101, %101 : vector<1x128xf32>
    %291 = arith.addf %289, %290 : vector<1x128xf32>
    %292 = arith.mulf %105, %105 : vector<1x128xf32>
    %293 = arith.addf %291, %292 : vector<1x128xf32>
    %294 = arith.mulf %93, %93 : vector<1x128xf32>
    %295 = arith.addf %293, %294 : vector<1x128xf32>
    %296 = arith.mulf %109, %109 : vector<1x128xf32>
    %297 = arith.addf %295, %296 : vector<1x128xf32>
    %298 = arith.mulf %113, %113 : vector<1x128xf32>
    %299 = arith.addf %297, %298 : vector<1x128xf32>
    %300 = arith.mulf %117, %117 : vector<1x128xf32>
    %301 = arith.addf %299, %300 : vector<1x128xf32>
    %302 = arith.mulf %121, %121 : vector<1x128xf32>
    %303 = arith.addf %301, %302 : vector<1x128xf32>
    %304 = arith.mulf %97, %97 : vector<1x128xf32>
    %305 = arith.addf %303, %304 : vector<1x128xf32>
    %306 = arith.mulf %113, %113 : vector<1x128xf32>
    %307 = arith.addf %305, %306 : vector<1x128xf32>
    %308 = arith.mulf %125, %125 : vector<1x128xf32>
    %309 = arith.addf %307, %308 : vector<1x128xf32>
    %310 = arith.mulf %129, %129 : vector<1x128xf32>
    %311 = arith.addf %309, %310 : vector<1x128xf32>
    %312 = arith.mulf %133, %133 : vector<1x128xf32>
    %313 = arith.addf %311, %312 : vector<1x128xf32>
    %314 = arith.mulf %101, %101 : vector<1x128xf32>
    %315 = arith.addf %313, %314 : vector<1x128xf32>
    %316 = arith.mulf %117, %117 : vector<1x128xf32>
    %317 = arith.addf %315, %316 : vector<1x128xf32>
    %318 = arith.mulf %129, %129 : vector<1x128xf32>
    %319 = arith.addf %317, %318 : vector<1x128xf32>
    %320 = arith.mulf %137, %137 : vector<1x128xf32>
    %321 = arith.addf %319, %320 : vector<1x128xf32>
    %322 = arith.mulf %141, %141 : vector<1x128xf32>
    %323 = arith.addf %321, %322 : vector<1x128xf32>
    %324 = arith.mulf %105, %105 : vector<1x128xf32>
    %325 = arith.addf %323, %324 : vector<1x128xf32>
    %326 = arith.mulf %121, %121 : vector<1x128xf32>
    %327 = arith.addf %325, %326 : vector<1x128xf32>
    %328 = arith.mulf %133, %133 : vector<1x128xf32>
    %329 = arith.addf %327, %328 : vector<1x128xf32>
    %330 = arith.mulf %141, %141 : vector<1x128xf32>
    %331 = arith.addf %329, %330 : vector<1x128xf32>
    %332 = arith.mulf %145, %145 : vector<1x128xf32>
    %333 = arith.addf %331, %332 : vector<1x128xf32>
    %334 = math.sqrt %333 : vector<1x128xf32>
    %cst_127 = arith.constant 0.000000e+00 : f32
    %335 = vector.broadcast %cst_127 : f32 to vector<1x128xf32>
    %336 = arith.mulf %335, %89 : vector<1x128xf32>
    %cst_128 = arith.constant 0.000000e+00 : f32
    %337 = vector.broadcast %cst_128 : f32 to vector<1x128xf32>
    %338 = arith.addf %337, %336 : vector<1x128xf32>
    %cst_129 = arith.constant 0.000000e+00 : f32
    %339 = vector.broadcast %cst_129 : f32 to vector<1x128xf32>
    %340 = arith.mulf %339, %93 : vector<1x128xf32>
    %341 = arith.addf %338, %340 : vector<1x128xf32>
    %cst_130 = arith.constant 0.000000e+00 : f32
    %342 = vector.broadcast %cst_130 : f32 to vector<1x128xf32>
    %343 = arith.mulf %342, %97 : vector<1x128xf32>
    %344 = arith.addf %341, %343 : vector<1x128xf32>
    %cst_131 = arith.constant 0.000000e+00 : f32
    %345 = vector.broadcast %cst_131 : f32 to vector<1x128xf32>
    %346 = arith.mulf %345, %101 : vector<1x128xf32>
    %347 = arith.addf %344, %346 : vector<1x128xf32>
    %cst_132 = arith.constant 0.000000e+00 : f32
    %348 = vector.broadcast %cst_132 : f32 to vector<1x128xf32>
    %349 = arith.mulf %348, %105 : vector<1x128xf32>
    %350 = arith.addf %347, %349 : vector<1x128xf32>
    %cst_133 = arith.constant 1.000000e+00 : f32
    %351 = vector.broadcast %cst_133 : f32 to vector<1x128xf32>
    %352 = arith.mulf %351, %93 : vector<1x128xf32>
    %353 = arith.addf %350, %352 : vector<1x128xf32>
    %cst_134 = arith.constant 1.000000e+00 : f32
    %354 = vector.broadcast %cst_134 : f32 to vector<1x128xf32>
    %355 = arith.mulf %354, %109 : vector<1x128xf32>
    %356 = arith.addf %353, %355 : vector<1x128xf32>
    %cst_135 = arith.constant 1.000000e+00 : f32
    %357 = vector.broadcast %cst_135 : f32 to vector<1x128xf32>
    %358 = arith.mulf %357, %113 : vector<1x128xf32>
    %359 = arith.addf %356, %358 : vector<1x128xf32>
    %cst_136 = arith.constant 1.000000e+00 : f32
    %360 = vector.broadcast %cst_136 : f32 to vector<1x128xf32>
    %361 = arith.mulf %360, %117 : vector<1x128xf32>
    %362 = arith.addf %359, %361 : vector<1x128xf32>
    %cst_137 = arith.constant 1.000000e+00 : f32
    %363 = vector.broadcast %cst_137 : f32 to vector<1x128xf32>
    %364 = arith.mulf %363, %121 : vector<1x128xf32>
    %365 = arith.addf %362, %364 : vector<1x128xf32>
    %cst_138 = arith.constant 2.000000e+00 : f32
    %366 = vector.broadcast %cst_138 : f32 to vector<1x128xf32>
    %367 = arith.mulf %366, %97 : vector<1x128xf32>
    %368 = arith.addf %365, %367 : vector<1x128xf32>
    %cst_139 = arith.constant 2.000000e+00 : f32
    %369 = vector.broadcast %cst_139 : f32 to vector<1x128xf32>
    %370 = arith.mulf %369, %113 : vector<1x128xf32>
    %371 = arith.addf %368, %370 : vector<1x128xf32>
    %cst_140 = arith.constant 2.000000e+00 : f32
    %372 = vector.broadcast %cst_140 : f32 to vector<1x128xf32>
    %373 = arith.mulf %372, %125 : vector<1x128xf32>
    %374 = arith.addf %371, %373 : vector<1x128xf32>
    %cst_141 = arith.constant 2.000000e+00 : f32
    %375 = vector.broadcast %cst_141 : f32 to vector<1x128xf32>
    %376 = arith.mulf %375, %129 : vector<1x128xf32>
    %377 = arith.addf %374, %376 : vector<1x128xf32>
    %cst_142 = arith.constant 2.000000e+00 : f32
    %378 = vector.broadcast %cst_142 : f32 to vector<1x128xf32>
    %379 = arith.mulf %378, %133 : vector<1x128xf32>
    %380 = arith.addf %377, %379 : vector<1x128xf32>
    %cst_143 = arith.constant 3.000000e+00 : f32
    %381 = vector.broadcast %cst_143 : f32 to vector<1x128xf32>
    %382 = arith.mulf %381, %101 : vector<1x128xf32>
    %383 = arith.addf %380, %382 : vector<1x128xf32>
    %cst_144 = arith.constant 3.000000e+00 : f32
    %384 = vector.broadcast %cst_144 : f32 to vector<1x128xf32>
    %385 = arith.mulf %384, %117 : vector<1x128xf32>
    %386 = arith.addf %383, %385 : vector<1x128xf32>
    %cst_145 = arith.constant 3.000000e+00 : f32
    %387 = vector.broadcast %cst_145 : f32 to vector<1x128xf32>
    %388 = arith.mulf %387, %129 : vector<1x128xf32>
    %389 = arith.addf %386, %388 : vector<1x128xf32>
    %cst_146 = arith.constant 3.000000e+00 : f32
    %390 = vector.broadcast %cst_146 : f32 to vector<1x128xf32>
    %391 = arith.mulf %390, %137 : vector<1x128xf32>
    %392 = arith.addf %389, %391 : vector<1x128xf32>
    %cst_147 = arith.constant 3.000000e+00 : f32
    %393 = vector.broadcast %cst_147 : f32 to vector<1x128xf32>
    %394 = arith.mulf %393, %141 : vector<1x128xf32>
    %395 = arith.addf %392, %394 : vector<1x128xf32>
    %cst_148 = arith.constant 4.000000e+00 : f32
    %396 = vector.broadcast %cst_148 : f32 to vector<1x128xf32>
    %397 = arith.mulf %396, %105 : vector<1x128xf32>
    %398 = arith.addf %395, %397 : vector<1x128xf32>
    %cst_149 = arith.constant 4.000000e+00 : f32
    %399 = vector.broadcast %cst_149 : f32 to vector<1x128xf32>
    %400 = arith.mulf %399, %121 : vector<1x128xf32>
    %401 = arith.addf %398, %400 : vector<1x128xf32>
    %cst_150 = arith.constant 4.000000e+00 : f32
    %402 = vector.broadcast %cst_150 : f32 to vector<1x128xf32>
    %403 = arith.mulf %402, %133 : vector<1x128xf32>
    %404 = arith.addf %401, %403 : vector<1x128xf32>
    %cst_151 = arith.constant 4.000000e+00 : f32
    %405 = vector.broadcast %cst_151 : f32 to vector<1x128xf32>
    %406 = arith.mulf %405, %141 : vector<1x128xf32>
    %407 = arith.addf %404, %406 : vector<1x128xf32>
    %cst_152 = arith.constant 4.000000e+00 : f32
    %408 = vector.broadcast %cst_152 : f32 to vector<1x128xf32>
    %409 = arith.mulf %408, %145 : vector<1x128xf32>
    %410 = arith.addf %407, %409 : vector<1x128xf32>
    %cst_153 = arith.constant 0.000000e+00 : f32
    %411 = vector.broadcast %cst_153 : f32 to vector<1x128xf32>
    %412 = arith.mulf %411, %89 : vector<1x128xf32>
    %cst_154 = arith.constant 0.000000e+00 : f32
    %413 = vector.broadcast %cst_154 : f32 to vector<1x128xf32>
    %414 = arith.addf %413, %412 : vector<1x128xf32>
    %cst_155 = arith.constant 1.000000e+00 : f32
    %415 = vector.broadcast %cst_155 : f32 to vector<1x128xf32>
    %416 = arith.mulf %415, %93 : vector<1x128xf32>
    %417 = arith.addf %414, %416 : vector<1x128xf32>
    %cst_156 = arith.constant 2.000000e+00 : f32
    %418 = vector.broadcast %cst_156 : f32 to vector<1x128xf32>
    %419 = arith.mulf %418, %97 : vector<1x128xf32>
    %420 = arith.addf %417, %419 : vector<1x128xf32>
    %cst_157 = arith.constant 3.000000e+00 : f32
    %421 = vector.broadcast %cst_157 : f32 to vector<1x128xf32>
    %422 = arith.mulf %421, %101 : vector<1x128xf32>
    %423 = arith.addf %420, %422 : vector<1x128xf32>
    %cst_158 = arith.constant 4.000000e+00 : f32
    %424 = vector.broadcast %cst_158 : f32 to vector<1x128xf32>
    %425 = arith.mulf %424, %105 : vector<1x128xf32>
    %426 = arith.addf %423, %425 : vector<1x128xf32>
    %cst_159 = arith.constant 0.000000e+00 : f32
    %427 = vector.broadcast %cst_159 : f32 to vector<1x128xf32>
    %428 = arith.mulf %427, %93 : vector<1x128xf32>
    %429 = arith.addf %426, %428 : vector<1x128xf32>
    %cst_160 = arith.constant 1.000000e+00 : f32
    %430 = vector.broadcast %cst_160 : f32 to vector<1x128xf32>
    %431 = arith.mulf %430, %109 : vector<1x128xf32>
    %432 = arith.addf %429, %431 : vector<1x128xf32>
    %cst_161 = arith.constant 2.000000e+00 : f32
    %433 = vector.broadcast %cst_161 : f32 to vector<1x128xf32>
    %434 = arith.mulf %433, %113 : vector<1x128xf32>
    %435 = arith.addf %432, %434 : vector<1x128xf32>
    %cst_162 = arith.constant 3.000000e+00 : f32
    %436 = vector.broadcast %cst_162 : f32 to vector<1x128xf32>
    %437 = arith.mulf %436, %117 : vector<1x128xf32>
    %438 = arith.addf %435, %437 : vector<1x128xf32>
    %cst_163 = arith.constant 4.000000e+00 : f32
    %439 = vector.broadcast %cst_163 : f32 to vector<1x128xf32>
    %440 = arith.mulf %439, %121 : vector<1x128xf32>
    %441 = arith.addf %438, %440 : vector<1x128xf32>
    %cst_164 = arith.constant 0.000000e+00 : f32
    %442 = vector.broadcast %cst_164 : f32 to vector<1x128xf32>
    %443 = arith.mulf %442, %97 : vector<1x128xf32>
    %444 = arith.addf %441, %443 : vector<1x128xf32>
    %cst_165 = arith.constant 1.000000e+00 : f32
    %445 = vector.broadcast %cst_165 : f32 to vector<1x128xf32>
    %446 = arith.mulf %445, %113 : vector<1x128xf32>
    %447 = arith.addf %444, %446 : vector<1x128xf32>
    %cst_166 = arith.constant 2.000000e+00 : f32
    %448 = vector.broadcast %cst_166 : f32 to vector<1x128xf32>
    %449 = arith.mulf %448, %125 : vector<1x128xf32>
    %450 = arith.addf %447, %449 : vector<1x128xf32>
    %cst_167 = arith.constant 3.000000e+00 : f32
    %451 = vector.broadcast %cst_167 : f32 to vector<1x128xf32>
    %452 = arith.mulf %451, %129 : vector<1x128xf32>
    %453 = arith.addf %450, %452 : vector<1x128xf32>
    %cst_168 = arith.constant 4.000000e+00 : f32
    %454 = vector.broadcast %cst_168 : f32 to vector<1x128xf32>
    %455 = arith.mulf %454, %133 : vector<1x128xf32>
    %456 = arith.addf %453, %455 : vector<1x128xf32>
    %cst_169 = arith.constant 0.000000e+00 : f32
    %457 = vector.broadcast %cst_169 : f32 to vector<1x128xf32>
    %458 = arith.mulf %457, %101 : vector<1x128xf32>
    %459 = arith.addf %456, %458 : vector<1x128xf32>
    %cst_170 = arith.constant 1.000000e+00 : f32
    %460 = vector.broadcast %cst_170 : f32 to vector<1x128xf32>
    %461 = arith.mulf %460, %117 : vector<1x128xf32>
    %462 = arith.addf %459, %461 : vector<1x128xf32>
    %cst_171 = arith.constant 2.000000e+00 : f32
    %463 = vector.broadcast %cst_171 : f32 to vector<1x128xf32>
    %464 = arith.mulf %463, %129 : vector<1x128xf32>
    %465 = arith.addf %462, %464 : vector<1x128xf32>
    %cst_172 = arith.constant 3.000000e+00 : f32
    %466 = vector.broadcast %cst_172 : f32 to vector<1x128xf32>
    %467 = arith.mulf %466, %137 : vector<1x128xf32>
    %468 = arith.addf %465, %467 : vector<1x128xf32>
    %cst_173 = arith.constant 4.000000e+00 : f32
    %469 = vector.broadcast %cst_173 : f32 to vector<1x128xf32>
    %470 = arith.mulf %469, %141 : vector<1x128xf32>
    %471 = arith.addf %468, %470 : vector<1x128xf32>
    %cst_174 = arith.constant 0.000000e+00 : f32
    %472 = vector.broadcast %cst_174 : f32 to vector<1x128xf32>
    %473 = arith.mulf %472, %105 : vector<1x128xf32>
    %474 = arith.addf %471, %473 : vector<1x128xf32>
    %cst_175 = arith.constant 1.000000e+00 : f32
    %475 = vector.broadcast %cst_175 : f32 to vector<1x128xf32>
    %476 = arith.mulf %475, %121 : vector<1x128xf32>
    %477 = arith.addf %474, %476 : vector<1x128xf32>
    %cst_176 = arith.constant 2.000000e+00 : f32
    %478 = vector.broadcast %cst_176 : f32 to vector<1x128xf32>
    %479 = arith.mulf %478, %133 : vector<1x128xf32>
    %480 = arith.addf %477, %479 : vector<1x128xf32>
    %cst_177 = arith.constant 3.000000e+00 : f32
    %481 = vector.broadcast %cst_177 : f32 to vector<1x128xf32>
    %482 = arith.mulf %481, %141 : vector<1x128xf32>
    %483 = arith.addf %480, %482 : vector<1x128xf32>
    %cst_178 = arith.constant 4.000000e+00 : f32
    %484 = vector.broadcast %cst_178 : f32 to vector<1x128xf32>
    %485 = arith.mulf %484, %145 : vector<1x128xf32>
    %486 = arith.addf %483, %485 : vector<1x128xf32>
    %cst_179 = arith.constant 0.000000e+00 : f32
    %487 = vector.broadcast %cst_179 : f32 to vector<1x128xf32>
    %488 = arith.subf %487, %410 : vector<1x128xf32>
    %489 = arith.mulf %488, %488 : vector<1x128xf32>
    %490 = arith.mulf %89, %489 : vector<1x128xf32>
    %cst_180 = arith.constant 0.000000e+00 : f32
    %491 = vector.broadcast %cst_180 : f32 to vector<1x128xf32>
    %492 = arith.addf %491, %490 : vector<1x128xf32>
    %cst_181 = arith.constant 0.000000e+00 : f32
    %493 = vector.broadcast %cst_181 : f32 to vector<1x128xf32>
    %494 = arith.subf %493, %410 : vector<1x128xf32>
    %495 = arith.mulf %494, %494 : vector<1x128xf32>
    %496 = arith.mulf %93, %495 : vector<1x128xf32>
    %497 = arith.addf %492, %496 : vector<1x128xf32>
    %cst_182 = arith.constant 0.000000e+00 : f32
    %498 = vector.broadcast %cst_182 : f32 to vector<1x128xf32>
    %499 = arith.subf %498, %410 : vector<1x128xf32>
    %500 = arith.mulf %499, %499 : vector<1x128xf32>
    %501 = arith.mulf %97, %500 : vector<1x128xf32>
    %502 = arith.addf %497, %501 : vector<1x128xf32>
    %cst_183 = arith.constant 0.000000e+00 : f32
    %503 = vector.broadcast %cst_183 : f32 to vector<1x128xf32>
    %504 = arith.subf %503, %410 : vector<1x128xf32>
    %505 = arith.mulf %504, %504 : vector<1x128xf32>
    %506 = arith.mulf %101, %505 : vector<1x128xf32>
    %507 = arith.addf %502, %506 : vector<1x128xf32>
    %cst_184 = arith.constant 0.000000e+00 : f32
    %508 = vector.broadcast %cst_184 : f32 to vector<1x128xf32>
    %509 = arith.subf %508, %410 : vector<1x128xf32>
    %510 = arith.mulf %509, %509 : vector<1x128xf32>
    %511 = arith.mulf %105, %510 : vector<1x128xf32>
    %512 = arith.addf %507, %511 : vector<1x128xf32>
    %cst_185 = arith.constant 1.000000e+00 : f32
    %513 = vector.broadcast %cst_185 : f32 to vector<1x128xf32>
    %514 = arith.subf %513, %410 : vector<1x128xf32>
    %515 = arith.mulf %514, %514 : vector<1x128xf32>
    %516 = arith.mulf %93, %515 : vector<1x128xf32>
    %517 = arith.addf %512, %516 : vector<1x128xf32>
    %cst_186 = arith.constant 1.000000e+00 : f32
    %518 = vector.broadcast %cst_186 : f32 to vector<1x128xf32>
    %519 = arith.subf %518, %410 : vector<1x128xf32>
    %520 = arith.mulf %519, %519 : vector<1x128xf32>
    %521 = arith.mulf %109, %520 : vector<1x128xf32>
    %522 = arith.addf %517, %521 : vector<1x128xf32>
    %cst_187 = arith.constant 1.000000e+00 : f32
    %523 = vector.broadcast %cst_187 : f32 to vector<1x128xf32>
    %524 = arith.subf %523, %410 : vector<1x128xf32>
    %525 = arith.mulf %524, %524 : vector<1x128xf32>
    %526 = arith.mulf %113, %525 : vector<1x128xf32>
    %527 = arith.addf %522, %526 : vector<1x128xf32>
    %cst_188 = arith.constant 1.000000e+00 : f32
    %528 = vector.broadcast %cst_188 : f32 to vector<1x128xf32>
    %529 = arith.subf %528, %410 : vector<1x128xf32>
    %530 = arith.mulf %529, %529 : vector<1x128xf32>
    %531 = arith.mulf %117, %530 : vector<1x128xf32>
    %532 = arith.addf %527, %531 : vector<1x128xf32>
    %cst_189 = arith.constant 1.000000e+00 : f32
    %533 = vector.broadcast %cst_189 : f32 to vector<1x128xf32>
    %534 = arith.subf %533, %410 : vector<1x128xf32>
    %535 = arith.mulf %534, %534 : vector<1x128xf32>
    %536 = arith.mulf %121, %535 : vector<1x128xf32>
    %537 = arith.addf %532, %536 : vector<1x128xf32>
    %cst_190 = arith.constant 2.000000e+00 : f32
    %538 = vector.broadcast %cst_190 : f32 to vector<1x128xf32>
    %539 = arith.subf %538, %410 : vector<1x128xf32>
    %540 = arith.mulf %539, %539 : vector<1x128xf32>
    %541 = arith.mulf %97, %540 : vector<1x128xf32>
    %542 = arith.addf %537, %541 : vector<1x128xf32>
    %cst_191 = arith.constant 2.000000e+00 : f32
    %543 = vector.broadcast %cst_191 : f32 to vector<1x128xf32>
    %544 = arith.subf %543, %410 : vector<1x128xf32>
    %545 = arith.mulf %544, %544 : vector<1x128xf32>
    %546 = arith.mulf %113, %545 : vector<1x128xf32>
    %547 = arith.addf %542, %546 : vector<1x128xf32>
    %cst_192 = arith.constant 2.000000e+00 : f32
    %548 = vector.broadcast %cst_192 : f32 to vector<1x128xf32>
    %549 = arith.subf %548, %410 : vector<1x128xf32>
    %550 = arith.mulf %549, %549 : vector<1x128xf32>
    %551 = arith.mulf %125, %550 : vector<1x128xf32>
    %552 = arith.addf %547, %551 : vector<1x128xf32>
    %cst_193 = arith.constant 2.000000e+00 : f32
    %553 = vector.broadcast %cst_193 : f32 to vector<1x128xf32>
    %554 = arith.subf %553, %410 : vector<1x128xf32>
    %555 = arith.mulf %554, %554 : vector<1x128xf32>
    %556 = arith.mulf %129, %555 : vector<1x128xf32>
    %557 = arith.addf %552, %556 : vector<1x128xf32>
    %cst_194 = arith.constant 2.000000e+00 : f32
    %558 = vector.broadcast %cst_194 : f32 to vector<1x128xf32>
    %559 = arith.subf %558, %410 : vector<1x128xf32>
    %560 = arith.mulf %559, %559 : vector<1x128xf32>
    %561 = arith.mulf %133, %560 : vector<1x128xf32>
    %562 = arith.addf %557, %561 : vector<1x128xf32>
    %cst_195 = arith.constant 3.000000e+00 : f32
    %563 = vector.broadcast %cst_195 : f32 to vector<1x128xf32>
    %564 = arith.subf %563, %410 : vector<1x128xf32>
    %565 = arith.mulf %564, %564 : vector<1x128xf32>
    %566 = arith.mulf %101, %565 : vector<1x128xf32>
    %567 = arith.addf %562, %566 : vector<1x128xf32>
    %cst_196 = arith.constant 3.000000e+00 : f32
    %568 = vector.broadcast %cst_196 : f32 to vector<1x128xf32>
    %569 = arith.subf %568, %410 : vector<1x128xf32>
    %570 = arith.mulf %569, %569 : vector<1x128xf32>
    %571 = arith.mulf %117, %570 : vector<1x128xf32>
    %572 = arith.addf %567, %571 : vector<1x128xf32>
    %cst_197 = arith.constant 3.000000e+00 : f32
    %573 = vector.broadcast %cst_197 : f32 to vector<1x128xf32>
    %574 = arith.subf %573, %410 : vector<1x128xf32>
    %575 = arith.mulf %574, %574 : vector<1x128xf32>
    %576 = arith.mulf %129, %575 : vector<1x128xf32>
    %577 = arith.addf %572, %576 : vector<1x128xf32>
    %cst_198 = arith.constant 3.000000e+00 : f32
    %578 = vector.broadcast %cst_198 : f32 to vector<1x128xf32>
    %579 = arith.subf %578, %410 : vector<1x128xf32>
    %580 = arith.mulf %579, %579 : vector<1x128xf32>
    %581 = arith.mulf %137, %580 : vector<1x128xf32>
    %582 = arith.addf %577, %581 : vector<1x128xf32>
    %cst_199 = arith.constant 3.000000e+00 : f32
    %583 = vector.broadcast %cst_199 : f32 to vector<1x128xf32>
    %584 = arith.subf %583, %410 : vector<1x128xf32>
    %585 = arith.mulf %584, %584 : vector<1x128xf32>
    %586 = arith.mulf %141, %585 : vector<1x128xf32>
    %587 = arith.addf %582, %586 : vector<1x128xf32>
    %cst_200 = arith.constant 4.000000e+00 : f32
    %588 = vector.broadcast %cst_200 : f32 to vector<1x128xf32>
    %589 = arith.subf %588, %410 : vector<1x128xf32>
    %590 = arith.mulf %589, %589 : vector<1x128xf32>
    %591 = arith.mulf %105, %590 : vector<1x128xf32>
    %592 = arith.addf %587, %591 : vector<1x128xf32>
    %cst_201 = arith.constant 4.000000e+00 : f32
    %593 = vector.broadcast %cst_201 : f32 to vector<1x128xf32>
    %594 = arith.subf %593, %410 : vector<1x128xf32>
    %595 = arith.mulf %594, %594 : vector<1x128xf32>
    %596 = arith.mulf %121, %595 : vector<1x128xf32>
    %597 = arith.addf %592, %596 : vector<1x128xf32>
    %cst_202 = arith.constant 4.000000e+00 : f32
    %598 = vector.broadcast %cst_202 : f32 to vector<1x128xf32>
    %599 = arith.subf %598, %410 : vector<1x128xf32>
    %600 = arith.mulf %599, %599 : vector<1x128xf32>
    %601 = arith.mulf %133, %600 : vector<1x128xf32>
    %602 = arith.addf %597, %601 : vector<1x128xf32>
    %cst_203 = arith.constant 4.000000e+00 : f32
    %603 = vector.broadcast %cst_203 : f32 to vector<1x128xf32>
    %604 = arith.subf %603, %410 : vector<1x128xf32>
    %605 = arith.mulf %604, %604 : vector<1x128xf32>
    %606 = arith.mulf %141, %605 : vector<1x128xf32>
    %607 = arith.addf %602, %606 : vector<1x128xf32>
    %cst_204 = arith.constant 4.000000e+00 : f32
    %608 = vector.broadcast %cst_204 : f32 to vector<1x128xf32>
    %609 = arith.subf %608, %410 : vector<1x128xf32>
    %610 = arith.mulf %609, %609 : vector<1x128xf32>
    %611 = arith.mulf %145, %610 : vector<1x128xf32>
    %612 = arith.addf %607, %611 : vector<1x128xf32>
    %cst_205 = arith.constant 0.000000e+00 : f32
    %613 = vector.broadcast %cst_205 : f32 to vector<1x128xf32>
    %614 = arith.subf %613, %486 : vector<1x128xf32>
    %615 = arith.mulf %614, %614 : vector<1x128xf32>
    %616 = arith.mulf %89, %615 : vector<1x128xf32>
    %cst_206 = arith.constant 0.000000e+00 : f32
    %617 = vector.broadcast %cst_206 : f32 to vector<1x128xf32>
    %618 = arith.addf %617, %616 : vector<1x128xf32>
    %cst_207 = arith.constant 1.000000e+00 : f32
    %619 = vector.broadcast %cst_207 : f32 to vector<1x128xf32>
    %620 = arith.subf %619, %486 : vector<1x128xf32>
    %621 = arith.mulf %620, %620 : vector<1x128xf32>
    %622 = arith.mulf %93, %621 : vector<1x128xf32>
    %623 = arith.addf %618, %622 : vector<1x128xf32>
    %cst_208 = arith.constant 2.000000e+00 : f32
    %624 = vector.broadcast %cst_208 : f32 to vector<1x128xf32>
    %625 = arith.subf %624, %486 : vector<1x128xf32>
    %626 = arith.mulf %625, %625 : vector<1x128xf32>
    %627 = arith.mulf %97, %626 : vector<1x128xf32>
    %628 = arith.addf %623, %627 : vector<1x128xf32>
    %cst_209 = arith.constant 3.000000e+00 : f32
    %629 = vector.broadcast %cst_209 : f32 to vector<1x128xf32>
    %630 = arith.subf %629, %486 : vector<1x128xf32>
    %631 = arith.mulf %630, %630 : vector<1x128xf32>
    %632 = arith.mulf %101, %631 : vector<1x128xf32>
    %633 = arith.addf %628, %632 : vector<1x128xf32>
    %cst_210 = arith.constant 4.000000e+00 : f32
    %634 = vector.broadcast %cst_210 : f32 to vector<1x128xf32>
    %635 = arith.subf %634, %486 : vector<1x128xf32>
    %636 = arith.mulf %635, %635 : vector<1x128xf32>
    %637 = arith.mulf %105, %636 : vector<1x128xf32>
    %638 = arith.addf %633, %637 : vector<1x128xf32>
    %cst_211 = arith.constant 0.000000e+00 : f32
    %639 = vector.broadcast %cst_211 : f32 to vector<1x128xf32>
    %640 = arith.subf %639, %486 : vector<1x128xf32>
    %641 = arith.mulf %640, %640 : vector<1x128xf32>
    %642 = arith.mulf %93, %641 : vector<1x128xf32>
    %643 = arith.addf %638, %642 : vector<1x128xf32>
    %cst_212 = arith.constant 1.000000e+00 : f32
    %644 = vector.broadcast %cst_212 : f32 to vector<1x128xf32>
    %645 = arith.subf %644, %486 : vector<1x128xf32>
    %646 = arith.mulf %645, %645 : vector<1x128xf32>
    %647 = arith.mulf %109, %646 : vector<1x128xf32>
    %648 = arith.addf %643, %647 : vector<1x128xf32>
    %cst_213 = arith.constant 2.000000e+00 : f32
    %649 = vector.broadcast %cst_213 : f32 to vector<1x128xf32>
    %650 = arith.subf %649, %486 : vector<1x128xf32>
    %651 = arith.mulf %650, %650 : vector<1x128xf32>
    %652 = arith.mulf %113, %651 : vector<1x128xf32>
    %653 = arith.addf %648, %652 : vector<1x128xf32>
    %cst_214 = arith.constant 3.000000e+00 : f32
    %654 = vector.broadcast %cst_214 : f32 to vector<1x128xf32>
    %655 = arith.subf %654, %486 : vector<1x128xf32>
    %656 = arith.mulf %655, %655 : vector<1x128xf32>
    %657 = arith.mulf %117, %656 : vector<1x128xf32>
    %658 = arith.addf %653, %657 : vector<1x128xf32>
    %cst_215 = arith.constant 4.000000e+00 : f32
    %659 = vector.broadcast %cst_215 : f32 to vector<1x128xf32>
    %660 = arith.subf %659, %486 : vector<1x128xf32>
    %661 = arith.mulf %660, %660 : vector<1x128xf32>
    %662 = arith.mulf %121, %661 : vector<1x128xf32>
    %663 = arith.addf %658, %662 : vector<1x128xf32>
    %cst_216 = arith.constant 0.000000e+00 : f32
    %664 = vector.broadcast %cst_216 : f32 to vector<1x128xf32>
    %665 = arith.subf %664, %486 : vector<1x128xf32>
    %666 = arith.mulf %665, %665 : vector<1x128xf32>
    %667 = arith.mulf %97, %666 : vector<1x128xf32>
    %668 = arith.addf %663, %667 : vector<1x128xf32>
    %cst_217 = arith.constant 1.000000e+00 : f32
    %669 = vector.broadcast %cst_217 : f32 to vector<1x128xf32>
    %670 = arith.subf %669, %486 : vector<1x128xf32>
    %671 = arith.mulf %670, %670 : vector<1x128xf32>
    %672 = arith.mulf %113, %671 : vector<1x128xf32>
    %673 = arith.addf %668, %672 : vector<1x128xf32>
    %cst_218 = arith.constant 2.000000e+00 : f32
    %674 = vector.broadcast %cst_218 : f32 to vector<1x128xf32>
    %675 = arith.subf %674, %486 : vector<1x128xf32>
    %676 = arith.mulf %675, %675 : vector<1x128xf32>
    %677 = arith.mulf %125, %676 : vector<1x128xf32>
    %678 = arith.addf %673, %677 : vector<1x128xf32>
    %cst_219 = arith.constant 3.000000e+00 : f32
    %679 = vector.broadcast %cst_219 : f32 to vector<1x128xf32>
    %680 = arith.subf %679, %486 : vector<1x128xf32>
    %681 = arith.mulf %680, %680 : vector<1x128xf32>
    %682 = arith.mulf %129, %681 : vector<1x128xf32>
    %683 = arith.addf %678, %682 : vector<1x128xf32>
    %cst_220 = arith.constant 4.000000e+00 : f32
    %684 = vector.broadcast %cst_220 : f32 to vector<1x128xf32>
    %685 = arith.subf %684, %486 : vector<1x128xf32>
    %686 = arith.mulf %685, %685 : vector<1x128xf32>
    %687 = arith.mulf %133, %686 : vector<1x128xf32>
    %688 = arith.addf %683, %687 : vector<1x128xf32>
    %cst_221 = arith.constant 0.000000e+00 : f32
    %689 = vector.broadcast %cst_221 : f32 to vector<1x128xf32>
    %690 = arith.subf %689, %486 : vector<1x128xf32>
    %691 = arith.mulf %690, %690 : vector<1x128xf32>
    %692 = arith.mulf %101, %691 : vector<1x128xf32>
    %693 = arith.addf %688, %692 : vector<1x128xf32>
    %cst_222 = arith.constant 1.000000e+00 : f32
    %694 = vector.broadcast %cst_222 : f32 to vector<1x128xf32>
    %695 = arith.subf %694, %486 : vector<1x128xf32>
    %696 = arith.mulf %695, %695 : vector<1x128xf32>
    %697 = arith.mulf %117, %696 : vector<1x128xf32>
    %698 = arith.addf %693, %697 : vector<1x128xf32>
    %cst_223 = arith.constant 2.000000e+00 : f32
    %699 = vector.broadcast %cst_223 : f32 to vector<1x128xf32>
    %700 = arith.subf %699, %486 : vector<1x128xf32>
    %701 = arith.mulf %700, %700 : vector<1x128xf32>
    %702 = arith.mulf %129, %701 : vector<1x128xf32>
    %703 = arith.addf %698, %702 : vector<1x128xf32>
    %cst_224 = arith.constant 3.000000e+00 : f32
    %704 = vector.broadcast %cst_224 : f32 to vector<1x128xf32>
    %705 = arith.subf %704, %486 : vector<1x128xf32>
    %706 = arith.mulf %705, %705 : vector<1x128xf32>
    %707 = arith.mulf %137, %706 : vector<1x128xf32>
    %708 = arith.addf %703, %707 : vector<1x128xf32>
    %cst_225 = arith.constant 4.000000e+00 : f32
    %709 = vector.broadcast %cst_225 : f32 to vector<1x128xf32>
    %710 = arith.subf %709, %486 : vector<1x128xf32>
    %711 = arith.mulf %710, %710 : vector<1x128xf32>
    %712 = arith.mulf %141, %711 : vector<1x128xf32>
    %713 = arith.addf %708, %712 : vector<1x128xf32>
    %cst_226 = arith.constant 0.000000e+00 : f32
    %714 = vector.broadcast %cst_226 : f32 to vector<1x128xf32>
    %715 = arith.subf %714, %486 : vector<1x128xf32>
    %716 = arith.mulf %715, %715 : vector<1x128xf32>
    %717 = arith.mulf %105, %716 : vector<1x128xf32>
    %718 = arith.addf %713, %717 : vector<1x128xf32>
    %cst_227 = arith.constant 1.000000e+00 : f32
    %719 = vector.broadcast %cst_227 : f32 to vector<1x128xf32>
    %720 = arith.subf %719, %486 : vector<1x128xf32>
    %721 = arith.mulf %720, %720 : vector<1x128xf32>
    %722 = arith.mulf %121, %721 : vector<1x128xf32>
    %723 = arith.addf %718, %722 : vector<1x128xf32>
    %cst_228 = arith.constant 2.000000e+00 : f32
    %724 = vector.broadcast %cst_228 : f32 to vector<1x128xf32>
    %725 = arith.subf %724, %486 : vector<1x128xf32>
    %726 = arith.mulf %725, %725 : vector<1x128xf32>
    %727 = arith.mulf %133, %726 : vector<1x128xf32>
    %728 = arith.addf %723, %727 : vector<1x128xf32>
    %cst_229 = arith.constant 3.000000e+00 : f32
    %729 = vector.broadcast %cst_229 : f32 to vector<1x128xf32>
    %730 = arith.subf %729, %486 : vector<1x128xf32>
    %731 = arith.mulf %730, %730 : vector<1x128xf32>
    %732 = arith.mulf %141, %731 : vector<1x128xf32>
    %733 = arith.addf %728, %732 : vector<1x128xf32>
    %cst_230 = arith.constant 4.000000e+00 : f32
    %734 = vector.broadcast %cst_230 : f32 to vector<1x128xf32>
    %735 = arith.subf %734, %486 : vector<1x128xf32>
    %736 = arith.mulf %735, %735 : vector<1x128xf32>
    %737 = arith.mulf %145, %736 : vector<1x128xf32>
    %738 = arith.addf %733, %737 : vector<1x128xf32>
    %cst_231 = arith.constant 0.000000e+00 : f32
    %739 = vector.broadcast %cst_231 : f32 to vector<1x128xf32>
    %740 = arith.subf %739, %410 : vector<1x128xf32>
    %741 = arith.mulf %89, %740 : vector<1x128xf32>
    %cst_232 = arith.constant 0.000000e+00 : f32
    %742 = vector.broadcast %cst_232 : f32 to vector<1x128xf32>
    %743 = arith.subf %742, %486 : vector<1x128xf32>
    %744 = arith.mulf %741, %743 : vector<1x128xf32>
    %cst_233 = arith.constant 0.000000e+00 : f32
    %745 = vector.broadcast %cst_233 : f32 to vector<1x128xf32>
    %746 = arith.addf %745, %744 : vector<1x128xf32>
    %cst_234 = arith.constant 0.000000e+00 : f32
    %747 = vector.broadcast %cst_234 : f32 to vector<1x128xf32>
    %748 = arith.subf %747, %410 : vector<1x128xf32>
    %749 = arith.mulf %93, %748 : vector<1x128xf32>
    %cst_235 = arith.constant 1.000000e+00 : f32
    %750 = vector.broadcast %cst_235 : f32 to vector<1x128xf32>
    %751 = arith.subf %750, %486 : vector<1x128xf32>
    %752 = arith.mulf %749, %751 : vector<1x128xf32>
    %753 = arith.addf %746, %752 : vector<1x128xf32>
    %cst_236 = arith.constant 0.000000e+00 : f32
    %754 = vector.broadcast %cst_236 : f32 to vector<1x128xf32>
    %755 = arith.subf %754, %410 : vector<1x128xf32>
    %756 = arith.mulf %97, %755 : vector<1x128xf32>
    %cst_237 = arith.constant 2.000000e+00 : f32
    %757 = vector.broadcast %cst_237 : f32 to vector<1x128xf32>
    %758 = arith.subf %757, %486 : vector<1x128xf32>
    %759 = arith.mulf %756, %758 : vector<1x128xf32>
    %760 = arith.addf %753, %759 : vector<1x128xf32>
    %cst_238 = arith.constant 0.000000e+00 : f32
    %761 = vector.broadcast %cst_238 : f32 to vector<1x128xf32>
    %762 = arith.subf %761, %410 : vector<1x128xf32>
    %763 = arith.mulf %101, %762 : vector<1x128xf32>
    %cst_239 = arith.constant 3.000000e+00 : f32
    %764 = vector.broadcast %cst_239 : f32 to vector<1x128xf32>
    %765 = arith.subf %764, %486 : vector<1x128xf32>
    %766 = arith.mulf %763, %765 : vector<1x128xf32>
    %767 = arith.addf %760, %766 : vector<1x128xf32>
    %cst_240 = arith.constant 0.000000e+00 : f32
    %768 = vector.broadcast %cst_240 : f32 to vector<1x128xf32>
    %769 = arith.subf %768, %410 : vector<1x128xf32>
    %770 = arith.mulf %105, %769 : vector<1x128xf32>
    %cst_241 = arith.constant 4.000000e+00 : f32
    %771 = vector.broadcast %cst_241 : f32 to vector<1x128xf32>
    %772 = arith.subf %771, %486 : vector<1x128xf32>
    %773 = arith.mulf %770, %772 : vector<1x128xf32>
    %774 = arith.addf %767, %773 : vector<1x128xf32>
    %cst_242 = arith.constant 1.000000e+00 : f32
    %775 = vector.broadcast %cst_242 : f32 to vector<1x128xf32>
    %776 = arith.subf %775, %410 : vector<1x128xf32>
    %777 = arith.mulf %93, %776 : vector<1x128xf32>
    %cst_243 = arith.constant 0.000000e+00 : f32
    %778 = vector.broadcast %cst_243 : f32 to vector<1x128xf32>
    %779 = arith.subf %778, %486 : vector<1x128xf32>
    %780 = arith.mulf %777, %779 : vector<1x128xf32>
    %781 = arith.addf %774, %780 : vector<1x128xf32>
    %cst_244 = arith.constant 1.000000e+00 : f32
    %782 = vector.broadcast %cst_244 : f32 to vector<1x128xf32>
    %783 = arith.subf %782, %410 : vector<1x128xf32>
    %784 = arith.mulf %109, %783 : vector<1x128xf32>
    %cst_245 = arith.constant 1.000000e+00 : f32
    %785 = vector.broadcast %cst_245 : f32 to vector<1x128xf32>
    %786 = arith.subf %785, %486 : vector<1x128xf32>
    %787 = arith.mulf %784, %786 : vector<1x128xf32>
    %788 = arith.addf %781, %787 : vector<1x128xf32>
    %cst_246 = arith.constant 1.000000e+00 : f32
    %789 = vector.broadcast %cst_246 : f32 to vector<1x128xf32>
    %790 = arith.subf %789, %410 : vector<1x128xf32>
    %791 = arith.mulf %113, %790 : vector<1x128xf32>
    %cst_247 = arith.constant 2.000000e+00 : f32
    %792 = vector.broadcast %cst_247 : f32 to vector<1x128xf32>
    %793 = arith.subf %792, %486 : vector<1x128xf32>
    %794 = arith.mulf %791, %793 : vector<1x128xf32>
    %795 = arith.addf %788, %794 : vector<1x128xf32>
    %cst_248 = arith.constant 1.000000e+00 : f32
    %796 = vector.broadcast %cst_248 : f32 to vector<1x128xf32>
    %797 = arith.subf %796, %410 : vector<1x128xf32>
    %798 = arith.mulf %117, %797 : vector<1x128xf32>
    %cst_249 = arith.constant 3.000000e+00 : f32
    %799 = vector.broadcast %cst_249 : f32 to vector<1x128xf32>
    %800 = arith.subf %799, %486 : vector<1x128xf32>
    %801 = arith.mulf %798, %800 : vector<1x128xf32>
    %802 = arith.addf %795, %801 : vector<1x128xf32>
    %cst_250 = arith.constant 1.000000e+00 : f32
    %803 = vector.broadcast %cst_250 : f32 to vector<1x128xf32>
    %804 = arith.subf %803, %410 : vector<1x128xf32>
    %805 = arith.mulf %121, %804 : vector<1x128xf32>
    %cst_251 = arith.constant 4.000000e+00 : f32
    %806 = vector.broadcast %cst_251 : f32 to vector<1x128xf32>
    %807 = arith.subf %806, %486 : vector<1x128xf32>
    %808 = arith.mulf %805, %807 : vector<1x128xf32>
    %809 = arith.addf %802, %808 : vector<1x128xf32>
    %cst_252 = arith.constant 2.000000e+00 : f32
    %810 = vector.broadcast %cst_252 : f32 to vector<1x128xf32>
    %811 = arith.subf %810, %410 : vector<1x128xf32>
    %812 = arith.mulf %97, %811 : vector<1x128xf32>
    %cst_253 = arith.constant 0.000000e+00 : f32
    %813 = vector.broadcast %cst_253 : f32 to vector<1x128xf32>
    %814 = arith.subf %813, %486 : vector<1x128xf32>
    %815 = arith.mulf %812, %814 : vector<1x128xf32>
    %816 = arith.addf %809, %815 : vector<1x128xf32>
    %cst_254 = arith.constant 2.000000e+00 : f32
    %817 = vector.broadcast %cst_254 : f32 to vector<1x128xf32>
    %818 = arith.subf %817, %410 : vector<1x128xf32>
    %819 = arith.mulf %113, %818 : vector<1x128xf32>
    %cst_255 = arith.constant 1.000000e+00 : f32
    %820 = vector.broadcast %cst_255 : f32 to vector<1x128xf32>
    %821 = arith.subf %820, %486 : vector<1x128xf32>
    %822 = arith.mulf %819, %821 : vector<1x128xf32>
    %823 = arith.addf %816, %822 : vector<1x128xf32>
    %cst_256 = arith.constant 2.000000e+00 : f32
    %824 = vector.broadcast %cst_256 : f32 to vector<1x128xf32>
    %825 = arith.subf %824, %410 : vector<1x128xf32>
    %826 = arith.mulf %125, %825 : vector<1x128xf32>
    %cst_257 = arith.constant 2.000000e+00 : f32
    %827 = vector.broadcast %cst_257 : f32 to vector<1x128xf32>
    %828 = arith.subf %827, %486 : vector<1x128xf32>
    %829 = arith.mulf %826, %828 : vector<1x128xf32>
    %830 = arith.addf %823, %829 : vector<1x128xf32>
    %cst_258 = arith.constant 2.000000e+00 : f32
    %831 = vector.broadcast %cst_258 : f32 to vector<1x128xf32>
    %832 = arith.subf %831, %410 : vector<1x128xf32>
    %833 = arith.mulf %129, %832 : vector<1x128xf32>
    %cst_259 = arith.constant 3.000000e+00 : f32
    %834 = vector.broadcast %cst_259 : f32 to vector<1x128xf32>
    %835 = arith.subf %834, %486 : vector<1x128xf32>
    %836 = arith.mulf %833, %835 : vector<1x128xf32>
    %837 = arith.addf %830, %836 : vector<1x128xf32>
    %cst_260 = arith.constant 2.000000e+00 : f32
    %838 = vector.broadcast %cst_260 : f32 to vector<1x128xf32>
    %839 = arith.subf %838, %410 : vector<1x128xf32>
    %840 = arith.mulf %133, %839 : vector<1x128xf32>
    %cst_261 = arith.constant 4.000000e+00 : f32
    %841 = vector.broadcast %cst_261 : f32 to vector<1x128xf32>
    %842 = arith.subf %841, %486 : vector<1x128xf32>
    %843 = arith.mulf %840, %842 : vector<1x128xf32>
    %844 = arith.addf %837, %843 : vector<1x128xf32>
    %cst_262 = arith.constant 3.000000e+00 : f32
    %845 = vector.broadcast %cst_262 : f32 to vector<1x128xf32>
    %846 = arith.subf %845, %410 : vector<1x128xf32>
    %847 = arith.mulf %101, %846 : vector<1x128xf32>
    %cst_263 = arith.constant 0.000000e+00 : f32
    %848 = vector.broadcast %cst_263 : f32 to vector<1x128xf32>
    %849 = arith.subf %848, %486 : vector<1x128xf32>
    %850 = arith.mulf %847, %849 : vector<1x128xf32>
    %851 = arith.addf %844, %850 : vector<1x128xf32>
    %cst_264 = arith.constant 3.000000e+00 : f32
    %852 = vector.broadcast %cst_264 : f32 to vector<1x128xf32>
    %853 = arith.subf %852, %410 : vector<1x128xf32>
    %854 = arith.mulf %117, %853 : vector<1x128xf32>
    %cst_265 = arith.constant 1.000000e+00 : f32
    %855 = vector.broadcast %cst_265 : f32 to vector<1x128xf32>
    %856 = arith.subf %855, %486 : vector<1x128xf32>
    %857 = arith.mulf %854, %856 : vector<1x128xf32>
    %858 = arith.addf %851, %857 : vector<1x128xf32>
    %cst_266 = arith.constant 3.000000e+00 : f32
    %859 = vector.broadcast %cst_266 : f32 to vector<1x128xf32>
    %860 = arith.subf %859, %410 : vector<1x128xf32>
    %861 = arith.mulf %129, %860 : vector<1x128xf32>
    %cst_267 = arith.constant 2.000000e+00 : f32
    %862 = vector.broadcast %cst_267 : f32 to vector<1x128xf32>
    %863 = arith.subf %862, %486 : vector<1x128xf32>
    %864 = arith.mulf %861, %863 : vector<1x128xf32>
    %865 = arith.addf %858, %864 : vector<1x128xf32>
    %cst_268 = arith.constant 3.000000e+00 : f32
    %866 = vector.broadcast %cst_268 : f32 to vector<1x128xf32>
    %867 = arith.subf %866, %410 : vector<1x128xf32>
    %868 = arith.mulf %137, %867 : vector<1x128xf32>
    %cst_269 = arith.constant 3.000000e+00 : f32
    %869 = vector.broadcast %cst_269 : f32 to vector<1x128xf32>
    %870 = arith.subf %869, %486 : vector<1x128xf32>
    %871 = arith.mulf %868, %870 : vector<1x128xf32>
    %872 = arith.addf %865, %871 : vector<1x128xf32>
    %cst_270 = arith.constant 3.000000e+00 : f32
    %873 = vector.broadcast %cst_270 : f32 to vector<1x128xf32>
    %874 = arith.subf %873, %410 : vector<1x128xf32>
    %875 = arith.mulf %141, %874 : vector<1x128xf32>
    %cst_271 = arith.constant 4.000000e+00 : f32
    %876 = vector.broadcast %cst_271 : f32 to vector<1x128xf32>
    %877 = arith.subf %876, %486 : vector<1x128xf32>
    %878 = arith.mulf %875, %877 : vector<1x128xf32>
    %879 = arith.addf %872, %878 : vector<1x128xf32>
    %cst_272 = arith.constant 4.000000e+00 : f32
    %880 = vector.broadcast %cst_272 : f32 to vector<1x128xf32>
    %881 = arith.subf %880, %410 : vector<1x128xf32>
    %882 = arith.mulf %105, %881 : vector<1x128xf32>
    %cst_273 = arith.constant 0.000000e+00 : f32
    %883 = vector.broadcast %cst_273 : f32 to vector<1x128xf32>
    %884 = arith.subf %883, %486 : vector<1x128xf32>
    %885 = arith.mulf %882, %884 : vector<1x128xf32>
    %886 = arith.addf %879, %885 : vector<1x128xf32>
    %cst_274 = arith.constant 4.000000e+00 : f32
    %887 = vector.broadcast %cst_274 : f32 to vector<1x128xf32>
    %888 = arith.subf %887, %410 : vector<1x128xf32>
    %889 = arith.mulf %121, %888 : vector<1x128xf32>
    %cst_275 = arith.constant 1.000000e+00 : f32
    %890 = vector.broadcast %cst_275 : f32 to vector<1x128xf32>
    %891 = arith.subf %890, %486 : vector<1x128xf32>
    %892 = arith.mulf %889, %891 : vector<1x128xf32>
    %893 = arith.addf %886, %892 : vector<1x128xf32>
    %cst_276 = arith.constant 4.000000e+00 : f32
    %894 = vector.broadcast %cst_276 : f32 to vector<1x128xf32>
    %895 = arith.subf %894, %410 : vector<1x128xf32>
    %896 = arith.mulf %133, %895 : vector<1x128xf32>
    %cst_277 = arith.constant 2.000000e+00 : f32
    %897 = vector.broadcast %cst_277 : f32 to vector<1x128xf32>
    %898 = arith.subf %897, %486 : vector<1x128xf32>
    %899 = arith.mulf %896, %898 : vector<1x128xf32>
    %900 = arith.addf %893, %899 : vector<1x128xf32>
    %cst_278 = arith.constant 4.000000e+00 : f32
    %901 = vector.broadcast %cst_278 : f32 to vector<1x128xf32>
    %902 = arith.subf %901, %410 : vector<1x128xf32>
    %903 = arith.mulf %141, %902 : vector<1x128xf32>
    %cst_279 = arith.constant 3.000000e+00 : f32
    %904 = vector.broadcast %cst_279 : f32 to vector<1x128xf32>
    %905 = arith.subf %904, %486 : vector<1x128xf32>
    %906 = arith.mulf %903, %905 : vector<1x128xf32>
    %907 = arith.addf %900, %906 : vector<1x128xf32>
    %cst_280 = arith.constant 4.000000e+00 : f32
    %908 = vector.broadcast %cst_280 : f32 to vector<1x128xf32>
    %909 = arith.subf %908, %410 : vector<1x128xf32>
    %910 = arith.mulf %145, %909 : vector<1x128xf32>
    %cst_281 = arith.constant 4.000000e+00 : f32
    %911 = vector.broadcast %cst_281 : f32 to vector<1x128xf32>
    %912 = arith.subf %911, %486 : vector<1x128xf32>
    %913 = arith.mulf %910, %912 : vector<1x128xf32>
    %914 = arith.addf %907, %913 : vector<1x128xf32>
    %915 = math.sqrt %612 : vector<1x128xf32>
    %916 = math.sqrt %738 : vector<1x128xf32>
    %cst_282 = arith.constant 1.000000e-15 : f32
    %917 = vector.broadcast %cst_282 : f32 to vector<1x128xf32>
    %918 = arith.cmpf ogt, %915, %917 : vector<1x128xf32>
    %cst_283 = arith.constant 1.000000e-15 : f32
    %919 = vector.broadcast %cst_283 : f32 to vector<1x128xf32>
    %920 = arith.cmpf ogt, %916, %919 : vector<1x128xf32>
    %921 = arith.andi %918, %920 : vector<1x128xi1>
    %922 = arith.mulf %915, %916 : vector<1x128xf32>
    %cst_284 = arith.constant 1.000000e-30 : f32
    %923 = vector.broadcast %cst_284 : f32 to vector<1x128xf32>
    %924 = arith.addf %922, %923 : vector<1x128xf32>
    %925 = arith.divf %914, %924 : vector<1x128xf32>
    %cst_285 = arith.constant 1.000000e+00 : f32
    %926 = vector.broadcast %cst_285 : f32 to vector<1x128xf32>
    %927 = arith.select %921, %925, %926 : vector<1x128xi1>, vector<1x128xf32>
    %cst_286 = arith.constant 9.99999993E-9 : f32
    %928 = vector.broadcast %cst_286 : f32 to vector<1x128xf32>
    %929 = arith.addf %89, %928 : vector<1x128xf32>
    %930 = math.log %929 : vector<1x128xf32>
    %cst_287 = arith.constant 2.000000e+00 : f32
    %931 = math.log %cst_287 : f32
    %932 = vector.broadcast %931 : f32 to vector<1x128xf32>
    %933 = arith.divf %930, %932 : vector<1x128xf32>
    %934 = arith.mulf %89, %933 : vector<1x128xf32>
    %cst_288 = arith.constant 0.000000e+00 : f32
    %935 = vector.broadcast %cst_288 : f32 to vector<1x128xf32>
    %936 = arith.addf %935, %934 : vector<1x128xf32>
    %cst_289 = arith.constant 9.99999993E-9 : f32
    %937 = vector.broadcast %cst_289 : f32 to vector<1x128xf32>
    %938 = arith.addf %93, %937 : vector<1x128xf32>
    %939 = math.log %938 : vector<1x128xf32>
    %cst_290 = arith.constant 2.000000e+00 : f32
    %940 = math.log %cst_290 : f32
    %941 = vector.broadcast %940 : f32 to vector<1x128xf32>
    %942 = arith.divf %939, %941 : vector<1x128xf32>
    %943 = arith.mulf %93, %942 : vector<1x128xf32>
    %944 = arith.addf %936, %943 : vector<1x128xf32>
    %cst_291 = arith.constant 9.99999993E-9 : f32
    %945 = vector.broadcast %cst_291 : f32 to vector<1x128xf32>
    %946 = arith.addf %97, %945 : vector<1x128xf32>
    %947 = math.log %946 : vector<1x128xf32>
    %cst_292 = arith.constant 2.000000e+00 : f32
    %948 = math.log %cst_292 : f32
    %949 = vector.broadcast %948 : f32 to vector<1x128xf32>
    %950 = arith.divf %947, %949 : vector<1x128xf32>
    %951 = arith.mulf %97, %950 : vector<1x128xf32>
    %952 = arith.addf %944, %951 : vector<1x128xf32>
    %cst_293 = arith.constant 9.99999993E-9 : f32
    %953 = vector.broadcast %cst_293 : f32 to vector<1x128xf32>
    %954 = arith.addf %101, %953 : vector<1x128xf32>
    %955 = math.log %954 : vector<1x128xf32>
    %cst_294 = arith.constant 2.000000e+00 : f32
    %956 = math.log %cst_294 : f32
    %957 = vector.broadcast %956 : f32 to vector<1x128xf32>
    %958 = arith.divf %955, %957 : vector<1x128xf32>
    %959 = arith.mulf %101, %958 : vector<1x128xf32>
    %960 = arith.addf %952, %959 : vector<1x128xf32>
    %cst_295 = arith.constant 9.99999993E-9 : f32
    %961 = vector.broadcast %cst_295 : f32 to vector<1x128xf32>
    %962 = arith.addf %105, %961 : vector<1x128xf32>
    %963 = math.log %962 : vector<1x128xf32>
    %cst_296 = arith.constant 2.000000e+00 : f32
    %964 = math.log %cst_296 : f32
    %965 = vector.broadcast %964 : f32 to vector<1x128xf32>
    %966 = arith.divf %963, %965 : vector<1x128xf32>
    %967 = arith.mulf %105, %966 : vector<1x128xf32>
    %968 = arith.addf %960, %967 : vector<1x128xf32>
    %cst_297 = arith.constant 9.99999993E-9 : f32
    %969 = vector.broadcast %cst_297 : f32 to vector<1x128xf32>
    %970 = arith.addf %93, %969 : vector<1x128xf32>
    %971 = math.log %970 : vector<1x128xf32>
    %cst_298 = arith.constant 2.000000e+00 : f32
    %972 = math.log %cst_298 : f32
    %973 = vector.broadcast %972 : f32 to vector<1x128xf32>
    %974 = arith.divf %971, %973 : vector<1x128xf32>
    %975 = arith.mulf %93, %974 : vector<1x128xf32>
    %976 = arith.addf %968, %975 : vector<1x128xf32>
    %cst_299 = arith.constant 9.99999993E-9 : f32
    %977 = vector.broadcast %cst_299 : f32 to vector<1x128xf32>
    %978 = arith.addf %109, %977 : vector<1x128xf32>
    %979 = math.log %978 : vector<1x128xf32>
    %cst_300 = arith.constant 2.000000e+00 : f32
    %980 = math.log %cst_300 : f32
    %981 = vector.broadcast %980 : f32 to vector<1x128xf32>
    %982 = arith.divf %979, %981 : vector<1x128xf32>
    %983 = arith.mulf %109, %982 : vector<1x128xf32>
    %984 = arith.addf %976, %983 : vector<1x128xf32>
    %cst_301 = arith.constant 9.99999993E-9 : f32
    %985 = vector.broadcast %cst_301 : f32 to vector<1x128xf32>
    %986 = arith.addf %113, %985 : vector<1x128xf32>
    %987 = math.log %986 : vector<1x128xf32>
    %cst_302 = arith.constant 2.000000e+00 : f32
    %988 = math.log %cst_302 : f32
    %989 = vector.broadcast %988 : f32 to vector<1x128xf32>
    %990 = arith.divf %987, %989 : vector<1x128xf32>
    %991 = arith.mulf %113, %990 : vector<1x128xf32>
    %992 = arith.addf %984, %991 : vector<1x128xf32>
    %cst_303 = arith.constant 9.99999993E-9 : f32
    %993 = vector.broadcast %cst_303 : f32 to vector<1x128xf32>
    %994 = arith.addf %117, %993 : vector<1x128xf32>
    %995 = math.log %994 : vector<1x128xf32>
    %cst_304 = arith.constant 2.000000e+00 : f32
    %996 = math.log %cst_304 : f32
    %997 = vector.broadcast %996 : f32 to vector<1x128xf32>
    %998 = arith.divf %995, %997 : vector<1x128xf32>
    %999 = arith.mulf %117, %998 : vector<1x128xf32>
    %1000 = arith.addf %992, %999 : vector<1x128xf32>
    %cst_305 = arith.constant 9.99999993E-9 : f32
    %1001 = vector.broadcast %cst_305 : f32 to vector<1x128xf32>
    %1002 = arith.addf %121, %1001 : vector<1x128xf32>
    %1003 = math.log %1002 : vector<1x128xf32>
    %cst_306 = arith.constant 2.000000e+00 : f32
    %1004 = math.log %cst_306 : f32
    %1005 = vector.broadcast %1004 : f32 to vector<1x128xf32>
    %1006 = arith.divf %1003, %1005 : vector<1x128xf32>
    %1007 = arith.mulf %121, %1006 : vector<1x128xf32>
    %1008 = arith.addf %1000, %1007 : vector<1x128xf32>
    %cst_307 = arith.constant 9.99999993E-9 : f32
    %1009 = vector.broadcast %cst_307 : f32 to vector<1x128xf32>
    %1010 = arith.addf %97, %1009 : vector<1x128xf32>
    %1011 = math.log %1010 : vector<1x128xf32>
    %cst_308 = arith.constant 2.000000e+00 : f32
    %1012 = math.log %cst_308 : f32
    %1013 = vector.broadcast %1012 : f32 to vector<1x128xf32>
    %1014 = arith.divf %1011, %1013 : vector<1x128xf32>
    %1015 = arith.mulf %97, %1014 : vector<1x128xf32>
    %1016 = arith.addf %1008, %1015 : vector<1x128xf32>
    %cst_309 = arith.constant 9.99999993E-9 : f32
    %1017 = vector.broadcast %cst_309 : f32 to vector<1x128xf32>
    %1018 = arith.addf %113, %1017 : vector<1x128xf32>
    %1019 = math.log %1018 : vector<1x128xf32>
    %cst_310 = arith.constant 2.000000e+00 : f32
    %1020 = math.log %cst_310 : f32
    %1021 = vector.broadcast %1020 : f32 to vector<1x128xf32>
    %1022 = arith.divf %1019, %1021 : vector<1x128xf32>
    %1023 = arith.mulf %113, %1022 : vector<1x128xf32>
    %1024 = arith.addf %1016, %1023 : vector<1x128xf32>
    %cst_311 = arith.constant 9.99999993E-9 : f32
    %1025 = vector.broadcast %cst_311 : f32 to vector<1x128xf32>
    %1026 = arith.addf %125, %1025 : vector<1x128xf32>
    %1027 = math.log %1026 : vector<1x128xf32>
    %cst_312 = arith.constant 2.000000e+00 : f32
    %1028 = math.log %cst_312 : f32
    %1029 = vector.broadcast %1028 : f32 to vector<1x128xf32>
    %1030 = arith.divf %1027, %1029 : vector<1x128xf32>
    %1031 = arith.mulf %125, %1030 : vector<1x128xf32>
    %1032 = arith.addf %1024, %1031 : vector<1x128xf32>
    %cst_313 = arith.constant 9.99999993E-9 : f32
    %1033 = vector.broadcast %cst_313 : f32 to vector<1x128xf32>
    %1034 = arith.addf %129, %1033 : vector<1x128xf32>
    %1035 = math.log %1034 : vector<1x128xf32>
    %cst_314 = arith.constant 2.000000e+00 : f32
    %1036 = math.log %cst_314 : f32
    %1037 = vector.broadcast %1036 : f32 to vector<1x128xf32>
    %1038 = arith.divf %1035, %1037 : vector<1x128xf32>
    %1039 = arith.mulf %129, %1038 : vector<1x128xf32>
    %1040 = arith.addf %1032, %1039 : vector<1x128xf32>
    %cst_315 = arith.constant 9.99999993E-9 : f32
    %1041 = vector.broadcast %cst_315 : f32 to vector<1x128xf32>
    %1042 = arith.addf %133, %1041 : vector<1x128xf32>
    %1043 = math.log %1042 : vector<1x128xf32>
    %cst_316 = arith.constant 2.000000e+00 : f32
    %1044 = math.log %cst_316 : f32
    %1045 = vector.broadcast %1044 : f32 to vector<1x128xf32>
    %1046 = arith.divf %1043, %1045 : vector<1x128xf32>
    %1047 = arith.mulf %133, %1046 : vector<1x128xf32>
    %1048 = arith.addf %1040, %1047 : vector<1x128xf32>
    %cst_317 = arith.constant 9.99999993E-9 : f32
    %1049 = vector.broadcast %cst_317 : f32 to vector<1x128xf32>
    %1050 = arith.addf %101, %1049 : vector<1x128xf32>
    %1051 = math.log %1050 : vector<1x128xf32>
    %cst_318 = arith.constant 2.000000e+00 : f32
    %1052 = math.log %cst_318 : f32
    %1053 = vector.broadcast %1052 : f32 to vector<1x128xf32>
    %1054 = arith.divf %1051, %1053 : vector<1x128xf32>
    %1055 = arith.mulf %101, %1054 : vector<1x128xf32>
    %1056 = arith.addf %1048, %1055 : vector<1x128xf32>
    %cst_319 = arith.constant 9.99999993E-9 : f32
    %1057 = vector.broadcast %cst_319 : f32 to vector<1x128xf32>
    %1058 = arith.addf %117, %1057 : vector<1x128xf32>
    %1059 = math.log %1058 : vector<1x128xf32>
    %cst_320 = arith.constant 2.000000e+00 : f32
    %1060 = math.log %cst_320 : f32
    %1061 = vector.broadcast %1060 : f32 to vector<1x128xf32>
    %1062 = arith.divf %1059, %1061 : vector<1x128xf32>
    %1063 = arith.mulf %117, %1062 : vector<1x128xf32>
    %1064 = arith.addf %1056, %1063 : vector<1x128xf32>
    %cst_321 = arith.constant 9.99999993E-9 : f32
    %1065 = vector.broadcast %cst_321 : f32 to vector<1x128xf32>
    %1066 = arith.addf %129, %1065 : vector<1x128xf32>
    %1067 = math.log %1066 : vector<1x128xf32>
    %cst_322 = arith.constant 2.000000e+00 : f32
    %1068 = math.log %cst_322 : f32
    %1069 = vector.broadcast %1068 : f32 to vector<1x128xf32>
    %1070 = arith.divf %1067, %1069 : vector<1x128xf32>
    %1071 = arith.mulf %129, %1070 : vector<1x128xf32>
    %1072 = arith.addf %1064, %1071 : vector<1x128xf32>
    %cst_323 = arith.constant 9.99999993E-9 : f32
    %1073 = vector.broadcast %cst_323 : f32 to vector<1x128xf32>
    %1074 = arith.addf %137, %1073 : vector<1x128xf32>
    %1075 = math.log %1074 : vector<1x128xf32>
    %cst_324 = arith.constant 2.000000e+00 : f32
    %1076 = math.log %cst_324 : f32
    %1077 = vector.broadcast %1076 : f32 to vector<1x128xf32>
    %1078 = arith.divf %1075, %1077 : vector<1x128xf32>
    %1079 = arith.mulf %137, %1078 : vector<1x128xf32>
    %1080 = arith.addf %1072, %1079 : vector<1x128xf32>
    %cst_325 = arith.constant 9.99999993E-9 : f32
    %1081 = vector.broadcast %cst_325 : f32 to vector<1x128xf32>
    %1082 = arith.addf %141, %1081 : vector<1x128xf32>
    %1083 = math.log %1082 : vector<1x128xf32>
    %cst_326 = arith.constant 2.000000e+00 : f32
    %1084 = math.log %cst_326 : f32
    %1085 = vector.broadcast %1084 : f32 to vector<1x128xf32>
    %1086 = arith.divf %1083, %1085 : vector<1x128xf32>
    %1087 = arith.mulf %141, %1086 : vector<1x128xf32>
    %1088 = arith.addf %1080, %1087 : vector<1x128xf32>
    %cst_327 = arith.constant 9.99999993E-9 : f32
    %1089 = vector.broadcast %cst_327 : f32 to vector<1x128xf32>
    %1090 = arith.addf %105, %1089 : vector<1x128xf32>
    %1091 = math.log %1090 : vector<1x128xf32>
    %cst_328 = arith.constant 2.000000e+00 : f32
    %1092 = math.log %cst_328 : f32
    %1093 = vector.broadcast %1092 : f32 to vector<1x128xf32>
    %1094 = arith.divf %1091, %1093 : vector<1x128xf32>
    %1095 = arith.mulf %105, %1094 : vector<1x128xf32>
    %1096 = arith.addf %1088, %1095 : vector<1x128xf32>
    %cst_329 = arith.constant 9.99999993E-9 : f32
    %1097 = vector.broadcast %cst_329 : f32 to vector<1x128xf32>
    %1098 = arith.addf %121, %1097 : vector<1x128xf32>
    %1099 = math.log %1098 : vector<1x128xf32>
    %cst_330 = arith.constant 2.000000e+00 : f32
    %1100 = math.log %cst_330 : f32
    %1101 = vector.broadcast %1100 : f32 to vector<1x128xf32>
    %1102 = arith.divf %1099, %1101 : vector<1x128xf32>
    %1103 = arith.mulf %121, %1102 : vector<1x128xf32>
    %1104 = arith.addf %1096, %1103 : vector<1x128xf32>
    %cst_331 = arith.constant 9.99999993E-9 : f32
    %1105 = vector.broadcast %cst_331 : f32 to vector<1x128xf32>
    %1106 = arith.addf %133, %1105 : vector<1x128xf32>
    %1107 = math.log %1106 : vector<1x128xf32>
    %cst_332 = arith.constant 2.000000e+00 : f32
    %1108 = math.log %cst_332 : f32
    %1109 = vector.broadcast %1108 : f32 to vector<1x128xf32>
    %1110 = arith.divf %1107, %1109 : vector<1x128xf32>
    %1111 = arith.mulf %133, %1110 : vector<1x128xf32>
    %1112 = arith.addf %1104, %1111 : vector<1x128xf32>
    %cst_333 = arith.constant 9.99999993E-9 : f32
    %1113 = vector.broadcast %cst_333 : f32 to vector<1x128xf32>
    %1114 = arith.addf %141, %1113 : vector<1x128xf32>
    %1115 = math.log %1114 : vector<1x128xf32>
    %cst_334 = arith.constant 2.000000e+00 : f32
    %1116 = math.log %cst_334 : f32
    %1117 = vector.broadcast %1116 : f32 to vector<1x128xf32>
    %1118 = arith.divf %1115, %1117 : vector<1x128xf32>
    %1119 = arith.mulf %141, %1118 : vector<1x128xf32>
    %1120 = arith.addf %1112, %1119 : vector<1x128xf32>
    %cst_335 = arith.constant 9.99999993E-9 : f32
    %1121 = vector.broadcast %cst_335 : f32 to vector<1x128xf32>
    %1122 = arith.addf %145, %1121 : vector<1x128xf32>
    %1123 = math.log %1122 : vector<1x128xf32>
    %cst_336 = arith.constant 2.000000e+00 : f32
    %1124 = math.log %cst_336 : f32
    %1125 = vector.broadcast %1124 : f32 to vector<1x128xf32>
    %1126 = arith.divf %1123, %1125 : vector<1x128xf32>
    %1127 = arith.mulf %145, %1126 : vector<1x128xf32>
    %1128 = arith.addf %1120, %1127 : vector<1x128xf32>
    %cst_337 = arith.constant 0.000000e+00 : f32
    %1129 = vector.broadcast %cst_337 : f32 to vector<1x128xf32>
    %1130 = arith.subf %1129, %1128 : vector<1x128xf32>
    %c0 = arith.constant 0 : index
    %1131 = arith.index_cast %3 : i32 to index
    %1132 = vector.load %arg2[%c0, %1131] : memref<14x128xf32, #tpu.memory_space<vmem>>, vector<1x128xf32>
    tpu.vector_store %arg2[%c0, %1131], %18 {strides = array<i32>} : memref<14x128xf32, #tpu.memory_space<vmem>>, vector<1x128xf32>,
    %c1 = arith.constant 1 : index
    %1133 = arith.index_cast %3 : i32 to index
    %1134 = vector.load %arg2[%c1, %1133] : memref<14x128xf32, #tpu.memory_space<vmem>>, vector<1x128xf32>
    tpu.vector_store %arg2[%c1, %1133], %25 {strides = array<i32>} : memref<14x128xf32, #tpu.memory_space<vmem>>, vector<1x128xf32>,
    %c2 = arith.constant 2 : index
    %1135 = arith.index_cast %3 : i32 to index
    %1136 = vector.load %arg2[%c2, %1135] : memref<14x128xf32, #tpu.memory_space<vmem>>, vector<1x128xf32>
    tpu.vector_store %arg2[%c2, %1135], %28 {strides = array<i32>} : memref<14x128xf32, #tpu.memory_space<vmem>>, vector<1x128xf32>,
    %c3 = arith.constant 3 : index
    %1137 = arith.index_cast %3 : i32 to index
    %1138 = vector.load %arg2[%c3, %1137] : memref<14x128xf32, #tpu.memory_space<vmem>>, vector<1x128xf32>
    tpu.vector_store %arg2[%c3, %1137], %30 {strides = array<i32>} : memref<14x128xf32, #tpu.memory_space<vmem>>, vector<1x128xf32>,
    %c4 = arith.constant 4 : index
    %1139 = arith.index_cast %3 : i32 to index
    %1140 = vector.load %arg2[%c4, %1139] : memref<14x128xf32, #tpu.memory_space<vmem>>, vector<1x128xf32>
    tpu.vector_store %arg2[%c4, %1139], %77 {strides = array<i32>} : memref<14x128xf32, #tpu.memory_space<vmem>>, vector<1x128xf32>,
    %c5 = arith.constant 5 : index
    %1141 = arith.index_cast %3 : i32 to index
    %1142 = vector.load %arg2[%c5, %1141] : memref<14x128xf32, #tpu.memory_space<vmem>>, vector<1x128xf32>
    tpu.vector_store %arg2[%c5, %1141], %79 {strides = array<i32>} : memref<14x128xf32, #tpu.memory_space<vmem>>, vector<1x128xf32>,
    %c6 = arith.constant 6 : index
    %1143 = arith.index_cast %3 : i32 to index
    %1144 = vector.load %arg2[%c6, %1143] : memref<14x128xf32, #tpu.memory_space<vmem>>, vector<1x128xf32>
    tpu.vector_store %arg2[%c6, %1143], %81 {strides = array<i32>} : memref<14x128xf32, #tpu.memory_space<vmem>>, vector<1x128xf32>,
    %c7 = arith.constant 7 : index
    %1145 = arith.index_cast %3 : i32 to index
    %1146 = vector.load %arg2[%c7, %1145] : memref<14x128xf32, #tpu.memory_space<vmem>>, vector<1x128xf32>
    tpu.vector_store %arg2[%c7, %1145], %83 {strides = array<i32>} : memref<14x128xf32, #tpu.memory_space<vmem>>, vector<1x128xf32>,
    %c8 = arith.constant 8 : index
    %1147 = arith.index_cast %3 : i32 to index
    %1148 = vector.load %arg2[%c8, %1147] : memref<14x128xf32, #tpu.memory_space<vmem>>, vector<1x128xf32>
    tpu.vector_store %arg2[%c8, %1147], %85 {strides = array<i32>} : memref<14x128xf32, #tpu.memory_space<vmem>>, vector<1x128xf32>,
    %c9 = arith.constant 9 : index
    %1149 = arith.index_cast %3 : i32 to index
    %1150 = vector.load %arg2[%c9, %1149] : memref<14x128xf32, #tpu.memory_space<vmem>>, vector<1x128xf32>
    tpu.vector_store %arg2[%c9, %1149], %206 {strides = array<i32>} : memref<14x128xf32, #tpu.memory_space<vmem>>, vector<1x128xf32>,
    %c10 = arith.constant 10 : index
    %1151 = arith.index_cast %3 : i32 to index
    %1152 = vector.load %arg2[%c10, %1151] : memref<14x128xf32, #tpu.memory_space<vmem>>, vector<1x128xf32>
    tpu.vector_store %arg2[%c10, %1151], %282 {strides = array<i32>} : memref<14x128xf32, #tpu.memory_space<vmem>>, vector<1x128xf32>,
    %c11 = arith.constant 11 : index
    %1153 = arith.index_cast %3 : i32 to index
    %1154 = vector.load %arg2[%c11, %1153] : memref<14x128xf32, #tpu.memory_space<vmem>>, vector<1x128xf32>
    tpu.vector_store %arg2[%c11, %1153], %334 {strides = array<i32>} : memref<14x128xf32, #tpu.memory_space<vmem>>, vector<1x128xf32>,
    %c12 = arith.constant 12 : index
    %1155 = arith.index_cast %3 : i32 to index
    %1156 = vector.load %arg2[%c12, %1155] : memref<14x128xf32, #tpu.memory_space<vmem>>, vector<1x128xf32>
    tpu.vector_store %arg2[%c12, %1155], %927 {strides = array<i32>} : memref<14x128xf32, #tpu.memory_space<vmem>>, vector<1x128xf32>,
    %c13 = arith.constant 13 : index
    %1157 = arith.index_cast %3 : i32 to index
    %1158 = vector.load %arg2[%c13, %1157] : memref<14x128xf32, #tpu.memory_space<vmem>>, vector<1x128xf32>
    tpu.vector_store %arg2[%c13, %1157], %1130 {strides = array<i32>} : memref<14x128xf32, #tpu.memory_space<vmem>>, vector<1x128xf32>,
    %c1_i32_338 = arith.constant 1 : i32
    return
  }
  func.func @transform_0(%arg0: i32) -> (i32, i32) {
    %c0_i32 = arith.constant 0 : i32
    %c0_i32_0 = arith.constant 0 : i32
    return %c0_i32, %arg0 : i32, i32
  }
  func.func @transform_1(%arg0: i32) -> (i32, i32) {
    %c0_i32 = arith.constant 0 : i32
    %c0_i32_0 = arith.constant 0 : i32
    return %c0_i32, %arg0 : i32, i32
  }
}

</mosaic_0001>

<bundles_post_ra>
// kernel: tpu_custom_call.1
= control target key start
LH: loop header
LB: loop body
LE: loop exit
PB: predicated region body
PF: predicated region fallthrough
CT: control target
= control target key end

     0   :  { %6 = vsyncpa [#allocation3], 0  ;;  %s2943_s0 = inlined_call_operand.hbm [shape: f32[304,256], index: 0, kind: input, shape index: {}]   ;;  %s2944_s1 = inlined_call_operand.hbm [shape: f32[14,256], index: 1, kind: output, shape index: {}]  }
   0x1   :  { %8 = vsyncpa [#allocation3 + $0x1], 0 }
   0x2   :  { %9 = vsyncpa [#allocation4], 0 }
   0x3   :  { %11 = vsyncpa [#allocation4 + $0x1], 0  ;;  %s1843_s6 = smov 0   ;;  %s1845_s7 = smov 0  }
   0x4   :  { %s1847_s8 = smov 0   ;;  %s1849_s9 = smov 0  }
   0x5 LB: > { %s1864_s10 = sadd.s32 4294967295, %s1722_s9   ;;  %s1209_s11 = sadd.s32 4294967294, %s1722_s9   ;;  %s1722_s9 = sphi %s1849_s9, %s3013_s9   ;;  %s1718_s8 = sphi %s1847_s8, %s3012_s8   ;;  %s1714_s7 = sphi %s1845_s7, %s3011_s7   ;;  %s1710_s6 = sphi %s1843_s6, %s3010_s6  }
   0x6   : > { %s1868_s12 = sadd.s32 1, %s1722_s9   ;;  %s24_s13 = sadd.s32 1, %s1718_s8 }
   0x7   : > { %s21_s14 = ssub.s32 %s1722_s9, %s1868_s12  ;;  %p31_p0 = scmp.ne.s32.totalorder %s1718_s8, %s1714_s7 }
   0x8   : > { %p22_p1 = scmp.eq.s32.totalorder %s21_s14, 0  ;;  %p32_p2 = scmp.eq.s32.totalorder %s1722_s9, 0 }
   0x9   : > { %p37_p3 = scmp.ne.s32.totalorder %s1714_s7, %s1710_s6  ;;  %p38_p4 = scmp.eq.s32.totalorder %s1864_s10, 0 }
   0xa   : > { %s1880_s15 = scalar_select %p22_p1, %s1718_s8, %s24_s13  }
   0xb   : > { %p33_p5 = por %p32_p2, %p31_p0  ;;  %p1882_p6 = por %p38_p4, %p37_p3 }
   0xc   : > { %p61_p7 = scmp.eq.s32.totalorder %s1864_s10, 1  ;;  %p67_p8 = scmp.eq.s32.totalorder %s1209_s11, 1 }
   0xd   : > { %p1245_p10 = scmp.lt.s32.totalorder %s1722_s9, 2  ;;  %s87_s19 = sand.u32 1, %s1718_s8  }
   0xe   : > { %p1889_p11 = por %p61_p7, %p31_p0  ;;  %p1893_p12 = por %p67_p8, %p37_p3 }
   0xf   : > { %s1212_s20 = sshll.u32 %s1722_s9, 7  ;;  %s1231_s21 = smul.u32 304, %s87_s19 }
  0x10   : > { %s2950_s17 = scalar_select %p1889_p11, 1, 0 }
  0x11   : > { %s2951_s18 = scalar_select %p1893_p12, 1, 0 }
  0x12   : > { %s1902_s24 = scalar_lea.hbm %s2943_s0, %s1212_s20  ;;  %p1904_p13 = pnand %p1245_p10, %p33_p5 }
  0x13   : > { %s91_s26 = scalar_lea.vmem [#allocation2], %s1231_s21  ;;  %s1911_s28 = scalar_lea.sflag [#allocation3], %s87_s19 }
  0x14   : > { %s97_s27 = sshll.u32 %s91_s26, 4  ;;  %s1526_s29 = scalar_lea.hbm %s1902_s24, 4864  ;;  %s1908_s27 = int_to_ptr.vmem [resolvable:$true] %s97_s27 }
  0x15   : > { %p1527_p1 = scmp.ne.s32.totalorder %s1902_s24, %s1526_s29  ;;  %p1528_p2 = pneg %p1904_p13 }
  0x16   : > { %s1531_s3 = scalar_lea.hbm %s2943_s0, 9728  ;;  %p1532_p5 = scmp.lt.u32.totalorder %s1902_s24, %s2943_s0 }
  0x17   : > { %p1529_p3 = pnand %p1528_p2, %p1527_p1  ;;  %p1533_p7 = scmp.lt.u32.totalorder %s1531_s3, %s1526_s29 }
  0x18   : > { %p1535_p10 = scmp.lt.u32.totalorder %s1526_s29, %s1902_s24 }
  0x19   : > { %p1530_p4 = pneg %p1529_p3  ;;  %p1534_p8 = por %p1533_p7, %p1532_p5 }
  0x1b   : > { %p1536_p9 = por %p1535_p10, %p1534_p8 }
  0x1d   : > { %p1537_p0 = pnand %p1536_p9, %p1530_p4 }
  0x1f   : > { %1540 = shalt.err (!%p1537_p0)
}
  0x20   : > { %s1541_s11 = scalar_lea.vmem %s1908_s27, 4864  ;;  %s1824_s13 = smov [#allocation2]  }
  0x21   : > { %p1542_p1 = scmp.ne.s32.totalorder %s1908_s27, %s1541_s11  ;;  %s1546_s14 = sshll.u32 %s1824_s13, 4  ;;  %s1547_s14 = int_to_ptr.vmem [resolvable:$false] %s1546_s14 }
  0x22   : > { %s1548_s19 = scalar_lea.vmem %s1547_s14, 9728  ;;  %p1549_p11 = scmp.lt.s32.totalorder %s1908_s27, %s1547_s14 }
  0x23   : > { %p1544_p3 = pnand %p1542_p1, %p1528_p2  ;;  %p1550_p5 = scmp.lt.s32.totalorder %s1548_s19, %s1541_s11 }
  0x25   : > { %p1545_p12 = pneg %p1544_p3  ;;  %p1551_p7 = por %p1550_p5, %p1549_p11 }
  0x27   : > { %p1552_p8 = pnand %p1551_p7, %p1545_p12 }
  0x29   : > { %1555 = shalt.err (!%p1552_p8)
}
  0x2a   : > { %s1825_s20 = smov 256   ;;  %s1826_s21 = smov 128  }
  0x2b   : > { %s1827_s22 = smov 8   ;;  %p105_p9 = scmp.lt.s32.totalorder %s1722_s9, 3 }
  0x2c   : > { %1240 = dma.hbm_to_vmem [thread:$0]  (!%p1904_p13), %s1902_s24, 4864, %s1908_s27, %s1911_s28, %s1825_s20, %s1826_s21, %s1827_s22  }
  0x2d   : > { %p2953_p0 = scmp.ge.s32.totalorder %s1722_s9, 1 }
  0x2f   : > { %p106_p2 = pnand %p2953_p0, %p105_p9 }
  0x31   : > { %109 = sbr.rel (%p106_p2) target bundleno = 357 (0x165), region = 24 }
  0x38   : > { %s1943_s23 = sand.u32 1, %s1714_s7  }
  0x39   : > { %s1232_s26 = smul.u32 304, %s1943_s23  ;;  %s112_s29 = scalar_lea.sflag [#allocation3], %s1943_s23 }
  0x3b   : > { %s1947_s30 = scalar_lea.vmem [#allocation2], %s1232_s26 }
  0x3c   : > { %1701 = dma.done.wait (%p1882_p6), %s112_s29, 4864  }
  0x3d   : > { %1703 = vsyncadd (%p1882_p6), %s112_s29, 4294962432  ;;  %s1214_s24 = sshll.u32 %s1943_s23, 4  ;;  %v134_v0 = vlaneseq  ;;  %v1724_v3 = vmov -inf   ;;  %v1728_v4 = vmov inf   ;;  %v1732_v5 = vmov 0.0   ;;  %s1959_s27 = smov 0  }
  0x3e   : > { %s1957_s25 = scalar_lea.vmem [#allocation5], %s1214_s24  ;;  %v1736_v6 = vmov 0.0  }
  0x3f   : > { %v1954_v1 = vshrl.u32 %v134_v0, 7 }
  0x41   : > { %v136_v2 = vcvt.s32.f32 %v1954_v1 }
  0x42 LB: >> { %s1215_s16 = sshll.u32 %s1742_s27, 3  ;;  %s142_s27 = sadd.s32 1, %s1742_s27   ;;  %s1742_s27 = sphi %s1959_s27, %s142_s27   ;;  %v1738_v6 = vphi %v1736_v6, %v1737_v6   ;;  %v1734_v5 = vphi %v1732_v5, %v1733_v5   ;;  %v1730_v4 = vphi %v1728_v4, %v1729_v4   ;;  %v1726_v3 = vphi %v1724_v3, %v1725_v3  }
  0x43   : >> { %s149_s28 = scalar_lea.vmem %s1947_s30, %s1215_s16 [#allocation2]  ;;  %s151_s2 = scvt.s32.f32 %s1215_s16 }
  0x44   : >> { %v150_v7 = vld [vmem:[%s149_s28] sm:$0xff]  ;;  %p139_p6 = scmp.ge.s32.totalorder %s142_s27, 37  }
  0x45   : >> { %v152_v8 = vstv %s151_s2  ;;  %v157_v9 = vmul.f32 %v150_v7, %v150_v7  ;;  %v1994_v62 = vmov (%p139_p6), 0.0   ;;  %v1996_v63 = vmov (%p139_p6), 0.0   ;;  %s2032_s3 = smov (%p139_p6), 0  }
  0x46   : >> { %v153_v10 = vadd.f32 %v152_v8, %v136_v2  ;;  %141 = sbr.rel (!%p139_p6) target bundleno = 66 (0x42), region = 85  ;;  %v1998_v0 = vmov (%p139_p6), 0.0   ;;  %v2010_v8 = vmov (%p139_p6), 0.0  }
  0x48   : >> { %vm154_vm0 = vcmp.lt.f32.partialorder %v153_v10, 289.0  ;;  %v2014_v10 = vmov (%p139_p6), 0.0  }
  0x49   : >> { %v155_v11 = vsel %vm154_vm0, %v150_v7, 0.0  ;;  %v158_v12 = vsel %vm154_vm0, %v157_v9, 0.0  ;;  %v160_v13 = vsel %vm154_vm0, %v150_v7, inf  ;;  %v162_v14 = vsel %vm154_vm0, %v150_v7, -inf }
  0x4a   : >> { %v156_v15 = vadd.f32 %v1738_v6, %v155_v11   ;;  %v159_v16 = vadd.f32 %v1734_v5, %v158_v12   ;;  %v161_v17 = vmin.f32 %v1730_v4, %v160_v13   ;;  %v163_v18 = vmax.f32 %v1726_v3, %v162_v14  }
  0x4b   : > { %v2008_v7 = vmov (%p139_p6), 0.0   ;;  %v2012_v9 = vmov (%p139_p6), 0.0   ;;  %v2016_v11 = vmov (%p139_p6), 0.0   ;;  %v2018_v12 = vmov (%p139_p6), 0.0  }
  0x4c   : >> { %v1725_v3 = vmov %v163_v18   ;;  %v1729_v4 = vmov %v161_v17   ;;  %v1733_v5 = vmov %v159_v16   ;;  %v1737_v6 = vmov %v156_v15  }
  0x4d   : > { %v164_v19 = vrot.slane %v156_v15, 4  ;;  %v170_v20 = vrot.slane %v159_v16, 4  ;;  %v176_v23 = vrot.slane %v161_v17, 4  ;;  %v182_v24 = vrot.slane %v163_v18, 4 }
  0x4e   : > { %v2000_v3 = vmov 0.0   ;;  %v2002_v4 = vmov 0.0   ;;  %v2004_v5 = vmov 0.0   ;;  %v2006_v6 = vmov 0.0  }
  0x4f   : > { %v165_v21 = vadd.f32 %v164_v19, %v156_v15  ;;  %v171_v22 = vadd.f32 %v170_v20, %v159_v16  ;;  %v177_v29 = vmin.f32 %v161_v17, %v176_v23  ;;  %v183_v30 = vmax.f32 %v163_v18, %v182_v24 }
  0x50   : > { %v2020_v13 = vmov 0.0   ;;  %v2022_v14 = vmov 0.0   ;;  %v2024_v15 = vmov 0.0   ;;  %v2026_v16 = vmov 0.0  }
  0x51   : > { %v166_v25 = vrot.slane %v165_v21, 2  ;;  %v172_v26 = vrot.slane %v171_v22, 2  ;;  %v178_v35 = vrot.slane %v177_v29, 2  ;;  %v184_v36 = vrot.slane %v183_v30, 2 }
  0x52   : > { %v2028_v17 = vmov 0.0   ;;  %v2030_v18 = vmov 0.0  }
  0x53   : > { %v167_v27 = vadd.f32 %v166_v25, %v165_v21  ;;  %v173_v28 = vadd.f32 %v172_v26, %v171_v22  ;;  %v179_v40 = vmin.f32 %v177_v29, %v178_v35  ;;  %v185_v41 = vmax.f32 %v183_v30, %v184_v36 }
  0x55   : > { %v168_v31 = vrot.slane %v167_v27, 1  ;;  %v174_v32 = vrot.slane %v173_v28, 1  ;;  %v180_v44 = vrot.slane %v179_v40, 1  ;;  %v186_v45 = vrot.slane %v185_v41, 1 }
  0x57   : > { %v169_v33 = vadd.f32 %v168_v31, %v167_v27  ;;  %v175_v34 = vadd.f32 %v174_v32, %v173_v28  ;;  %v181_v46 = vmin.f32 %v179_v40, %v180_v44  ;;  %v187_v47 = vmax.f32 %v185_v41, %v186_v45 }
  0x59   : > { %v1967_v37 = vmul.f32 0.0034602077, %v169_v33  ;;  %v189_v38 = vmul.f32 0.0034602077, %v175_v34 }
  0x5b   : > { %v190_v39 = vmul.f32 %v1967_v37, %v1967_v37  ;;  %v201_v48 = vsub.f32 %v187_v47, %v1967_v37  ;;  %v203_v49 = vsub.f32 %v1967_v37, %v181_v46 }
  0x5d   : > { %v191_v42 = vsub.f32 %v189_v38, %v190_v39 }
  0x5f   : > { %v192_v43 = vmax.f32 %v191_v42, 0.0 }
  0x61   : > { %1486 = vrsqrt.f32 %v192_v43  ;;  %vm195_vm1 = vcmp.eq.f32.partialorder %v192_v43, inf  ;;  %v198_v51 = vand.u32 2147483648, %v192_v43  ;;  %vm197_vm2 = vcmp.eq.f32.partialorder %v192_v43, 0.0 }
  0x6b   : > { %v1973_v50 = vpop.eup %1486 }
  0x6c   : > { %v194_v52 = vmul.f32 %v1973_v50, %v192_v43  ;;  %v1977_v53 = vmul.f32 %v1973_v50, %v201_v48  ;;  %v1980_v54 = vmul.f32 %v1973_v50, %v203_v49 }
  0x6e   : > { %v196_v55 = vsel %vm195_vm1, %v192_v43, %v194_v52 }
  0x6f   : > { %v1982_v56 = vsel %vm197_vm2, %v198_v51, %v196_v55 }
  0x70   : > { %v205_v57 = vmul.f32 %v1973_v50, %v1982_v56 }
  0x72   : > { %v1986_v58 = vmul.f32 -1.5, %v205_v57  ;;  %v1988_v59 = vmul.f32 -0.5, %v205_v57  ;;  %v1990_v60 = vmul.f32 0.5, %v205_v57  ;;  %v1992_v61 = vmul.f32 1.5, %v205_v57 }
  0x73 LB: >> { %s1216_s4 = sshll.u32 %s1822_s3, 3  ;;  %v1828_v25 = vmov 0.0   ;;  %vm313_vm13 = vcmask 1046528   ;;  %s215_s3 = sadd.s32 1, %s1822_s3   ;;  %s1822_s3 = sphi %s2032_s3, %s215_s3   ;;  %v1818_v18 = vphi %v2030_v18, %v2992_v18   ;;  %v1814_v17 = vphi %v2028_v17, %v2991_v17   ;;  %v1810_v16 = vphi %v2026_v16, %v2990_v16   ;;  %v1806_v15 = vphi %v2024_v15, %v2989_v15   ;;  %v1802_v14 = vphi %v2022_v14, %v2988_v14   ;;  %v1798_v13 = vphi %v2020_v13, %v2987_v13   ;;  %v1794_v12 = vphi %v2018_v12, %v2986_v12   ;;  %v1790_v11 = vphi %v2016_v11, %v2985_v11   ;;  %v1786_v10 = vphi %v2014_v10, %v2984_v10   ;;  %v1782_v9 = vphi %v2012_v9, %v2983_v9   ;;  %v1778_v8 = vphi %v2010_v8, %v2982_v8   ;;  %v1774_v7 = vphi %v2008_v7, %v2981_v7   ;;  %v1770_v6 = vphi %v2006_v6, %v2980_v6   ;;  %v1766_v5 = vphi %v2004_v5, %v2979_v5   ;;  %v1762_v4 = vphi %v2002_v4, %v2978_v4   ;;  %v1758_v3 = vphi %v2000_v3, %v2977_v3   ;;  %v1754_v0 = vphi %v1998_v0, %v2976_v0   ;;  %v1750_v63 = vphi %v1996_v63, %v2975_v63   ;;  %v1746_v62 = vphi %v1994_v62, %v2974_v62  }
  0x74   : >> { %s237_s5 = scalar_lea.vmem %s1947_s30, %s1216_s4 [#allocation2]  ;;  %s272_s11 = scvt.s32.f32 %s1216_s4 }
  0x75   : >> { %v238_v19 = vld [vmem:[%s237_s5] sm:$0xff]  ;;  %v239_v21 = vld [vmem:[%s237_s5 + $0x8] sm:$0xff]  ;;  %p2206_p11 = scmp.ge.s32.totalorder %s215_s3, 37  }
  0x76   : >> { %v240_v20 = vsub.f32 %v238_v19, %v1967_v37  ;;  %v273_v23 = vstv %s272_s11  ;;  %v241_v24 = vsub.f32 %v239_v21, %v1967_v37  ;;  %1026 = vst [vmem:[%s1957_s25] sm:$0x1] (%p2206_p11), %v1967_v37  ;;  %1027 = vst [vmem:[%s1957_s25 + $0x1] sm:$0x1] (%p2206_p11), %v1982_v56  ;;  %s1228_s14 = sshll.u32 (%p2206_p11), %s1864_s10, 7  ;;  %s1053_s19 = sshll.u32 (%p2206_p11), %s1957_s25, 4  ;;  %s2898_s19 = int_to_ptr.vmem [resolvable:$true] %s1053_s19 }
  0x77   : >> { %v274_v27 = vadd.f32 %v273_v23, %v136_v2  ;;  %1028 = vst [vmem:[%s1957_s25 + $0x2] sm:$0x1] (%p2206_p11), %v1977_v53  ;;  %1029 = vst [vmem:[%s1957_s25 + $0x3] sm:$0x1] (%p2206_p11), %v1980_v54  ;;  %s2896_s22 = scalar_lea.hbm (%p2206_p11), %s2944_s1, %s1228_s14  ;;  %s1041_s26 = scalar_lea.sflag (%p2206_p11), [#allocation4], %s1943_s23 }
  0x78   : >> { %v242_v22 = vmul.f32 %v1973_v50, %v240_v20  ;;  %v243_v31 = vmul.f32 %v1973_v50, %v241_v24  ;;  %s1556_s10 = scalar_lea.vmem (%p2206_p11), %s2898_s19, 256  ;;  %p3007_p13 = scmp.ne.s32.totalorder (%p2206_p11), %s2950_s17, 0 }
  0x79   : >> { %v275_v35 = vmul.f32 0.05882353, %v274_v27  ;;  %vm279_vm7 = vcmp.lt.f32.partialorder %v274_v27, 289.0  ;;  %p1557_p12 = scmp.ne.s32.totalorder (%p2206_p11), %s2898_s19, %s1556_s10  ;;  %s1829_s29 = smov (%p2206_p11), [#allocation5]  }
  0x7a   : >> { %vm244_vm3 = vcmp.ge.f32.partialorder %v242_v22, %v1986_v58  ;;  %vm250_vm4 = vcmp.ge.f32.partialorder %v242_v22, %v1988_v59  ;;  %vm256_vm5 = vcmp.ge.f32.partialorder %v242_v22, %v1990_v60  ;;  %vm262_vm6 = vcmp.ge.f32.partialorder %v242_v22, %v1992_v61  ;;  %s1560_s30 = sshll.u32 (%p2206_p11), %s1829_s29, 4  ;;  %s1561_s30 = int_to_ptr.vmem [resolvable:$false] %s1560_s30 }
  0x7b   : >> { %v1217_v26 = vsel %vm244_vm3, 1.0, %v1828_v25  ;;  %v1219_v28 = vsel %vm250_vm4, 1.0, %v1828_v25  ;;  %v1221_v29 = vsel %vm256_vm5, 1.0, %v1828_v25  ;;  %v2097_v30 = vsel %vm262_vm6, 1.0, %v1828_v25  ;;  %p1558_p4 = pnand (%p2206_p11), %p1557_p12, %p3007_p13  ;;  %s1562_s24 = scalar_lea.vmem (%p2206_p11), %s1561_s30, 512 }
  0x7c   : >> { %v2100_v32 = vsub.f32 1.0, %v1217_v26  ;;  %v2102_v33 = vsub.f32 %v1217_v26, %v1219_v28  ;;  %v2104_v34 = vsub.f32 %v1219_v28, %v1221_v29  ;;  %v2107_v36 = vsub.f32 %v1221_v29, %v2097_v30  ;;  %p1563_p1 = scmp.lt.s32.totalorder (%p2206_p11), %s2898_s19, %s1561_s30  ;;  %p1564_p3 = scmp.lt.s32.totalorder (%p2206_p11), %s1562_s24, %s1556_s10 }
  0x7d   : >> { %v1225_v38 = vsel %vm279_vm7, 1.0, %v1828_v25  ;;  %v276_v39 = vfloor.f32 %v275_v35  ;;  %vm245_vm8 = vcmp.ge.f32.partialorder %v243_v31, %v1986_v58  ;;  %vm251_vm9 = vcmp.ge.f32.partialorder %v243_v31, %v1988_v59  ;;  %p1559_p10 = pneg (%p2206_p11), %p1558_p4 }
  0x7e   : >> { %v282_v40 = vmul.f32 %v1225_v38, %v2100_v32  ;;  %v284_v41 = vmul.f32 %v1225_v38, %v2102_v33  ;;  %v286_v42 = vmul.f32 %v1225_v38, %v2104_v34  ;;  %v288_v43 = vmul.f32 %v1225_v38, %v2107_v36  ;;  %p1565_p5 = por (%p2206_p11), %p1564_p3, %p1563_p1 }
  0x7f   : >> { %v277_v44 = vmul.f32 17.0, %v276_v39  ;;  %vm257_vm10 = vcmp.ge.f32.partialorder %v243_v31, %v1990_v60  ;;  %vm263_vm11 = vcmp.ge.f32.partialorder %v243_v31, %v1992_v61  ;;  %v1218_v51 = vsel %vm245_vm8, 1.0, %v1828_v25 }
  0x80   : >> { %v2115_v18 = vadd.f32 %v1818_v18, %v282_v40   ;;  %v2117_v17 = vadd.f32 %v1814_v17, %v284_v41   ;;  %v2119_v16 = vadd.f32 %v1810_v16, %v286_v42   ;;  %v2123_v15 = vadd.f32 %v1806_v15, %v288_v43   ;;  %p1566_p7 = pnand (%p2206_p11), %p1565_p5, %p1559_p10 }
  0x81   : >> { %v278_v49 = vsub.f32 %v274_v27, %v277_v44  ;;  %v1220_v52 = vsel %vm251_vm9, 1.0, %v1828_v25  ;;  %v1222_v55 = vsel %vm257_vm10, 1.0, %v1828_v25  ;;  %v1224_v57 = vsel %vm263_vm11, 1.0, %v1828_v25 }
  0x82   : >> { %v2954_v45 = vmov %v2115_v18  ;;  %v2955_v46 = vmov %v2117_v17  ;;  %v2956_v47 = vmov %v2119_v16  ;;  %v2957_v48 = vmov %v2123_v15 }
  0x83   : >> { %vm294_vm12 = vcmp.lt.f32.partialorder %v278_v49, 16.0  ;;  %v290_v20 = vsub.f32 1.0, %v1218_v51  ;;  %v291_v21 = vsub.f32 %v1218_v51, %v1220_v52  ;;  %v292_v22 = vsub.f32 %v1220_v52, %v1222_v55 }
  0x84   : >> { %v1226_v19 = vsel %vm294_vm12, 1.0, %v1828_v25  ;;  %v293_v17 = vsub.f32 %v1222_v55, %v1224_v57 }
  0x85   : >> { %v297_v18 = vmul.f32 %v1226_v19, %v1225_v38 }
  0x87   : >> { %v299_v23 = vrot.slane %v297_v18, 7 }
  0x89   : >> { %v301_v16 = vmul.f32 %v299_v23, %v2100_v32  ;;  %v302_v24 = vmul.f32 %v299_v23, %v290_v20  ;;  %v303_v26 = vmul.f32 %v299_v23, %v2102_v33  ;;  %v304_v15 = vmul.f32 %v299_v23, %v291_v21 }
  0x8a   : >> { %v305_v27 = vmul.f32 %v299_v23, %v2104_v34  ;;  %v306_v28 = vmul.f32 %v299_v23, %v292_v22  ;;  %v307_v29 = vmul.f32 %v299_v23, %v2107_v36  ;;  %v308_v31 = vmul.f32 %v299_v23, %v293_v17 }
  0x8b   : >> { %v309_v25 = vmul.f32 %v2097_v30, %v299_v23  ;;  %v310_v35 = vmul.f32 %v1224_v57, %v299_v23  ;;  %v314_v38 = vrot.slane %v301_v16, 1  ;;  %v315_v39 = vrot.slane %v302_v24, 1 }
  0x8c   : >> { %v322_v40 = vrot.slane %v303_v26, 1  ;;  %v323_v41 = vrot.slane %v304_v15, 1  ;;  %v332_v42 = vrot.slane %v305_v27, 1  ;;  %v333_v43 = vrot.slane %v306_v28, 1 }
  0x8d   : >> { %v316_v44 = vsel %vm313_vm13, %v314_v38, %v315_v39  ;;  %v342_v49 = vrot.slane %v307_v29, 1  ;;  %v343_v51 = vrot.slane %v308_v31, 1  ;;  %v352_v52 = vrot.slane %v309_v25, 1 }
  0x8e   : >> { %v318_v55 = vmul.f32 %v316_v44, %v2100_v32  ;;  %v324_v19 = vsel %vm313_vm13, %v322_v40, %v323_v41  ;;  %v327_v20 = vmul.f32 %v316_v44, %v2102_v33  ;;  %v334_v21 = vsel %vm313_vm13, %v332_v42, %v333_v43 }
  0x8f   : >> { %v326_v57 = vmul.f32 %v324_v19, %v2100_v32  ;;  %v336_v18 = vmul.f32 %v334_v21, %v2100_v32  ;;  %v337_v22 = vmul.f32 %v316_v44, %v2104_v34  ;;  %v344_v17 = vsel %vm313_vm13, %v342_v49, %v343_v51 }
  0x90   : >> { %v2140_v14 = vadd.f32 %v1802_v14, %v318_v55   ;;  %v346_v16 = vmul.f32 %v344_v17, %v2100_v32  ;;  %v347_v24 = vmul.f32 %v316_v44, %v2107_v36  ;;  %v353_v26 = vrot.slane %v310_v35, 1 }
  0x91   : >> { %v328_v15 = vadd.f32 %v327_v20, %v326_v57  ;;  %v338_v27 = vadd.f32 %v337_v22, %v336_v18  ;;  %v357_v28 = vmul.f32 %v2097_v30, %v316_v44  ;;  %v360_v29 = vmul.f32 %v324_v19, %v2102_v33 }
  0x92   : >> { %v2958_v23 = vmov %v2140_v14  ;;  %v348_v31 = vadd.f32 %v347_v24, %v346_v16  ;;  %v354_v25 = vsel %vm313_vm13, %v352_v52, %v353_v26  ;;  %v362_v38 = vmul.f32 %v334_v21, %v2102_v33 }
  0x93   : >> { %v363_v39 = vmul.f32 %v324_v19, %v2104_v34  ;;  %v2150_v13 = vadd.f32 %v1798_v13, %v328_v15   ;;  %v2153_v12 = vadd.f32 %v1794_v12, %v338_v27   ;;  %v356_v14 = vmul.f32 %v354_v25, %v2100_v32 }
  0x94   : >> { %v2157_v9 = vadd.f32 %v1782_v9, %v360_v29   ;;  %v2160_v11 = vadd.f32 %v1790_v11, %v348_v31   ;;  %v366_v44 = vmul.f32 %v344_v17, %v2102_v33  ;;  %v367_v49 = vmul.f32 %v324_v19, %v2107_v36 }
  0x95   : >> { %v2959_v40 = vmov %v2150_v13  ;;  %v2960_v41 = vmov %v2153_v12  ;;  %v364_v43 = vadd.f32 %v363_v39, %v362_v38  ;;  %v358_v51 = vadd.f32 %v357_v28, %v356_v14 }
  0x96   : >> { %v2961_v35 = vmov %v2157_v9  ;;  %v2962_v42 = vmov %v2160_v11  ;;  %v370_v52 = vmul.f32 %v354_v25, %v2102_v33  ;;  %v371_v13 = vmul.f32 %v2097_v30, %v324_v19 }
  0x97   : >> { %v374_v12 = vmul.f32 %v334_v21, %v2104_v34  ;;  %v2168_v8 = vadd.f32 %v1778_v8, %v364_v43   ;;  %v368_v55 = vadd.f32 %v367_v49, %v366_v44  ;;  %v376_v9 = vmul.f32 %v344_v17, %v2104_v34 }
  0x98   : >> { %v377_v11 = vmul.f32 %v334_v21, %v2107_v36  ;;  %v2173_v10 = vadd.f32 %v1786_v10, %v358_v51   ;;  %v372_v57 = vadd.f32 %v371_v13, %v370_v52  ;;  %v380_v33 = vmul.f32 %v354_v25, %v2104_v34 }
  0x99   : >> { %v2963_v32 = vmov %v2168_v8  ;;  %v2176_v5 = vadd.f32 %v1766_v5, %v374_v12   ;;  %v2180_v7 = vadd.f32 %v1774_v7, %v368_v55   ;;  %v381_v8 = vmul.f32 %v2097_v30, %v334_v21 }
  0x9a   : >> { %v2964_v20 = vmov %v2173_v10  ;;  %v378_v18 = vadd.f32 %v377_v11, %v376_v9  ;;  %v384_v16 = vmul.f32 %v344_v17, %v2107_v36  ;;  %v2185_v6 = vadd.f32 %v1770_v6, %v372_v57  }
  0x9b   : >> { %v2965_v22 = vmov %v2176_v5  ;;  %v2966_v19 = vmov %v2180_v7  ;;  %v386_v26 = vmul.f32 %v354_v25, %v2107_v36  ;;  %v387_v10 = vmul.f32 %v2097_v30, %v344_v17 }
  0x9c   : >> { %v2967_v24 = vmov %v2185_v6  ;;  %v390_v15 = vmul.f32 %v2097_v30, %v354_v25  ;;  %v2191_v4 = vadd.f32 %v1762_v4, %v378_v18   ;;  %v382_v5 = vadd.f32 %v381_v8, %v380_v33 }
  0x9d   : >> { %v2194_v0 = vadd.f32 %v1754_v0, %v384_v16   ;;  %v388_v7 = vadd.f32 %v387_v10, %v386_v26  ;;  %v2980_v6 = vmov %v2967_v24  ;;  %v2982_v8 = vmov %v2963_v32 }
  0x9e   : >> { %v2968_v34 = vmov %v2191_v4  ;;  %v2197_v62 = vadd.f32 %v1746_v62, %v390_v15   ;;  %v2200_v3 = vadd.f32 %v1758_v3, %v382_v5   ;;  %v2979_v5 = vmov %v2965_v22  ;;  %214 = sbr.rel (!%p2206_p11) target bundleno = 115 (0x73), region = 96 }
  0x9f   : >> { %v2969_v27 = vmov %v2194_v0  ;;  %v2203_v63 = vadd.f32 %v1750_v63, %v388_v7   ;;  %v2978_v4 = vmov %v2968_v34  ;;  %v2981_v7 = vmov %v2966_v19 }
  0xa0   : >> { %v2970_v21 = vmov %v2197_v62  ;;  %v2971_v28 = vmov %v2200_v3  ;;  %v2976_v0 = vmov %v2969_v27  ;;  %v2983_v9 = vmov %v2961_v35 }
  0xa1   : >> { %v2972_v36 = vmov %v2203_v63  ;;  %v2974_v62 = vmov %v2970_v21  ;;  %v2977_v3 = vmov %v2971_v28  ;;  %v2984_v10 = vmov %v2964_v20 }
  0xa2   : >> { %v2975_v63 = vmov %v2972_v36  ;;  %v2985_v11 = vmov %v2962_v42  ;;  %v2986_v12 = vmov %v2960_v41  ;;  %v2987_v13 = vmov %v2959_v40 }
  0xa3   : >> { %v2988_v14 = vmov %v2958_v23  ;;  %v2989_v15 = vmov %v2957_v48  ;;  %v2990_v16 = vmov %v2956_v47  ;;  %v2991_v17 = vmov %v2955_v46 }
  0xa4   : >> { %v2992_v18 = vmov %v2954_v45  ;;  %v392_v30 = vrot.slane (%p2206_p11), %v2954_v45, 4  ;;  %v398_v29 = vrot.slane (%p2206_p11), %v2955_v46, 4  ;;  %v404_v31 = vrot.slane (%p2206_p11), %v2956_v47, 4 }
  0xa5   : > { %v410_v25 = vrot.slane %v2957_v48, 4  ;;  %v426_v1 = vrot.slane %v2958_v23, 4  ;;  %v433_v2 = vrot.slane %v2959_v40, 4  ;;  %v440_v37 = vrot.slane %v2960_v41, 4 }
  0xa6   : > { %v447_v50 = vrot.slane %v2962_v42, 4  ;;  %v393_v53 = vadd.f32 %v392_v30, %v2954_v45  ;;  %v399_v54 = vadd.f32 %v398_v29, %v2955_v46  ;;  %v405_v56 = vadd.f32 %v404_v31, %v2956_v47 }
  0xa7   : > { %v411_v58 = vadd.f32 %v410_v25, %v2957_v48  ;;  %v427_v59 = vadd.f32 %v426_v1, %v2958_v23  ;;  %v434_v3 = vadd.f32 %v433_v2, %v2959_v40  ;;  %v441_v4 = vadd.f32 %v440_v37, %v2960_v41 }
  0xa8   : > { %v394_v60 = vrot.slane %v393_v53, 2  ;;  %v400_v61 = vrot.slane %v399_v54, 2  ;;  %v406_v62 = vrot.slane %v405_v56, 2  ;;  %v448_v6 = vadd.f32 %v447_v50, %v2962_v42 }
  0xa9   : > { %v412_v63 = vrot.slane %v411_v58, 2  ;;  %v428_v0 = vrot.slane %v427_v59, 2  ;;  %v435_v23 = vrot.slane %v434_v3, 2  ;;  %v442_v43 = vrot.slane %v441_v4, 2 }
  0xaa   : > { %v395_v45 = vadd.f32 %v394_v60, %v393_v53  ;;  %v401_v17 = vadd.f32 %v400_v61, %v399_v54  ;;  %v407_v46 = vadd.f32 %v406_v62, %v405_v56  ;;  %v449_v44 = vrot.slane %v448_v6, 2 }
  0xab   : > { %v413_v38 = vadd.f32 %v412_v63, %v411_v58  ;;  %v429_v41 = vadd.f32 %v428_v0, %v427_v59  ;;  %v436_v11 = vadd.f32 %v435_v23, %v434_v3  ;;  %v443_v57 = vadd.f32 %v442_v43, %v441_v4 }
  0xac   : > { %v396_v47 = vrot.slane %v395_v45, 1  ;;  %v402_v39 = vrot.slane %v401_v17, 1  ;;  %v408_v48 = vrot.slane %v407_v46, 1  ;;  %v450_v8 = vadd.f32 %v449_v44, %v448_v6 }
  0xad   : > { %v414_v14 = vrot.slane %v413_v38, 1  ;;  %v430_v18 = vrot.slane %v429_v41, 1  ;;  %v454_v16 = vrot.slane %v2964_v20, 4  ;;  %v461_v26 = vrot.slane %v2961_v35, 4 }
  0xae   : > { %v397_v49 = vadd.f32 %v396_v47, %v395_v45  ;;  %v403_v40 = vadd.f32 %v402_v39, %v401_v17  ;;  %v409_v51 = vadd.f32 %v408_v48, %v407_v46  ;;  %v468_v10 = vrot.slane %v2963_v32, 4 }
  0xaf   : > { %v415_v42 = vadd.f32 %v414_v14, %v413_v38  ;;  %v475_v15 = vrot.slane %v2966_v19, 4  ;;  %v482_v5 = vrot.slane %v2967_v24, 4  ;;  %v455_v30 = vadd.f32 %v454_v16, %v2964_v20 }
  0xb0   : > { %v421_v52 = vmul.f32 0.0034602077, %v397_v49  ;;  %v417_v13 = vadd.f32 %v403_v40, %v397_v49  ;;  %v422_v12 = vmul.f32 0.0034602077, %v403_v40  ;;  %v423_v55 = vmul.f32 0.0034602077, %v409_v51 }
  0xb1   : > { %v424_v9 = vmul.f32 0.0034602077, %v415_v42  ;;  %v489_v29 = vrot.slane %v2965_v22, 4  ;;  %v496_v31 = vrot.slane %v2968_v34, 4  ;;  %v437_v25 = vrot.slane %v436_v11, 1 }
  0xb2   : > { %1030 = vst [vmem:[%s1957_s25 + $0x4] sm:$0x1] %v421_v52  ;;  %1031 = vst [vmem:[%s1957_s25 + $0x5] sm:$0x1] %v422_v12  ;;  %v418_v33 = vadd.f32 %v417_v13, %v409_v51  ;;  %v469_v1 = vadd.f32 %v468_v10, %v2963_v32  ;;  %v476_v2 = vadd.f32 %v475_v15, %v2966_v19  ;;  %v444_v53 = vrot.slane %v443_v57, 1 }
  0xb3   : > { %1032 = vst [vmem:[%s1957_s25 + $0x6] sm:$0x1] %v423_v55  ;;  %1033 = vst [vmem:[%s1957_s25 + $0x7] sm:$0x1] %v424_v9  ;;  %v483_v37 = vadd.f32 %v482_v5, %v2967_v24  ;;  %v456_v54 = vrot.slane %v455_v30, 2  ;;  %v462_v56 = vadd.f32 %v461_v26, %v2961_v35  ;;  %v451_v58 = vrot.slane %v450_v8, 1 }
  0xb4   : > { %v419_v7 = vadd.f32 %v418_v33, %v415_v42  ;;  %v477_v59 = vrot.slane %v476_v2, 2  ;;  %v490_v20 = vadd.f32 %v489_v29, %v2965_v22  ;;  %v497_v60 = vadd.f32 %v496_v31, %v2968_v34 }
  0xb5   : > { %v457_v62 = vadd.f32 %v456_v54, %v455_v30  ;;  %v470_v63 = vrot.slane %v469_v1, 2  ;;  %v484_v32 = vrot.slane %v483_v37, 2  ;;  %v431_v0 = vadd.f32 %v430_v18, %v429_v41 }
  0xb6   : > { %v420_v50 = vsub.f32 289.0, %v419_v7  ;;  %v438_v19 = vadd.f32 %v437_v25, %v436_v11  ;;  %v463_v24 = vrot.slane %v462_v56, 2  ;;  %v478_v4 = vadd.f32 %v477_v59, %v476_v2 }
  0xb7   : > { %v458_v3 = vrot.slane %v457_v62, 1  ;;  %v503_v6 = vrot.slane %v2971_v28, 4  ;;  %v445_v45 = vadd.f32 %v444_v53, %v443_v57  ;;  %v452_v35 = vadd.f32 %v451_v58, %v450_v8 }
  0xb8   : > { %v425_v61 = vmul.f32 0.0034602077, %v420_v50  ;;  %v491_v17 = vrot.slane %v490_v20, 2  ;;  %v498_v46 = vrot.slane %v497_v60, 2  ;;  %v471_v22 = vadd.f32 %v470_v63, %v469_v1 }
  0xb9   : > { %v459_v38 = vadd.f32 %v458_v3, %v457_v62  ;;  %v485_v47 = vadd.f32 %v484_v32, %v483_v37  ;;  %v504_v34 = vadd.f32 %v503_v6, %v2971_v28  ;;  %v2316_v39 = vmul.f32 0.0036764706, %v431_v0 }
  0xba   : > { %1034 = vst [vmem:[%s1957_s25 + $0x8] sm:$0x1] %v425_v61  ;;  %v2318_v48 = vmul.f32 0.0018382353, %v438_v19  ;;  %v464_v14 = vadd.f32 %v463_v24, %v462_v56  ;;  %v479_v23 = vrot.slane %v478_v4, 1  ;;  %v492_v40 = vadd.f32 %v491_v17, %v490_v20 }
  0xbb   : > { %v505_v43 = vrot.slane %v504_v34, 2  ;;  %v2320_v44 = vmul.f32 0.0018382353, %v445_v45  ;;  %v2322_v49 = vmul.f32 0.0018382353, %v452_v35  ;;  %v499_v51 = vadd.f32 %v498_v46, %v497_v60 }
  0xbc   : > { %v2324_v41 = vmul.f32 0.0018382353, %v459_v38  ;;  %v472_v42 = vrot.slane %v471_v22, 1  ;;  %v486_v52 = vrot.slane %v485_v47, 1  ;;  %v510_v28 = vrot.slane %v2969_v27, 4 }
  0xbd   : > { %v506_v13 = vadd.f32 %v505_v43, %v504_v34  ;;  %v517_v12 = vrot.slane %v2972_v36, 4  ;;  %v524_v55 = vrot.slane %v2970_v21, 4  ;;  %v532_v9 = vmul.f32 4.0, %v2320_v44 }
  0xbe   : > { %v465_v11 = vrot.slane %v464_v14, 1  ;;  %v480_v57 = vadd.f32 %v479_v23, %v478_v4  ;;  %v2331_v18 = vmul.f32 9.0, %v2322_v49  ;;  %v511_v8 = vadd.f32 %v510_v28, %v2969_v27 }
  0xbf   : > { %v507_v33 = vrot.slane %v506_v13, 1  ;;  %v518_v16 = vadd.f32 %v517_v12, %v2972_v36  ;;  %v533_v26 = vadd.f32 %v532_v9, %v2318_v48  ;;  %v2337_v10 = vmul.f32 16.0, %v2324_v41 }
  0xc0   : > { %v487_v15 = vadd.f32 %v486_v52, %v485_v47  ;;  %v493_v5 = vrot.slane %v492_v40, 1  ;;  %v639_v7 = vmul.f32 0.0, %v2316_v39  ;;  %v2341_v30 = vmul.f32 0.0, %v2318_v48 }
  0xc1   : > { %v473_v29 = vadd.f32 %v472_v42, %v471_v22  ;;  %v500_v31 = vrot.slane %v499_v51, 1  ;;  %v525_v25 = vadd.f32 %v524_v55, %v2970_v21  ;;  %v535_v27 = vadd.f32 %v2331_v18, %v533_v26 }
  0xc2   : > { %v2345_v1 = vmul.f32 0.0018382353, %v480_v57  ;;  %v642_v36 = vadd.f32 %v2341_v30, %v639_v7  ;;  %v2349_v2 = vmul.f32 0.0, %v2320_v44  ;;  %v2352_v37 = vmul.f32 0.0, %v2322_v49 }
  0xc3   : > { %v508_v50 = vadd.f32 %v507_v33, %v506_v13  ;;  %v512_v53 = vrot.slane %v511_v8, 2  ;;  %v519_v54 = vrot.slane %v518_v16, 2  ;;  %v537_v56 = vadd.f32 %v2337_v10, %v535_v27 }
  0xc4   : > { %v466_v58 = vadd.f32 %v465_v11, %v464_v14  ;;  %v2355_v59 = vmul.f32 0.0018382353, %v487_v15  ;;  %v644_v21 = vadd.f32 %v2349_v2, %v642_v36  ;;  %v2359_v20 = vmul.f32 0.0, %v2324_v41 }
  0xc5   : > { %v2361_v60 = vmul.f32 0.0018382353, %v473_v29  ;;  %v526_v61 = vrot.slane %v525_v25, 2  ;;  %v538_v62 = vadd.f32 %v537_v56, %v2318_v48  ;;  %v2365_v63 = vmul.f32 4.0, %v2345_v1 }
  0xc6   : > { %v494_v32 = vadd.f32 %v493_v5, %v492_v40  ;;  %v501_v0 = vadd.f32 %v500_v31, %v499_v51  ;;  %v2368_v19 = vmul.f32 9.0, %v2355_v59  ;;  %v646_v3 = vadd.f32 %v2352_v37, %v644_v21 }
  0xc7   : > { %v2371_v24 = vmul.f32 0.0018382353, %v508_v50  ;;  %v513_v4 = vadd.f32 %v512_v53, %v511_v8  ;;  %v520_v6 = vadd.f32 %v519_v54, %v518_v16  ;;  %v539_v45 = vadd.f32 %v538_v62, %v2361_v60 }
  0xc8   : > { %v2374_v35 = vmul.f32 0.0036764706, %v466_v58  ;;  %v648_v17 = vadd.f32 %v2359_v20, %v646_v3  ;;  %v527_v46 = vadd.f32 %v526_v61, %v525_v25  ;;  %v592_v22 = vmul.f32 %v2316_v39, %v2316_v39 }
  0xc9   : > { %v541_v38 = vadd.f32 %v2365_v63, %v539_v45  ;;  %v2380_v47 = vmul.f32 0.0036764706, %v494_v32  ;;  %v2382_v34 = vmul.f32 0.0018382353, %v501_v0  ;;  %v654_v23 = vmul.f32 2.0, %v2320_v44 }
  0xca   : > { %v649_v14 = vadd.f32 %v648_v17, %v2318_v48  ;;  %v514_v43 = vrot.slane %v513_v4, 1  ;;  %v521_v40 = vrot.slane %v520_v6, 1  ;;  %v2388_v42 = vmul.f32 4.0, %v2371_v24 }
  0xcb   : > { %v543_v51 = vadd.f32 %v2368_v19, %v541_v38  ;;  %v2392_v13 = vmul.f32 3.0, %v2322_v49  ;;  %v683_v28 = vadd.f32 %v639_v7, %v2318_v48  ;;  %v558_v12 = vmul.f32 0.5, %v2318_v48 }
  0xcc   : > { %v650_v52 = vadd.f32 %v649_v14, %v2374_v35  ;;  %v528_v55 = vrot.slane %v527_v46, 1  ;;  %v2397_v57 = vmul.f32 4.0, %v2324_v41  ;;  %v2400_v33 = vmul.f32 0.2, %v2320_v44 }
  0xcd   : > { %v544_v11 = vadd.f32 %v543_v51, %v532_v9  ;;  %v684_v16 = vadd.f32 %v683_v28, %v654_v23  ;;  %v559_v26 = vadd.f32 %v558_v12, %v2316_v39  ;;  %v2405_v15 = vmul.f32 0.1, %v2322_v49 }
  0xce   : > { %v651_v8 = vadd.f32 %v650_v52, %v2361_v60  ;;  %v656_v7 = vmul.f32 2.0, %v2361_v60  ;;  %v2410_v9 = vmul.f32 2.0, %v2380_v47  ;;  %v2413_v29 = vmul.f32 2.0, %v2382_v34 }
  0xcf   : > { %v545_v5 = vadd.f32 %v544_v11, %v2361_v60  ;;  %v685_v25 = vadd.f32 %v684_v16, %v2392_v13  ;;  %v561_v27 = vadd.f32 %v2400_v33, %v559_v26  ;;  %v2419_v36 = vmul.f32 0.05882353, %v2324_v41 }
  0xd0   : > { %v652_v31 = vadd.f32 %v651_v8, %v2345_v1  ;;  %v515_v50 = vadd.f32 %v514_v43, %v513_v4  ;;  %v594_v54 = vmul.f32 %v2318_v48, %v2318_v48  ;;  %v2426_v56 = vmul.f32 %v2320_v44, %v2320_v44 }
  0xd1   : > { %v546_v53 = vadd.f32 %v545_v5, %v2382_v34  ;;  %v522_v58 = vadd.f32 %v521_v40, %v520_v6  ;;  %v686_v61 = vadd.f32 %v685_v25, %v2397_v57  ;;  %v563_v62 = vadd.f32 %v2405_v15, %v561_v27 }
  0xd2   : > { %v653_v21 = vadd.f32 %v652_v31, %v2355_v59  ;;  %v2431_v32 = vadd.f32 %v528_v55, %v527_v46  ;;  %v595_v3 = vadd.f32 %v594_v54, %v592_v22  ;;  %v2436_v4 = vmul.f32 %v2322_v49, %v2322_v49 }
  0xd3   : > { %v548_v0 = vadd.f32 %v2388_v42, %v546_v53  ;;  %v2439_v17 = vmul.f32 2.0, %v2371_v24  ;;  %v687_v6 = vadd.f32 %v686_v61, %v2341_v30  ;;  %v565_v38 = vadd.f32 %v2419_v36, %v563_v62 }
  0xd4   : > { %v655_v45 = vadd.f32 %v654_v23, %v653_v21  ;;  %v666_v46 = vmul.f32 3.0, %v2345_v1  ;;  %v597_v43 = vadd.f32 %v2426_v56, %v595_v3  ;;  %v2448_v22 = vmul.f32 %v2324_v41, %v2324_v41 }
  0xd5   : > { %v549_v14 = vadd.f32 %v548_v0, %v2331_v18  ;;  %v688_v23 = vadd.f32 %v687_v6, %v2374_v35  ;;  %v566_v51 = vadd.f32 %v565_v38, %v558_v12  ;;  %v568_v52 = vmul.f32 0.5, %v2361_v60 }
  0xd6   : > { %v657_v40 = vadd.f32 %v656_v7, %v655_v45  ;;  %v2452_v28 = vmul.f32 0.0036764706, %v515_v50  ;;  %v2456_v18 = vmul.f32 4.0, %v2355_v59  ;;  %v599_v55 = vadd.f32 %v2436_v4, %v597_v43 }
  0xd7   : > { %v550_v30 = vadd.f32 %v549_v14, %v2365_v63  ;;  %v689_v8 = vadd.f32 %v688_v23, %v656_v7  ;;  %v567_v16 = vadd.f32 %v566_v51, %v2374_v35  ;;  %v2462_v26 = vmul.f32 0.2, %v2345_v1 }
  0xd8   : > { %v659_v11 = vadd.f32 %v2410_v9, %v657_v40  ;;  %v2464_v12 = vmul.f32 0.0018382353, %v522_v58  ;;  %v601_v31 = vadd.f32 %v2448_v22, %v599_v55  ;;  %v603_v63 = vmul.f32 %v2374_v35, %v2374_v35 }
  0xd9   : > { %v551_v5 = vadd.f32 %v550_v30, %v2382_v34  ;;  %v690_v27 = vadd.f32 %v689_v8, %v666_v46  ;;  %v569_v50 = vadd.f32 %v568_v52, %v567_v16  ;;  %v2472_v7 = vmul.f32 0.1, %v2355_v59 }
  0xda   : > { %v661_v25 = vadd.f32 %v2413_v29, %v659_v11  ;;  %v668_v21 = vmul.f32 3.0, %v2382_v34  ;;  %v602_v58 = vadd.f32 %v601_v31, %v594_v54  ;;  %v605_v61 = vmul.f32 %v2361_v60, %v2361_v60 }
  0xdb   : > { %v552_v53 = vadd.f32 %v551_v5, %v2464_v12  ;;  %v2480_v0 = vmul.f32 3.0, %v2452_v28  ;;  %v691_v3 = vadd.f32 %v690_v27, %v2456_v18  ;;  %v571_v45 = vadd.f32 %v2462_v26, %v569_v50 }
  0xdc   : > { %v663_v62 = vadd.f32 %v2439_v17, %v661_v25  ;;  %v604_v38 = vadd.f32 %v603_v63, %v602_v58  ;;  %v2487_v14 = vmul.f32 %v2345_v1, %v2345_v1  ;;  %v924_v54 = vadd.f32 1e-08, %v2316_v39 }
  0xdd   : > { %v553_v6 = vadd.f32 %v552_v53, %v2337_v10  ;;  %v692_v40 = vadd.f32 %v691_v3, %v2349_v2  ;;  %v573_v23 = vadd.f32 %v2472_v7, %v571_v45  ;;  %v931_v51 = vadd.f32 1e-08, %v2318_v48 }
  0xde   : > { %v665_v43 = vadd.f32 %v2392_v13, %v663_v62  ;;  %v2496_v55 = vmul.f32 3.0, %v2464_v12  ;;  %v606_v10 = vadd.f32 %v605_v61, %v604_v38  ;;  %v2500_v11 = vmul.f32 %v2355_v59, %v2355_v59 }
  0xdf   : > { %v554_v30 = vadd.f32 %v553_v6, %v2368_v19  ;;  %v693_v16 = vadd.f32 %v692_v40, %v2361_v60  ;;  %v574_v13 = vadd.f32 %v573_v23, %v2400_v33  ;;  %v937_v2 = vadd.f32 1e-08, %v2320_v44 }
  0xe0   : > { %v667_v8 = vadd.f32 %v666_v46, %v665_v43  ;;  %v577_v19 = vmul.f32 0.5, %v2382_v34  ;;  %v608_v31 = vadd.f32 %v2487_v14, %v606_v10  ;;  %1488 = vlog2.f32 %v924_v54 }
  0xe1   : > { %v555_v5 = vadd.f32 %v554_v30, %v2388_v42  ;;  %v694_v25 = vadd.f32 %v693_v16, %v2410_v9  ;;  %v575_v27 = vadd.f32 %v574_v13, %v568_v52  ;;  %1490 = vlog2.f32 %v931_v51 }
  0xe2   : > { %v669_v63 = vadd.f32 %v668_v21, %v667_v8  ;;  %v2511_v50 = vmul.f32 0.2, %v2371_v24  ;;  %v610_v33 = vadd.f32 %v2500_v11, %v608_v31  ;;  %v943_v53 = vadd.f32 1e-08, %v2322_v49 }
  0xe3   : > { %v556_v46 = vadd.f32 %v555_v5, %v2464_v12  ;;  %v695_v62 = vadd.f32 %v694_v25, %v668_v21  ;;  %v576_v3 = vadd.f32 %v575_v27, %v2380_v47  ;;  %1492 = vlog2.f32 %v937_v2 }
  0xe4   : > { %v671_v58 = vadd.f32 %v2480_v0, %v669_v63  ;;  %v611_v9 = vadd.f32 %v610_v33, %v2426_v56  ;;  %v613_v52 = vmul.f32 %v2380_v47, %v2380_v47  ;;  %v2524_v54 = vmul.f32 0.0036764706, %v2431_v32 }
  0xe5   : > { %1035 = vst [vmem:[%s1957_s25 + $0x9] sm:$0x1] %v556_v46  ;;  %v696_v6 = vadd.f32 %v695_v62, %v2388_v42  ;;  %v578_v38 = vadd.f32 %v577_v19, %v576_v3  ;;  %v615_v21 = vmul.f32 %v2382_v34, %v2382_v34  ;;  %1494 = vlog2.f32 %v943_v53 }
  0xe6   : > { %v673_v45 = vadd.f32 %v2496_v55, %v671_v58  ;;  %v612_v43 = vadd.f32 %v611_v9, %v605_v61  ;;  %v679_v51 = vmul.f32 4.0, %v2464_v12  ;;  %v2534_v10 = vmul.f32 %v2371_v24, %v2371_v24 }
  0xe7   : > { %v697_v23 = vadd.f32 %v696_v6, %v2352_v37  ;;  %v580_v56 = vadd.f32 %v2511_v50, %v578_v38  ;;  %v949_v32 = vadd.f32 1e-08, %v2324_v41  ;;  %v956_v37 = vadd.f32 1e-08, %v2374_v35 }
  0xe8   : > { %v675_v40 = vadd.f32 %v2397_v57, %v673_v45  ;;  %v614_v30 = vadd.f32 %v613_v52, %v612_v43  ;;  %v2542_v13 = vmul.f32 4.0, %v2524_v54  ;;  %v2545_v2 = vmul.f32 0.5, %v2464_v12 }
  0xe9   : > { %v698_v8 = vadd.f32 %v697_v23, %v2345_v1  ;;  %v581_v57 = vadd.f32 %v580_v56, %v2405_v15  ;;  %v962_v31 = vadd.f32 1e-08, %v2361_v60  ;;  %v622_v15 = vmul.f32 %v2452_v28, %v2452_v28 }
  0xea   : > { %v677_v61 = vadd.f32 %v2456_v18, %v675_v40  ;;  %v1489_v16 = vpop.eup %1488  ;;  %v616_v5 = vadd.f32 %v615_v21, %v614_v30  ;;  %v2556_v33 = vmul.f32 %v2464_v12, %v2464_v12  ;;  %1496 = vlog2.f32 %v949_v32 }
  0xeb   : > { %v1491_v63 = vpop.eup %1490  ;;  %v699_v18 = vadd.f32 %v698_v8, %v2413_v29  ;;  %v582_v27 = vadd.f32 %v581_v57, %v2462_v26  ;;  %v968_v53 = vadd.f32 1e-08, %v2345_v1  ;;  %1498 = vlog2.f32 %v956_v37 }
  0xec   : > { %v678_v25 = vadd.f32 %v677_v61, %v2388_v42  ;;  %v618_v46 = vadd.f32 %v2534_v10, %v616_v5  ;;  %v926_v26 = vmul.f32 0.6931472, %v1489_v16  ;;  %v933_v9 = vmul.f32 0.6931472, %v1491_v63 }
  0xed   : > { %v1493_v58 = vpop.eup %1492  ;;  %v700_v42 = vadd.f32 %v699_v18, %v2480_v0  ;;  %v583_v3 = vadd.f32 %v582_v27, %v577_v19  ;;  %1500 = vlog2.f32 %v962_v31  ;;  %v974_v38 = vadd.f32 1e-08, %v2355_v59 }
  0xee   : > { %v680_v62 = vadd.f32 %v679_v51, %v678_v25  ;;  %v619_v29 = vadd.f32 %v618_v46, %v2436_v4  ;;  %v2569_v0 = vmul.f32 %v2524_v54, %v2524_v54  ;;  %v939_v19 = vmul.f32 0.6931472, %v1493_v58 }
  0xef   : > { %v701_v45 = vadd.f32 %v700_v42, %v679_v51  ;;  %v584_v6 = vadd.f32 %v583_v3, %v2452_v28  ;;  %1502 = vlog2.f32 %v968_v53  ;;  %v1495_v4 = vpop.eup %1494  ;;  %v982_v56 = vadd.f32 1e-08, %v2380_v47 }
  0xf0   : > { %v2562_v52 = vadd.f32 %v2542_v13, %v680_v62  ;;  %v620_v43 = vadd.f32 %v619_v29, %v2487_v14  ;;  %v988_v51 = vadd.f32 1e-08, %v2382_v34  ;;  %v928_v14 = vmul.f32 1.442695, %v926_v26 }
  0xf1   : > { %v702_v40 = vadd.f32 %v701_v45, %v2359_v20  ;;  %v586_v30 = vadd.f32 %v2545_v2, %v584_v6  ;;  %v934_v61 = vmul.f32 1.442695, %v933_v9  ;;  %1504 = vlog2.f32 %v974_v38 }
  0xf2   : > { %v2573_v23 = vsub.f32 0.0, %v2562_v52  ;;  %v621_v32 = vadd.f32 %v620_v43, %v615_v21  ;;  %v2582_v37 = vsub.f32 1.0, %v2562_v52  ;;  %v940_v5 = vmul.f32 1.442695, %v939_v19 }
  0xf3   : > { %v703_v8 = vadd.f32 %v702_v40, %v2355_v59  ;;  %v587_v20 = vadd.f32 %v586_v30, %v2419_v36  ;;  %v945_v31 = vmul.f32 0.6931472, %v1495_v4  ;;  %v929_v58 = vmul.f32 %v928_v14, %v2316_v39 }
  0xf4   : > { %v708_v57 = vmul.f32 %v2573_v23, %v2573_v23  ;;  %v623_v16 = vadd.f32 %v622_v15, %v621_v32  ;;  %v1497_v27 = vpop.eup %1496  ;;  %v2593_v36 = vmul.f32 %v934_v61, %v2318_v48  ;;  %v720_v3 = vmul.f32 %v2582_v37, %v2582_v37 }
  0xf5   : > { %v704_v63 = vadd.f32 %v703_v8, %v2439_v17  ;;  %v588_v46 = vadd.f32 %v587_v20, %v2472_v7  ;;  %v1499_v15 = vpop.eup %1498  ;;  %v946_v9 = vmul.f32 1.442695, %v945_v31  ;;  %1506 = vlog2.f32 %v982_v56 }
  0xf6   : > { %v709_v21 = vmul.f32 %v708_v57, %v2316_v39  ;;  %v711_v25 = vmul.f32 %v708_v57, %v2318_v48  ;;  %v713_v18 = vmul.f32 %v708_v57, %v2320_v44  ;;  %v625_v53 = vadd.f32 %v2556_v33, %v623_v16 }
  0xf7   : > { %v705_v62 = vadd.f32 %v704_v63, %v2496_v55  ;;  %v715_v42 = vmul.f32 %v708_v57, %v2322_v49  ;;  %v2599_v29 = vpop.eup %1500  ;;  %v589_v7 = vadd.f32 %v588_v46, %v2511_v50  ;;  %v717_v6 = vmul.f32 %v708_v57, %v2324_v41 }
  0xf8   : > { %v712_v17 = vadd.f32 %v711_v25, %v709_v21  ;;  %v626_v26 = vadd.f32 %v625_v53, %v2448_v22  ;;  %v2605_v38 = vmul.f32 %v940_v5, %v2320_v44  ;;  %v951_v55 = vmul.f32 0.6931472, %v1497_v27 }
  0xf9   : > { %v2607_v43 = vpop.eup %1502  ;;  %v2610_v19 = vsub.f32 2.0, %v2562_v52  ;;  %v590_v4 = vadd.f32 %v589_v7, %v2545_v2  ;;  %v936_v22 = vadd.f32 %v2593_v36, %v929_v58  ;;  %v706_v40 = vadd.f32 %v705_v62, %v2542_v13 }
  0xfa   : > { %v714_v45 = vadd.f32 %v713_v18, %v712_v17  ;;  %2993 = vst [vmem:[#allocation8_spill] sm:$0xff] %v2605_v38  ;;  %2994 = vst [vmem:[#allocation9_spill] sm:$0xff] %v2607_v43  ;;  %v627_v50 = vadd.f32 %v626_v26, %v2500_v11  ;;  %v721_v30 = vmul.f32 %v720_v3, %v2318_v48  ;;  %v2618_v32 = vadd.f32 1e-08, %v2371_v24 }
  0xfb   : > { %v591_v14 = vadd.f32 %v590_v4, %v2524_v54  ;;  %v2623_v8 = vmul.f32 %v946_v9, %v2322_v49  ;;  %1508 = vlog2.f32 %v988_v51  ;;  %v2625_v11 = vpop.eup %1504  ;;  %v723_v57 = vmul.f32 %v720_v3, %v2374_v35 }
  0xfc   : > { %v716_v56 = vadd.f32 %v715_v42, %v714_v45  ;;  %2995 = vst [vmem:[#allocation10_spill] sm:$0xff] %v2618_v32  ;;  %v628_v61 = vadd.f32 %v627_v50, %v2534_v10  ;;  %2996 = vst [vmem:[#allocation11_spill] sm:$0xff] %v2625_v11  ;;  %v952_v13 = vmul.f32 1.442695, %v951_v55  ;;  %v958_v20 = vmul.f32 0.6931472, %v1499_v15 }
  0xfd   : > { %v732_v16 = vmul.f32 %v2610_v19, %v2610_v19  ;;  %v2631_v5 = vsub.f32 3.0, %v2562_v52  ;;  %1036 = vst [vmem:[%s1957_s25 + $0xa] sm:$0x1] %v591_v14  ;;  %v2636_v31 = vadd.f32 %v2605_v38, %v936_v22  ;;  %v725_v63 = vmul.f32 %v720_v3, %v2361_v60 }
  0xfe   : > { %v718_v2 = vadd.f32 %v717_v6, %v716_v56  ;;  %v629_v10 = vadd.f32 %v628_v61, %v2556_v33  ;;  %v2639_v21 = vsub.f32 0.0, %v706_v40  ;;  %v2641_v25 = vsub.f32 1.0, %v706_v40 }
  0xff   : > { %v2646_v27 = vsub.f32 2.0, %v706_v40  ;;  %v2648_v46 = vsub.f32 3.0, %v706_v40  ;;  %v2650_v53 = vsub.f32 4.0, %v706_v40  ;;  %v727_v58 = vmul.f32 %v720_v3, %v2345_v1  ;;  %v2661_v17 = vpop.eup %1506 }
 0x100   : > { %v722_v51 = vadd.f32 %v721_v30, %v718_v2  ;;  %v2644_v18 = vadd.f32 %v2569_v0, %v629_v10  ;;  %v2655_v15 = vmul.f32 %v2639_v21, %v2639_v21  ;;  %v2659_v62 = vmul.f32 %v2641_v25, %v2641_v25  ;;  %2997 = vst [vmem:[#allocation12_spill] sm:$0xff] %v2661_v17 }
 0x101   : > { %v729_v0 = vmul.f32 %v720_v3, %v2355_v59  ;;  %v2666_v42 = vsub.f32 4.0, %v2562_v52  ;;  %v2669_v7 = vmul.f32 %v952_v13, %v2324_v41  ;;  %v2677_v6 = vmul.f32 %v2646_v27, %v2646_v27 }
 0x102   : > { %v724_v33 = vadd.f32 %v723_v57, %v722_v51  ;;  %1510 = vrsqrt.f32 %v2644_v18  ;;  %v769_v9 = vmul.f32 %v2655_v15, %v2316_v39  ;;  %v773_v45 = vmul.f32 %v2659_v62, %v2318_v48 }
 0x103   : > { %2998 = vst [vmem:[#allocation13_spill] sm:$0xff] %v2666_v42  ;;  %v744_v3 = vmul.f32 %v2631_v5, %v2631_v5  ;;  %v2683_v52 = vmul.f32 %v2648_v46, %v2648_v46  ;;  %v2687_v55 = vmul.f32 %v2650_v53, %v2650_v53  ;;  %v2689_v4 = vmul.f32 1.442695, %v958_v20 }
 0x104   : > { %v726_v26 = vadd.f32 %v725_v63, %v724_v33  ;;  %v733_v22 = vmul.f32 %v732_v16, %v2320_v44  ;;  %v774_v40 = vadd.f32 %v773_v45, %v769_v9  ;;  %v777_v56 = vmul.f32 %v2677_v6, %v2320_v44 }
 0x105   : > { %v2694_v30 = vpop.eup %1508  ;;  %v735_v14 = vmul.f32 %v732_v16, %v2361_v60  ;;  %v756_v61 = vmul.f32 %v2666_v42, %v2666_v42  ;;  %v781_v2 = vmul.f32 %v2683_v52, %v2322_v49  ;;  %v2702_v57 = vmul.f32 0.6931472, %v2599_v29 }
 0x106   : > { %v728_v50 = vadd.f32 %v727_v58, %v726_v26  ;;  %2999 = vst [vmem:[#allocation14_spill] sm:$0xff] %v2694_v30  ;;  %v737_v20 = vmul.f32 %v732_v16, %v2380_v47  ;;  %v778_v10 = vadd.f32 %v777_v56, %v774_v40  ;;  %v785_v51 = vmul.f32 %v2687_v55, %v2324_v41 }
 0x107   : > { %v739_v63 = vmul.f32 %v732_v16, %v2382_v34  ;;  %v741_v33 = vmul.f32 %v732_v16, %v2371_v24  ;;  %v745_v58 = vmul.f32 %v744_v3, %v2322_v49  ;;  %v827_v26 = vmul.f32 %v2573_v23, %v2316_v39 }
 0x108   : > { %v730_v13 = vadd.f32 %v729_v0, %v728_v50  ;;  %v747_v29 = vmul.f32 %v744_v3, %v2345_v1  ;;  %v782_v45 = vadd.f32 %v781_v2, %v778_v10  ;;  %v787_v0 = vmul.f32 %v2655_v15, %v2318_v48 }
 0x109   : > { %vm634_vm14 = vcmp.eq.f32.partialorder %v2644_v18, inf  ;;  %vm636_vm15 = vcmp.eq.f32.partialorder %v2644_v18, 0.0  ;;  %v749_v50 = vmul.f32 %v744_v3, %v2382_v34  ;;  %v751_v16 = vmul.f32 %v744_v3, %v2452_v28 }
 0x10a   : > { %v734_v9 = vadd.f32 %v733_v22, %v730_v13  ;;  %v637_v40 = vand.u32 2147483648, %v2644_v18  ;;  %v786_v42 = vadd.f32 %v785_v51, %v782_v45  ;;  %v789_v39 = vmul.f32 %v2659_v62, %v2374_v35 }
 0x10b   : > { %v791_v2 = vmul.f32 %v2677_v6, %v2361_v60  ;;  %v828_v13 = vmul.f32 %v827_v26, %v2639_v21  ;;  %v830_v10 = vmul.f32 %v2573_v23, %v2318_v48  ;;  %v833_v38 = vmul.f32 %v2573_v23, %v2320_v44 }
 0x10c   : > { %v736_v56 = vadd.f32 %v735_v14, %v734_v9  ;;  %v1511_v22 = vpop.eup %1510  ;;  %v788_v51 = vadd.f32 %v787_v0, %v786_v42  ;;  %v836_v9 = vmul.f32 %v2573_v23, %v2322_v49  ;;  %v753_v45 = vmul.f32 %v744_v3, %v2464_v12 }
 0x10d   : > { %v633_v30 = vmul.f32 %v1511_v22, %v2644_v18  ;;  %v831_v32 = vmul.f32 %v830_v10, %v2641_v25  ;;  %v834_v26 = vmul.f32 %v833_v38, %v2646_v27  ;;  %v839_v17 = vmul.f32 %v2573_v23, %v2324_v41 }
 0x10e   : > { %v738_v14 = vadd.f32 %v737_v20, %v736_v56  ;;  %v790_v43 = vadd.f32 %v789_v39, %v788_v51  ;;  %v793_v42 = vmul.f32 %v2683_v52, %v2345_v1  ;;  %v837_v0 = vmul.f32 %v836_v9, %v2648_v46 }
 0x10f   : > { %v635_v11 = vsel %vm634_vm14, %v2644_v18, %v633_v30  ;;  %v832_v3 = vadd.f32 %v831_v32, %v828_v13  ;;  %v842_v38 = vmul.f32 %v2582_v37, %v2318_v48  ;;  %v757_v56 = vmul.f32 %v756_v61, %v2324_v41 }
 0x110   : > { %v740_v22 = vadd.f32 %v739_v63, %v738_v14  ;;  %v638_v20 = vsel %vm636_vm15, %v637_v40, %v635_v11  ;;  %v792_v10 = vadd.f32 %v791_v2, %v790_v43  ;;  %v795_v30 = vmul.f32 %v2687_v55, %v2355_v59 }
 0x111   : > { %1037 = vst [vmem:[%s1957_s25 + $0xb] sm:$0x1] %v638_v20  ;;  %v759_v63 = vmul.f32 %v756_v61, %v2355_v59  ;;  %v835_v39 = vadd.f32 %v834_v26, %v832_v3  ;;  %v840_v18 = vmul.f32 %v839_v17, %v2650_v53  ;;  %v845_v32 = vmul.f32 %v2582_v37, %v2374_v35 }
 0x112   : > { %v742_v23 = vadd.f32 %v741_v33, %v740_v22  ;;  %v761_v40 = vmul.f32 %v756_v61, %v2371_v24  ;;  %v794_v48 = vadd.f32 %v793_v42, %v792_v10  ;;  %v797_v33 = vmul.f32 %v2655_v15, %v2320_v44 }
 0x113   : > { %v763_v43 = vmul.f32 %v756_v61, %v2464_v12  ;;  %v838_v2 = vadd.f32 %v837_v0, %v835_v39  ;;  %v843_v13 = vmul.f32 %v842_v38, %v2639_v21  ;;  %v848_v14 = vmul.f32 %v2582_v37, %v2361_v60 }
 0x114   : > { %v746_v11 = vadd.f32 %v745_v58, %v742_v23  ;;  %v2763_v17 = vmul.f32 %v756_v61, %v2524_v54  ;;  %v796_v9 = vadd.f32 %v795_v30, %v794_v48  ;;  %v799_v58 = vmul.f32 %v2659_v62, %v2361_v60 }
 0x115   : > { %v801_v26 = vmul.f32 %v2677_v6, %v2380_v47  ;;  %v841_v22 = vadd.f32 %v840_v18, %v838_v2  ;;  %v846_v42 = vmul.f32 %v845_v32, %v2641_v25  ;;  %v851_v20 = vmul.f32 %v2582_v37, %v2345_v1 }
 0x116   : > { %v748_v51 = vadd.f32 %v747_v29, %v746_v11  ;;  %v798_v0 = vadd.f32 %v797_v33, %v796_v9  ;;  %v803_v29 = vmul.f32 %v2683_v52, %v2382_v34  ;;  %v805_v61 = vmul.f32 %v2687_v55, %v2371_v24 }
 0x117   : > { %v807_v38 = vmul.f32 %v2655_v15, %v2322_v49  ;;  %v844_v23 = vadd.f32 %v843_v13, %v841_v22  ;;  %v849_v10 = vmul.f32 %v848_v14, %v2646_v27  ;;  %v854_v30 = vmul.f32 %v2582_v37, %v2355_v59 }
 0x118   : > { %v750_v3 = vadd.f32 %v749_v50, %v748_v51  ;;  %v800_v18 = vadd.f32 %v799_v58, %v798_v0  ;;  %v809_v50 = vmul.f32 %v2659_v62, %v2345_v1  ;;  %v811_v32 = vmul.f32 %v2677_v6, %v2382_v34 }
 0x119   : > { %v813_v11 = vmul.f32 %v2683_v52, %v2452_v28  ;;  %v847_v48 = vadd.f32 %v846_v42, %v844_v23  ;;  %v852_v33 = vmul.f32 %v851_v20, %v2648_v46  ;;  %v857_v2 = vmul.f32 %v2610_v19, %v2320_v44 }
 0x11a   : > { %v752_v39 = vadd.f32 %v751_v16, %v750_v3  ;;  %v802_v14 = vadd.f32 %v801_v26, %v800_v18  ;;  %v815_v37 = vmul.f32 %v2687_v55, %v2464_v12  ;;  %v860_v16 = vmul.f32 %v2610_v19, %v2361_v60 }
 0x11b   : > { %v850_v51 = vadd.f32 %v849_v10, %v847_v48  ;;  %v855_v9 = vmul.f32 %v854_v30, %v2650_v53  ;;  %v863_v58 = vmul.f32 %v2610_v19, %v2380_v47  ;;  %v866_v22 = vmul.f32 %v2610_v19, %v2382_v34 }
 0x11c   : > { %v754_v13 = vadd.f32 %v753_v45, %v752_v39  ;;  %v804_v20 = vadd.f32 %v803_v29, %v802_v14  ;;  %v817_v44 = vmul.f32 %v2655_v15, %v2324_v41  ;;  %v819_v45 = vmul.f32 %v2659_v62, %v2355_v59 }
 0x11d   : > { %v853_v26 = vadd.f32 %v852_v33, %v850_v51  ;;  %v858_v3 = vmul.f32 %v857_v2, %v2639_v21  ;;  %v869_v0 = vmul.f32 %v2610_v19, %v2371_v24  ;;  %v948_v23 = vadd.f32 %v2623_v8, %v2636_v31  ;;  %v3000_v2 = vld [vmem:[#allocation9_spill] sm:$0xff] }
 0x11e   : > { %v758_v42 = vadd.f32 %v757_v56, %v754_v13  ;;  %v806_v30 = vadd.f32 %v805_v61, %v804_v20  ;;  %v861_v56 = vmul.f32 %v860_v16, %v2641_v25  ;;  %v872_v29 = vmul.f32 %v2631_v5, %v2322_v49  ;;  %v3001_v49 = vld [vmem:[#allocation11_spill] sm:$0xff] }
 0x11f   : > { %v856_v15 = vadd.f32 %v855_v9, %v853_v26  ;;  %v864_v39 = vmul.f32 %v863_v58, %v2646_v27  ;;  %v867_v62 = vmul.f32 %v866_v22, %v2648_v46  ;;  %v954_v18 = vadd.f32 %v2669_v7, %v948_v23 }
 0x120   : > { %v760_v10 = vadd.f32 %v759_v63, %v758_v42  ;;  %v808_v33 = vadd.f32 %v807_v38, %v806_v30  ;;  %v960_v19 = vmul.f32 %v2689_v4, %v2374_v35  ;;  %v965_v31 = vmul.f32 1.442695, %v2702_v57  ;;  %v3002_v42 = vld [vmem:[#allocation12_spill] sm:$0xff] }
 0x121   : > { %v859_v63 = vadd.f32 %v858_v3, %v856_v15  ;;  %v955_v61 = vadd.f32 %v954_v18, %v2593_v36  ;;  %v970_v13 = vmul.f32 0.6931472, %v3000_v2  ;;  %v976_v14 = vmul.f32 0.6931472, %v3001_v49 }
 0x122   : > { %v762_v48 = vadd.f32 %v761_v40, %v760_v10  ;;  %v810_v51 = vadd.f32 %v809_v50, %v808_v33  ;;  %v875_v9 = vmul.f32 %v2631_v5, %v2345_v1  ;;  %v966_v40 = vmul.f32 %v965_v31, %v2361_v60 }
 0x123   : > { %v862_v38 = vadd.f32 %v861_v56, %v859_v63  ;;  %v961_v58 = vadd.f32 %v960_v19, %v955_v61  ;;  %v971_v22 = vmul.f32 1.442695, %v970_v13  ;;  %v977_v35 = vmul.f32 1.442695, %v976_v14  ;;  %v3005_v61 = vld [vmem:[#allocation8_spill] sm:$0xff]  ;;  %v3006_v14 = vld [vmem:[#allocation13_spill] sm:$0xff] }
 0x124   : > { %v764_v16 = vadd.f32 %v763_v43, %v762_v48  ;;  %v812_v4 = vadd.f32 %v811_v32, %v810_v51  ;;  %v821_v57 = vmul.f32 %v2677_v6, %v2371_v24  ;;  %v870_v36 = vmul.f32 %v869_v0, %v2650_v53  ;;  %v3004_v48 = vld [vmem:[#allocation14_spill] sm:$0xff] }
 0x125   : > { %v984_v20 = vmul.f32 0.6931472, %v3002_v42  ;;  %v865_v26 = vadd.f32 %v864_v39, %v862_v38  ;;  %v967_v43 = vadd.f32 %v966_v40, %v961_v58  ;;  %v2828_v50 = vmul.f32 %v971_v22, %v2345_v1  ;;  %v3003_v39 = vld [vmem:[#allocation10_spill] sm:$0xff] }
 0x126   : > { %v2831_v3 = vmul.f32 %v977_v35, %v2355_v59  ;;  %v814_v60 = vadd.f32 %v813_v11, %v812_v4  ;;  %v873_v23 = vmul.f32 %v872_v29, %v2639_v21  ;;  %v878_v32 = vmul.f32 %v2631_v5, %v2382_v34 }
 0x127   : > { %v881_v6 = vmul.f32 %v2631_v5, %v2452_v28  ;;  %v2839_v0 = vadd.f32 %v2763_v17, %v764_v16  ;;  %v868_v10 = vadd.f32 %v867_v62, %v865_v26  ;;  %v876_v30 = vmul.f32 %v875_v9, %v2641_v25 }
 0x128   : > { %v973_v1 = vadd.f32 %v2828_v50, %v967_v43  ;;  %v816_v56 = vadd.f32 %v815_v37, %v814_v60  ;;  %v985_v15 = vmul.f32 1.442695, %v984_v20  ;;  %1512 = vlog2.f32 %v3003_v39 }
 0x129   : > { %v1003_v11 = vadd.f32 1e-08, %v2452_v28  ;;  %v871_v29 = vadd.f32 %v870_v36, %v868_v10  ;;  %v990_v33 = vmul.f32 0.6931472, %v3004_v48  ;;  %v1009_v19 = vadd.f32 1e-08, %v2464_v12 }
 0x12a   : > { %v979_v18 = vadd.f32 %v2831_v3, %v973_v1  ;;  %v818_v17 = vadd.f32 %v817_v44, %v816_v56  ;;  %v823_v62 = vmul.f32 %v2683_v52, %v2464_v12  ;;  %v884_v31 = vmul.f32 %v2631_v5, %v2464_v12 }
 0x12b   : > { %1514 = vlog2.f32 %v1003_v11  ;;  %v874_v37 = vadd.f32 %v873_v23, %v871_v29  ;;  %v879_v63 = vmul.f32 %v878_v32, %v2646_v27  ;;  %v882_v49 = vmul.f32 %v881_v6, %v2648_v46 }
 0x12c   : > { %v980_v2 = vadd.f32 %v979_v18, %v3005_v61  ;;  %1516 = vlog2.f32 %v1009_v19  ;;  %v820_v13 = vadd.f32 %v819_v45, %v818_v17  ;;  %v887_v16 = vmul.f32 %v3006_v14, %v2324_v41 }
 0x12d   : > { %1518 = vrsqrt.f32 %v2839_v0  ;;  %v877_v44 = vadd.f32 %v876_v30, %v874_v37  ;;  %v986_v51 = vmul.f32 %v985_v15, %v2380_v47  ;;  %v991_v5 = vmul.f32 1.442695, %v990_v33 }
 0x12e   : > { %v981_v52 = vadd.f32 %v980_v2, %v966_v40  ;;  %v822_v9 = vadd.f32 %v821_v57, %v820_v13  ;;  %v825_v38 = vmul.f32 %v2687_v55, %v2524_v54  ;;  %v885_v22 = vmul.f32 %v884_v31, %v2650_v53 }
 0x12f   : > { %v880_v58 = vadd.f32 %v879_v63, %v877_v44  ;;  %v890_v45 = vmul.f32 %v3006_v14, %v2355_v59  ;;  %v1019_v35 = vadd.f32 1e-08, %v2524_v54  ;;  %v888_v4 = vmul.f32 %v887_v16, %v2639_v21 }
 0x130   : > { %v824_v41 = vadd.f32 %v823_v62, %v822_v9  ;;  %v893_v47 = vmul.f32 %v3006_v14, %v2371_v24  ;;  %v987_v40 = vadd.f32 %v986_v51, %v981_v52  ;;  %v992_v57 = vmul.f32 %v991_v5, %v2382_v34 }
 0x131   : > { %v883_v36 = vadd.f32 %v882_v49, %v880_v58  ;;  %v896_v20 = vmul.f32 %v3006_v14, %v2464_v12  ;;  %v891_v59 = vmul.f32 %v890_v45, %v2641_v25  ;;  %1520 = vlog2.f32 %v1019_v35 }
 0x132   : > { %v1513_v42 = vpop.eup %1512  ;;  %v826_v55 = vadd.f32 %v825_v38, %v824_v41  ;;  %v899_v21 = vmul.f32 %v3006_v14, %v2524_v54  ;;  %v894_v6 = vmul.f32 %v893_v47, %v2646_v27  ;;  %v993_v34 = vadd.f32 %v992_v57, %v987_v40 }
 0x133   : > { %v886_v26 = vadd.f32 %v885_v22, %v883_v36  ;;  %v996_v43 = vmul.f32 0.6931472, %v1513_v42  ;;  %v897_v15 = vmul.f32 %v896_v20, %v2648_v46  ;;  %vm904_vm0 = vcmp.eq.f32.partialorder %v2839_v0, inf }
 0x134   : > { %1522 = vrsqrt.f32 %v826_v55  ;;  %v900_v11 = vmul.f32 %v899_v21, %v2650_v53  ;;  %vm906_vm1 = vcmp.eq.f32.partialorder %v2839_v0, 0.0  ;;  %v907_v46 = vand.u32 2147483648, %v2839_v0 }
 0x135   : > { %v1515_v60 = vpop.eup %1514  ;;  %v889_v32 = vadd.f32 %v888_v4, %v886_v26  ;;  %v997_v10 = vmul.f32 1.442695, %v996_v43  ;;  %vm911_vm2 = vcmp.eq.f32.partialorder %v826_v55, inf  ;;  %v914_v61 = vand.u32 2147483648, %v826_v55 }
 0x136   : > { %v1517_v23 = vpop.eup %1516  ;;  %v1005_v1 = vmul.f32 0.6931472, %v1515_v60  ;;  %vm913_vm3 = vcmp.eq.f32.partialorder %v826_v55, 0.0 }
 0x137   : > { %v1519_v30 = vpop.eup %1518  ;;  %v892_v56 = vadd.f32 %v891_v59, %v889_v32  ;;  %v998_v25 = vmul.f32 %v997_v10, %v2371_v24  ;;  %v1011_v39 = vmul.f32 0.6931472, %v1517_v23 }
 0x138   : > { %v903_v18 = vmul.f32 %v1519_v30, %v2839_v0  ;;  %v1006_v33 = vmul.f32 1.442695, %v1005_v1 }
 0x139   : > { %v895_v29 = vadd.f32 %v894_v6, %v892_v56  ;;  %v999_v48 = vadd.f32 %v998_v25, %v993_v34  ;;  %v1012_v17 = vmul.f32 1.442695, %v1011_v39 }
 0x13a   : > { %v905_v31 = vsel %vm904_vm0, %v2839_v0, %v903_v18  ;;  %v1007_v37 = vmul.f32 %v1006_v33, %v2452_v28 }
 0x13b   : > { %v898_v27 = vadd.f32 %v897_v15, %v895_v29  ;;  %v1000_v19 = vadd.f32 %v999_v48, %v2623_v8  ;;  %v1521_v62 = vpop.eup %1520  ;;  %v1013_v8 = vmul.f32 %v1012_v17, %v2464_v12  ;;  %v908_v49 = vsel %vm906_vm1, %v907_v46, %v905_v31 }
 0x13c   : > { %v1021_v44 = vmul.f32 0.6931472, %v1521_v62  ;;  %vm916_vm4 = vcmp.gt.f32.partialorder %v908_v49, 1e-15 }
 0x13d   : > { %v901_v24 = vadd.f32 %v900_v11, %v898_v27  ;;  %v1001_v53 = vadd.f32 %v1000_v19, %v2828_v50 }
 0x13e   : > { %v1523_v63 = vpop.eup %1522  ;;  %v1022_v5 = vmul.f32 1.442695, %v1021_v44 }
 0x13f   : > { %v910_v2 = vmul.f32 %v1523_v63, %v826_v55  ;;  %v1002_v13 = vadd.f32 %v1001_v53, %v992_v57 }
 0x140   : > { %v1023_v12 = vmul.f32 %v1022_v5, %v2524_v54 }
 0x141   : > { %v912_v14 = vsel %vm911_vm2, %v826_v55, %v910_v2  ;;  %v1008_v16 = vadd.f32 %v1007_v37, %v1002_v13 }
 0x142   : > { %v915_v52 = vsel %vm913_vm3, %v914_v61, %v912_v14 }
 0x143   : > { %v919_v0 = vmul.f32 %v915_v52, %v908_v49  ;;  %v1014_v51 = vadd.f32 %v1013_v8, %v1008_v16  ;;  %vm917_vm5 = vcmp.gt.f32.partialorder %v915_v52, 1e-15 }
 0x144   : > { %vm918_vm6 = vmand %vm916_vm4, %vm917_vm5 }
 0x145   : > { %v920_v50 = vadd.f32 1e-30, %v919_v0  ;;  %v1015_v28 = vadd.f32 %v1014_v51, %v2669_v7 }
 0x147   : > { %1524 = vrcp.f32 %v920_v50  ;;  %v1016_v9 = vadd.f32 %v1015_v28, %v2831_v3 }
 0x149   : > { %v1017_v38 = vadd.f32 %v1016_v9, %v998_v25 }
 0x14b   : > { %v1018_v58 = vadd.f32 %v1017_v38, %v1013_v8 }
 0x14d   : > { %v1024_v22 = vadd.f32 %v1023_v12, %v1018_v58 }
 0x14f   : > { %v1025_v45 = vsub.f32 0.0, %v1024_v22 }
 0x151   : > { %v1525_v35 = vpop.eup %1524  ;;  %1039 = vst [vmem:[%s1957_s25 + $0xd] sm:$0x1] %v1025_v45 }
 0x152   : > { %v922_v7 = vmul.f32 %v1525_v35, %v901_v24 }
 0x154   : > { %v923_v54 = vsel %vm918_vm6, %v922_v7, 1.0 }
 0x155   : > { %1038 = vst [vmem:[%s1957_s25 + $0xc] sm:$0x1] %v923_v54 }
 0x156   : > { %1569 = shalt.err (!%p1566_p7)
}
 0x157   : > { %s1570_s25 = scalar_lea.hbm %s2896_s22, 256  ;;  %s1574_s28 = scalar_lea.hbm %s2944_s1, 512 }
 0x158   : > { %p1571_p8 = scmp.ne.s32.totalorder %s2896_s22, %s1570_s25  ;;  %p1575_p2 = scmp.lt.u32.totalorder %s2896_s22, %s2944_s1 }
 0x159   : > { %p1576_p6 = scmp.lt.u32.totalorder %s1574_s28, %s1570_s25  ;;  %p1578_p12 = scmp.lt.u32.totalorder %s1570_s25, %s2896_s22 }
 0x15a   : > { %p1572_p9 = pnand %p1571_p8, %p3007_p13 }
 0x15b   : > { %p1577_p11 = por %p1576_p6, %p1575_p2 }
 0x15c   : > { %p1573_p0 = pneg %p1572_p9 }
 0x15d   : > { %p1579_p4 = por %p1578_p12, %p1577_p11 }
 0x15f   : > { %p1580_p10 = pnand %p1579_p4, %p1573_p0 }
 0x161   : > { %1583 = shalt.err (!%p1580_p10)
}
 0x162   : > { %s1830_s4 = smov 128   ;;  %s1831_s5 = smov 256  }
 0x163   : > { %s1832_s11 = smov 8  }
 0x164   : > { %1235 = dma.vmem_to_hbm [thread:$0]  (%p3007_p13), %s2898_s19, 256, %s2896_s22, %s1041_s26, %s1830_s4, %s1831_s5, %s1832_s11  }
 0x165 PF: > { %s1068_s13 = sand.u32 1, %s1710_s6   ;;  %p3008_p1 = scmp.ne.s32.totalorder %s2951_s18, 0 }
 0x166   : > { %p3009_p3 = scmp.ge.s32.totalorder %s1722_s9, 2  ;;  %s1069_s14 = scalar_lea.sflag [#allocation4], %s1068_s13 }
 0x168   : > { %p1242_p5 = pnand %p3009_p3, %p3008_p1 }
 0x16a   : > { %1705 = dma.done.wait (!%p1242_p5), %s1069_s14, 256  }
 0x16b   : > { %1707 = vsyncadd (!%p1242_p5), %s1069_s14, 4294967040  ;;  %p14_p7 = scmp.ge.s32.totalorder %s1868_s12, 4   ;;  %s3010_s6 = smov %s1714_s7 }
 0x16c   : > { %s3011_s7 = smov %s1718_s8  ;;  %s3012_s8 = smov %s1880_s15 }
 0x16d   : > { %s3013_s9 = smov %s1868_s12  ;;  %16 = sbr.rel (!%p14_p7) target bundleno = 5 (0x5), region = 107 }
 0x174   :  { %1074 = vsyncpa [#allocation3], 1 }
 0x175   :  { %1076 = vsyncpa [#allocation3 + $0x1], 1 }
 0x176   :  { %1077 = vsyncpa [#allocation4], 1 }
 0x177   :  { %1079 = vsyncpa [#allocation4 + $0x1], 1 }

</bundles_post_ra>
